<compile_context>
chip_gen: v6e
topology: v6e:2x2x1
jax: 0.10.0
libtpu: 0.0.40
codegen_flags: <defaults>
</compile_context>

<pallas_src>
import functools

import numpy as np
import jax
import jax.numpy as jnp
from jax import lax
from jax.experimental import pallas as pl
from jax.experimental.pallas import tpu as pltpu


# ------------------------------ Pallas kernels ------------------------------

def _softmax_normalize(e, denom):
    """e / denom with approx reciprocal + one Newton-Raphson refinement step."""
    r = pl.reciprocal(denom, approx=True)
    r = r * (2.0 - denom * r)          # NR step -> ~fp32 accuracy, 2 cheap VALU ops
    return e * r


def _linattn_kernel_with_attn(x_cn_ref, x_nc_ref, wq_ref, bq_ref, wkv_ref,
                              bkv_ref, interp_ref, bias_ref, wout_ref, bout_ref,
                              out_ref, attn_ref, *, heads, dim_head, scale):
    """Variant that also materializes attn in the module's (B,heads,N,M) layout."""
    x_cn = x_cn_ref[0]              # (C, N)
    x_nc = x_nc_ref[0]              # (N, C) - q path needs tokens-major
    inner = heads * dim_head

    # to_qkv (1x1 conv); q tokens-major, k/v channel-major.
    q_nc = jnp.dot(x_nc, wq_ref[...],
                   preferred_element_type=jnp.float32) + bq_ref[...]          # (N, inner)
    kv_cn = jnp.dot(wkv_ref[...], x_cn,
                    preferred_element_type=jnp.float32) + bkv_ref[...]        # (2i, N)
    # Joint bilinear down-sample of k and v in ONE MXU pass (review item 2).
    kv_cm = jnp.dot(kv_cn, interp_ref[...],
                    preferred_element_type=jnp.float32)                       # (2i, M)

    wout = wout_ref[...]            # (C, inner)
    out_acc = None
    for h in range(heads):
        sl = slice(h * dim_head, (h + 1) * dim_head)
        q_h = q_nc[:, sl]                                                     # (N, d)
        k_h = kv_cm[h * dim_head:(h + 1) * dim_head]                          # (d, M)
        v_h = kv_cm[inner + h * dim_head: inner + (h + 1) * dim_head]         # (d, M)

        s = jnp.dot(q_h, k_h, preferred_element_type=jnp.float32)             # (N, M)
        s = (s + bias_ref[h]) * scale      # bias added BEFORE scale (PyTorch order)
        s = s - jnp.max(s, axis=-1, keepdims=True)
        e = jnp.exp(s)
        denom = jnp.sum(e, axis=-1, keepdims=True)                            # (N, 1)
        p = _softmax_normalize(e, denom)                                      # (N, M)
        attn_ref[0, h] = p.astype(attn_ref.dtype)

        # Reassociated epilogue: (W_out_h @ V_h) @ P^T  (fewer FLOPs, C < d),
        # accumulated per head in f32 vregs (no concat, review item 5).
        wv_h = jnp.dot(wout[:, sl], v_h, preferred_element_type=jnp.float32)  # (C, M)
        contrib = lax.dot_general(wv_h, p, (((1,), (1,)), ((), ())),
                                  preferred_element_type=jnp.float32)         # (C, N)
        out_acc = contrib if out_acc is None else out_acc + contrib

    out_ref[0] = (out_acc + bout_ref[...]).astype(out_ref.dtype)              # lane-dense store


def _linattn_kernel_no_attn(x_cn_ref, wqkv_ref, bqkv_ref, interp_t_ref,
                            bias_t_ref, wout_ref, bout_ref, out_ref,
                            *, heads, dim_head, scale):
    """Fast path: no attn writeback, single x input, lane-dense (M,N) softmax."""
    x_cn = x_cn_ref[0]              # (C, N)
    inner = heads * dim_head

    # Single fused qkv projection, channel-major (review item 3).
    qkv = jnp.dot(wqkv_ref[...], x_cn,
                  preferred_element_type=jnp.float32) + bqkv_ref[...]         # (3i, N)
    q_cn = qkv[:inner]                                                        # (i, N)
    kv_cn = qkv[inner:]                                                       # (2i, N)

    # Joint bilinear down-sample of k and v in ONE (NT) MXU pass, producing
    # tokens-major kv so per-head score matmuls are plain NN (review item 2).
    kv_mc = lax.dot_general(interp_t_ref[...], kv_cn, (((1,), (1,)), ((), ())),
                            preferred_element_type=jnp.float32)               # (M, 2i)

    wout = wout_ref[...]            # (C, inner)
    out_acc = None
    for h in range(heads):
        sl = slice(h * dim_head, (h + 1) * dim_head)
        q_h = q_cn[sl]                                                        # (d, N)
        k_h = kv_mc[:, sl]                                                    # (M, d)
        v_h = kv_mc[:, inner + h * dim_head: inner + (h + 1) * dim_head]      # (M, d)

        # Lane-dense scores / softmax: (M, N) tiles use all 128 lanes (item 4).
        s = jnp.dot(k_h, q_h, preferred_element_type=jnp.float32)             # (M, N)
        s = (s + bias_t_ref[h]) * scale
        s = s - jnp.max(s, axis=0, keepdims=True)
        e = jnp.exp(s)
        denom = jnp.sum(e, axis=0, keepdims=True)                             # (1, N)
        p = _softmax_normalize(e, denom)                                      # (M, N)

        # Reassociated epilogue: (W_out_h @ V_h) @ P, per-head accumulation.
        wv_h = lax.dot_general(wout[:, sl], v_h, (((1,), (1,)), ((), ())),
                               preferred_element_type=jnp.float32)            # (C, M)
        contrib = jnp.dot(wv_h, p, preferred_element_type=jnp.float32)        # (C, N)
        out_acc = contrib if out_acc is None else out_acc + contrib

    out_ref[0] = (out_acc + bout_ref[...]).astype(out_ref.dtype)              # lane-dense store


# ------------------------------ host-side glue ------------------------------

def _interp_matrix_align_corners(in_size, out_size):
    """1-D bilinear resampling matrix (out, in); F.interpolate(align_corners=True)."""
    if out_size == 1:
        pos = np.zeros((1,), np.float64)
    else:
        pos = np.arange(out_size, dtype=np.float64) * (in_size - 1) / (out_size - 1)
    lo = np.clip(np.floor(pos).astype(np.int64), 0, max(in_size - 2, 0))
    frac = pos - lo
    A = np.zeros((out_size, in_size), np.float64)
    A[np.arange(out_size), lo] += 1.0 - frac
    A[np.arange(out_size), np.minimum(lo + 1, in_size - 1)] += frac
    return A


def _spatial_interp_matrix(H, W, reduce_size, dtype=jnp.float32):
    """(N, M) matrix with x_flat(HW) @ A == flatten(bilinear_resize(x, (rs, rs)))."""
    Ah = _interp_matrix_align_corners(H, reduce_size)   # (rs, H)
    Aw = _interp_matrix_align_corners(W, reduce_size)   # (rs, W)
    A = np.kron(Ah, Aw)                                 # (rs*rs, H*W)
    return jnp.asarray(A.T, dtype)                      # (N, M)


def _relative_position_bias(table, rs, heads, H, W):
    """Replicates RelativePositionBias.forward(H, W); returns (heads, H*W, rs*rs)."""
    coords = np.stack(np.meshgrid(np.arange(rs), np.arange(rs), indexing='ij'))
    coords_flat = coords.reshape(2, -1)
    rel = coords_flat[:, :, None] - coords_flat[:, None, :]
    rel = rel.transpose(1, 2, 0).copy()
    rel[:, :, 0] += rs - 1
    rel[:, :, 1] += rs - 1
    rel[:, :, 0] *= 2 * rs - 1
    idx = rel.sum(-1)                                          # (rs*rs, rs*rs)
    bias = table[jnp.asarray(idx.reshape(-1))].reshape(rs, rs, rs * rs, heads)
    bias = jnp.repeat(bias, H // rs, axis=0)
    bias = jnp.repeat(bias, W // rs, axis=1)
    bias = bias.reshape(H * W, rs * rs, heads)
    return jnp.transpose(bias, (2, 0, 1))                      # (heads, N, M)


def init_params(key, dim, heads, dim_head, reduce_size):
    inner = heads * dim_head
    ks = jax.random.split(key, 7)
    return {
        # Weights stored pre-transposed / pre-split for the fused kernel.
        # Channel order within `inner` is heads-major (== PyTorch module up to a
        # fixed permutation of randomly-initialised to_qkv / to_out channels).
        'w_q':     jax.random.normal(ks[0], (dim, inner), jnp.float32) * 0.1,
        'b_q':     jax.random.normal(ks[1], (inner,), jnp.float32) * 0.1,
        'w_kv_t':  jax.random.normal(ks[2], (2 * inner, dim), jnp.float32) * 0.1,
        'b_kv':    jax.random.normal(ks[3], (2 * inner,), jnp.float32) * 0.1,
        'w_out_t': jax.random.normal(ks[4], (dim, inner), jnp.float32) * 0.1,
        'b_out':   jax.random.normal(ks[5], (dim,), jnp.float32) * 0.1,
        'rel_table': jax.random.normal(
            ks[6], ((2 * reduce_size - 1) * (2 * reduce_size - 1), heads),
            jnp.float32) * 0.02,
    }


def linear_attention_forward(x, params, *, heads, dim_head, reduce_size,
                             return_attn=True):
    """x: (B, C, H, W) NCHW. Returns (out NCHW, attn (B, heads, H*W, rs*rs) or None)."""
    B, C, H, W = x.shape
    N = H * W
    M = reduce_size * reduce_size
    inner = heads * dim_head
    scale = dim_head ** (-0.5)

    x_cn = x.reshape(B, C, N)                  # free reshape (NCHW is already C-major)
    interp = _spatial_interp_matrix(H, W, reduce_size)                        # (N, M)
    bias = _relative_position_bias(params['rel_table'], reduce_size, heads, H, W)

    cparams = pltpu.CompilerParams(dimension_semantics=("parallel",))

    if return_attn:
        # Module-faithful path: attn is materialized in (B, heads, N, M).
        x_nc = jnp.transpose(x_cn, (0, 2, 1))  # tiny one-off transpose for the q path
        kernel = functools.partial(_linattn_kernel_with_attn, heads=heads,
                                   dim_head=dim_head, scale=scale)
        out_cn, attn = pl.pallas_call(
            kernel,
            out_shape=(jax.ShapeDtypeStruct((B, C, N), jnp.float32),
                       jax.ShapeDtypeStruct((B, heads, N, M), jnp.float32)),
            grid=(B,),
            in_specs=[
                pl.BlockSpec((1, C, N), lambda b: (b, 0, 0)),       # x  (C, N)
                pl.BlockSpec((1, N, C), lambda b: (b, 0, 0)),       # x  (N, C)
                pl.BlockSpec((C, inner), lambda b: (0, 0)),         # w_q
                pl.BlockSpec((1, inner), lambda b: (0, 0)),         # b_q
                pl.BlockSpec((2 * inner, C), lambda b: (0, 0)),     # w_kv (transposed)
                pl.BlockSpec((2 * inner, 1), lambda b: (0, 0)),     # b_kv
                pl.BlockSpec((N, M), lambda b: (0, 0)),             # bilinear matrix
                pl.BlockSpec((heads, N, M), lambda b: (0, 0, 0)),   # rel-pos bias
                pl.BlockSpec((C, inner), lambda b: (0, 0)),         # w_out (transposed)
                pl.BlockSpec((C, 1), lambda b: (0, 0)),             # b_out
            ],
            out_specs=(
                pl.BlockSpec((1, C, N), lambda b: (b, 0, 0)),       # out, lane-dense
                pl.BlockSpec((1, heads, N, M), lambda b: (b, 0, 0, 0)),
            ),
            compiler_params=cparams,
        )(x_cn, x_nc,
          params['w_q'], params['b_q'].reshape(1, inner),
          params['w_kv_t'], params['b_kv'].reshape(2 * inner, 1),
          interp, bias,
          params['w_out_t'], params['b_out'].reshape(C, 1))
        return out_cn.reshape(B, C, H, W), attn

    # Fast path: no attn writeback, single x input, fused qkv, lane-dense softmax.
    w_qkv_t = jnp.concatenate([params['w_q'].T, params['w_kv_t']], axis=0)    # (3i, C)
    b_qkv = jnp.concatenate([params['b_q'], params['b_kv']], axis=0)          # (3i,)
    interp_t = jnp.transpose(interp, (1, 0))                                  # (M, N)
    bias_t = jnp.transpose(bias, (0, 2, 1))                                   # (heads, M, N)

    kernel = functools.partial(_linattn_kernel_no_attn, heads=heads,
                               dim_head=dim_head, scale=scale)
    out_cn = pl.pallas_call(
        kernel,
        out_shape=jax.ShapeDtypeStruct((B, C, N), jnp.float32),
        grid=(B,),
        in_specs=[
            pl.BlockSpec((1, C, N), lambda b: (b, 0, 0)),           # x  (C, N)
            pl.BlockSpec((3 * inner, C), lambda b: (0, 0)),         # fused w_qkv
            pl.BlockSpec((3 * inner, 1), lambda b: (0, 0)),         # fused b_qkv
            pl.BlockSpec((M, N), lambda b: (0, 0)),                 # bilinear matrix^T
            pl.BlockSpec((heads, M, N), lambda b: (0, 0, 0)),       # rel-pos bias^T
            pl.BlockSpec((C, inner), lambda b: (0, 0)),             # w_out (transposed)
            pl.BlockSpec((C, 1), lambda b: (0, 0)),                 # b_out
        ],
        out_specs=pl.BlockSpec((1, C, N), lambda b: (b, 0, 0)),     # out, lane-dense
        compiler_params=cparams,
    )(x_cn, w_qkv_t, b_qkv.reshape(3 * inner, 1), interp_t, bias_t,
      params['w_out_t'], params['b_out'].reshape(C, 1))
    return out_cn.reshape(B, C, H, W), None


# ------------------------------ pure-JAX reference ------------------------------

def linear_attention_reference(x, params, *, heads, dim_head, reduce_size):
    B, C, H, W = x.shape
    N, M = H * W, reduce_size * reduce_size
    inner = heads * dim_head
    scale = dim_head ** (-0.5)
    hp = lax.Precision.HIGHEST
    x_cn = x.reshape(B, C, N)
    q = jnp.einsum('ci,bcn->bin', params['w_q'], x_cn,
                   precision=hp) + params['b_q'][None, :, None]
    kv = jnp.einsum('oc,bcn->bon', params['w_kv_t'], x_cn,
                    precision=hp) + params['b_kv'][None, :, None]
    interp = _spatial_interp_matrix(H, W, reduce_size)
    kv_m = jnp.einsum('bon,nm->bom', kv, interp, precision=hp)
    k, v = kv_m[:, :inner], kv_m[:, inner:]
    qh = q.reshape(B, heads, dim_head, N)
    kh = k.reshape(B, heads, dim_head, M)
    vh = v.reshape(B, heads, dim_head, M)
    s = jnp.einsum('bhdn,bhdm->bhnm', qh, kh, precision=hp)
    bias = _relative_position_bias(params['rel_table'], reduce_size, heads, H, W)
    s = (s + bias[None]) * scale
    p = jax.nn.softmax(s, axis=-1)
    o = jnp.einsum('bhnm,bhdm->bhdn', p, vh, precision=hp).reshape(B, inner, N)
    out = jnp.einsum('ci,bin->bcn', params['w_out_t'], o,
                     precision=hp) + params['b_out'][None, :, None]
    return out.reshape(B, C, H, W), p


if __name__ == "__main__":
    B, dim, H, W = 2, 8, 16, 16
    heads, dim_head, reduce_size = 2, 16, 8

    key = jax.random.PRNGKey(0)
    kx, kp = jax.random.split(key)
    x = jax.random.normal(kx, (B, dim, H, W), jnp.float32)
    params = init_params(kp, dim, heads, dim_head, reduce_size)

    fwd_attn = jax.jit(functools.partial(
        linear_attention_forward, heads=heads, dim_head=dim_head,
        reduce_size=reduce_size, return_attn=True))
    fwd_fast = jax.jit(functools.partial(
        linear_attention_forward, heads=heads, dim_head=dim_head,
        reduce_size=reduce_size, return_attn=False))

    out, attn = fwd_attn(x, params)
    out_fast, _ = fwd_fast(x, params)
    jax.block_until_ready((out, attn, out_fast))

    out_ref, attn_ref = linear_attention_reference(
        x, params, heads=heads, dim_head=dim_head, reduce_size=reduce_size)

    assert out.shape == (B, dim, H, W)
    assert attn.shape == (B, heads, H * W, reduce_size * reduce_size)
    assert bool(jnp.all(jnp.isfinite(out))) and bool(jnp.all(jnp.isfinite(attn)))
    # softmax rows sum to ~1 (tight now: NR-refined reciprocal)
    row_sums = jnp.sum(attn, axis=-1)
    assert bool(jnp.all(jnp.abs(row_sums - 1.0) < 1e-3))
    # both kernel variants match the pure-JAX reference
    assert bool(jnp.allclose(attn, attn_ref, atol=5e-3, rtol=5e-2))
    assert bool(jnp.allclose(out, out_ref, atol=5e-3, rtol=5e-2))
    assert bool(jnp.allclose(out_fast, out_ref, atol=5e-3, rtol=5e-2))
    print("KERNEL_OK")
</pallas_src>

<mosaic_0001>
module attributes {stable_mosaic.version = 11 : i64} {
  func.func @_linattn_kernel_with_attn(%arg0: i32, %arg1: memref<1x8x256xf32, #tpu.memory_space<vmem>>, %arg2: memref<1x256x8xf32, #tpu.memory_space<vmem>>, %arg3: memref<8x32xf32, #tpu.memory_space<vmem>>, %arg4: memref<1x32xf32, #tpu.memory_space<vmem>>, %arg5: memref<64x8xf32, #tpu.memory_space<vmem>>, %arg6: memref<64x1xf32, #tpu.memory_space<vmem>>, %arg7: memref<256x64xf32, #tpu.memory_space<vmem>>, %arg8: memref<2x256x64xf32, #tpu.memory_space<vmem>>, %arg9: memref<8x32xf32, #tpu.memory_space<vmem>>, %arg10: memref<8x1xf32, #tpu.memory_space<vmem>>, %arg11: memref<1x8x256xf32, #tpu.memory_space<vmem>>, %arg12: memref<1x2x256x64xf32, #tpu.memory_space<vmem>>) attributes {dimension_semantics = [#tpu.dimension_semantics<parallel>], iteration_bounds = array<i64: 2>, scalar_prefetch = 0 : i64, scratch_operands = 0 : i64, tpu.core_type = #tpu.core_type<tc>, window_params = [{transform_indices = @transform_0, window_bounds = array<i64: 1, 8, 256>}, {transform_indices = @transform_1, window_bounds = array<i64: 1, 256, 8>}, {pipeline_mode = #tpu.pipeline_mode<synchronous>, transform_indices = @transform_2, window_bounds = array<i64: 8, 32>}, {pipeline_mode = #tpu.pipeline_mode<synchronous>, transform_indices = @transform_3, window_bounds = array<i64: 1, 32>}, {pipeline_mode = #tpu.pipeline_mode<synchronous>, transform_indices = @transform_4, window_bounds = array<i64: 64, 8>}, {pipeline_mode = #tpu.pipeline_mode<synchronous>, transform_indices = @transform_5, window_bounds = array<i64: 64, 1>}, {pipeline_mode = #tpu.pipeline_mode<synchronous>, transform_indices = @transform_6, window_bounds = array<i64: 256, 64>}, {pipeline_mode = #tpu.pipeline_mode<synchronous>, transform_indices = @transform_7, window_bounds = array<i64: 2, 256, 64>}, {pipeline_mode = #tpu.pipeline_mode<synchronous>, transform_indices = @transform_8, window_bounds = array<i64: 8, 32>}, {pipeline_mode = #tpu.pipeline_mode<synchronous>, transform_indices = @transform_9, window_bounds = array<i64: 8, 1>}, {transform_indices = @transform_10, window_bounds = array<i64: 1, 8, 256>}, {transform_indices = @transform_11, window_bounds = array<i64: 1, 2, 256, 64>}]} {
    %c0 = arith.constant 0 : index
    %c0_0 = arith.constant 0 : index
    %c0_1 = arith.constant 0 : index
    %0 = vector.load %arg1[%c0, %c0_0, %c0_1] : memref<1x8x256xf32, #tpu.memory_space<vmem>>, vector<1x8x256xf32>
    %1 = vector.shape_cast %0 : vector<1x8x256xf32> to vector<8x256xf32>
    %c0_2 = arith.constant 0 : index
    %c0_3 = arith.constant 0 : index
    %c0_4 = arith.constant 0 : index
    %2 = vector.load %arg2[%c0_2, %c0_3, %c0_4] : memref<1x256x8xf32, #tpu.memory_space<vmem>>, vector<1x256x8xf32>
    %3 = vector.shape_cast %2 : vector<1x256x8xf32> to vector<256x8xf32>
    %c0_5 = arith.constant 0 : index
    %c0_6 = arith.constant 0 : index
    %4 = vector.load %arg3[%c0_5, %c0_6] : memref<8x32xf32, #tpu.memory_space<vmem>>, vector<8x32xf32>
    %cst = arith.constant dense<0.000000e+00> : vector<256x32xf32>
    %5 = tpu.matmul %3, %4, %cst {dimension_numbers = #tpu.dot_dimension_numbers<[1], [0], [0], [1], [0, 0, 1, 1], [], []>} : vector<256x8xf32>, vector<8x32xf32>, vector<256x32xf32> -> vector<256x32xf32>
    %c0_7 = arith.constant 0 : index
    %c0_8 = arith.constant 0 : index
    %6 = vector.load %arg4[%c0_7, %c0_8] : memref<1x32xf32, #tpu.memory_space<vmem>>, vector<1x32xf32>
    %7 = vector.broadcast %6 : vector<1x32xf32> to vector<256x32xf32>
    %8 = arith.addf %5, %7 : vector<256x32xf32>
    %c0_9 = arith.constant 0 : index
    %c0_10 = arith.constant 0 : index
    %9 = vector.load %arg5[%c0_9, %c0_10] : memref<64x8xf32, #tpu.memory_space<vmem>>, vector<64x8xf32>
    %cst_11 = arith.constant dense<0.000000e+00> : vector<64x256xf32>
    %10 = tpu.matmul %9, %1, %cst_11 {dimension_numbers = #tpu.dot_dimension_numbers<[1], [0], [0], [1], [0, 0, 1, 1], [], []>} : vector<64x8xf32>, vector<8x256xf32>, vector<64x256xf32> -> vector<64x256xf32>
    %c0_12 = arith.constant 0 : index
    %c0_13 = arith.constant 0 : index
    %11 = vector.load %arg6[%c0_12, %c0_13] : memref<64x1xf32, #tpu.memory_space<vmem>>, vector<64x1xf32>
    %12 = vector.broadcast %11 : vector<64x1xf32> to vector<64x256xf32>
    %13 = arith.addf %10, %12 : vector<64x256xf32>
    %c0_14 = arith.constant 0 : index
    %c0_15 = arith.constant 0 : index
    %14 = vector.load %arg7[%c0_14, %c0_15] : memref<256x64xf32, #tpu.memory_space<vmem>>, vector<256x64xf32>
    %cst_16 = arith.constant dense<0.000000e+00> : vector<64x64xf32>
    %15 = tpu.matmul %13, %14, %cst_16 {dimension_numbers = #tpu.dot_dimension_numbers<[1], [0], [0], [1], [0, 0, 1, 1], [], []>} : vector<64x256xf32>, vector<256x64xf32>, vector<64x64xf32> -> vector<64x64xf32>
    %c0_17 = arith.constant 0 : index
    %c0_18 = arith.constant 0 : index
    %16 = vector.load %arg9[%c0_17, %c0_18] : memref<8x32xf32, #tpu.memory_space<vmem>>, vector<8x32xf32>
    %17 = vector.extract_strided_slice %8 {offsets = [0, 0], sizes = [256, 16], strides = [1, 1]} : vector<256x32xf32> to vector<256x16xf32>
    %18 = vector.extract_strided_slice %15 {offsets = [0, 0], sizes = [16, 64], strides = [1, 1]} : vector<64x64xf32> to vector<16x64xf32>
    %19 = vector.extract_strided_slice %15 {offsets = [32, 0], sizes = [16, 64], strides = [1, 1]} : vector<64x64xf32> to vector<16x64xf32>
    %cst_19 = arith.constant dense<0.000000e+00> : vector<256x64xf32>
    %20 = tpu.matmul %17, %18, %cst_19 {dimension_numbers = #tpu.dot_dimension_numbers<[1], [0], [0], [1], [0, 0, 1, 1], [], []>} : vector<256x16xf32>, vector<16x64xf32>, vector<256x64xf32> -> vector<256x64xf32>
    %c0_20 = arith.constant 0 : index
    %c0_21 = arith.constant 0 : index
    %c0_22 = arith.constant 0 : index
    %21 = vector.load %arg8[%c0_20, %c0_21, %c0_22] : memref<2x256x64xf32, #tpu.memory_space<vmem>>, vector<1x256x64xf32>
    %22 = vector.shape_cast %21 : vector<1x256x64xf32> to vector<256x64xf32>
    %23 = arith.addf %20, %22 : vector<256x64xf32>
    %cst_23 = arith.constant 2.500000e-01 : f32
    %24 = vector.broadcast %cst_23 : f32 to vector<256x64xf32>
    %25 = arith.mulf %23, %24 : vector<256x64xf32>
    %cst_24 = arith.constant dense<0xFF800000> : vector<256xf32>
    %26 = vector.multi_reduction <maximumf>, %25, %cst_24 [1] : vector<256x64xf32> to vector<256xf32>
    %27 = vector.shape_cast %26 : vector<256xf32> to vector<256x1xf32>
    %28 = vector.broadcast %27 : vector<256x1xf32> to vector<256x64xf32>
    %29 = arith.subf %25, %28 : vector<256x64xf32>
    %30 = math.exp %29 : vector<256x64xf32>
    %cst_25 = arith.constant dense<0.000000e+00> : vector<256xf32>
    %31 = vector.multi_reduction <add>, %30, %cst_25 [1] : vector<256x64xf32> to vector<256xf32>
    %32 = vector.shape_cast %31 : vector<256xf32> to vector<256x1xf32>
    %33 = tpu.reciprocal %32 {approx = true} : vector<256x1xf32> -> vector<256x1xf32>
    %34 = arith.mulf %32, %33 : vector<256x1xf32>
    %cst_26 = arith.constant 2.000000e+00 : f32
    %35 = vector.broadcast %cst_26 : f32 to vector<256x1xf32>
    %36 = arith.subf %35, %34 : vector<256x1xf32>
    %37 = arith.mulf %33, %36 : vector<256x1xf32>
    %38 = vector.broadcast %37 : vector<256x1xf32> to vector<256x64xf32>
    %39 = arith.mulf %30, %38 : vector<256x64xf32>
    %c0_27 = arith.constant 0 : index
    %c0_28 = arith.constant 0 : index
    %c0_29 = arith.constant 0 : index
    %c0_30 = arith.constant 0 : index
    %40 = vector.load %arg12[%c0_27, %c0_28, %c0_29, %c0_30] : memref<1x2x256x64xf32, #tpu.memory_space<vmem>>, vector<1x1x256x64xf32>
    %41 = vector.shape_cast %40 : vector<1x1x256x64xf32> to vector<256x64xf32>
    %42 = vector.shape_cast %39 : vector<256x64xf32> to vector<1x1x256x64xf32>
    tpu.vector_store %arg12[%c0_27, %c0_28, %c0_29, %c0_30], %42 {strides = array<i32>} : memref<1x2x256x64xf32, #tpu.memory_space<vmem>>, vector<1x1x256x64xf32>,
    %43 = vector.extract_strided_slice %16 {offsets = [0, 0], sizes = [8, 16], strides = [1, 1]} : vector<8x32xf32> to vector<8x16xf32>
    %cst_31 = arith.constant dense<0.000000e+00> : vector<8x64xf32>
    %44 = tpu.matmul %43, %19, %cst_31 {dimension_numbers = #tpu.dot_dimension_numbers<[1], [0], [0], [1], [0, 0, 1, 1], [], []>} : vector<8x16xf32>, vector<16x64xf32>, vector<8x64xf32> -> vector<8x64xf32>
    %cst_32 = arith.constant dense<0.000000e+00> : vector<8x256xf32>
    %45 = tpu.matmul %44, %39, %cst_32 {dimension_numbers = #tpu.dot_dimension_numbers<[1], [1], [0], [0], [0, 0, 1, 0], [], []>} : vector<8x64xf32>, vector<256x64xf32>, vector<8x256xf32> -> vector<8x256xf32>
    %46 = vector.extract_strided_slice %8 {offsets = [0, 16], sizes = [256, 16], strides = [1, 1]} : vector<256x32xf32> to vector<256x16xf32>
    %47 = vector.extract_strided_slice %15 {offsets = [16, 0], sizes = [16, 64], strides = [1, 1]} : vector<64x64xf32> to vector<16x64xf32>
    %48 = vector.extract_strided_slice %15 {offsets = [48, 0], sizes = [16, 64], strides = [1, 1]} : vector<64x64xf32> to vector<16x64xf32>
    %cst_33 = arith.constant dense<0.000000e+00> : vector<256x64xf32>
    %49 = tpu.matmul %46, %47, %cst_33 {dimension_numbers = #tpu.dot_dimension_numbers<[1], [0], [0], [1], [0, 0, 1, 1], [], []>} : vector<256x16xf32>, vector<16x64xf32>, vector<256x64xf32> -> vector<256x64xf32>
    %c1 = arith.constant 1 : index
    %c0_34 = arith.constant 0 : index
    %c0_35 = arith.constant 0 : index
    %50 = vector.load %arg8[%c1, %c0_34, %c0_35] : memref<2x256x64xf32, #tpu.memory_space<vmem>>, vector<1x256x64xf32>
    %51 = vector.shape_cast %50 : vector<1x256x64xf32> to vector<256x64xf32>
    %52 = arith.addf %49, %51 : vector<256x64xf32>
    %cst_36 = arith.constant 2.500000e-01 : f32
    %53 = vector.broadcast %cst_36 : f32 to vector<256x64xf32>
    %54 = arith.mulf %52, %53 : vector<256x64xf32>
    %cst_37 = arith.constant dense<0xFF800000> : vector<256xf32>
    %55 = vector.multi_reduction <maximumf>, %54, %cst_37 [1] : vector<256x64xf32> to vector<256xf32>
    %56 = vector.shape_cast %55 : vector<256xf32> to vector<256x1xf32>
    %57 = vector.broadcast %56 : vector<256x1xf32> to vector<256x64xf32>
    %58 = arith.subf %54, %57 : vector<256x64xf32>
    %59 = math.exp %58 : vector<256x64xf32>
    %cst_38 = arith.constant dense<0.000000e+00> : vector<256xf32>
    %60 = vector.multi_reduction <add>, %59, %cst_38 [1] : vector<256x64xf32> to vector<256xf32>
    %61 = vector.shape_cast %60 : vector<256xf32> to vector<256x1xf32>
    %62 = tpu.reciprocal %61 {approx = true} : vector<256x1xf32> -> vector<256x1xf32>
    %63 = arith.mulf %61, %62 : vector<256x1xf32>
    %cst_39 = arith.constant 2.000000e+00 : f32
    %64 = vector.broadcast %cst_39 : f32 to vector<256x1xf32>
    %65 = arith.subf %64, %63 : vector<256x1xf32>
    %66 = arith.mulf %62, %65 : vector<256x1xf32>
    %67 = vector.broadcast %66 : vector<256x1xf32> to vector<256x64xf32>
    %68 = arith.mulf %59, %67 : vector<256x64xf32>
    %c0_40 = arith.constant 0 : index
    %c1_41 = arith.constant 1 : index
    %c0_42 = arith.constant 0 : index
    %c0_43 = arith.constant 0 : index
    %69 = vector.load %arg12[%c0_40, %c1_41, %c0_42, %c0_43] : memref<1x2x256x64xf32, #tpu.memory_space<vmem>>, vector<1x1x256x64xf32>
    %70 = vector.shape_cast %69 : vector<1x1x256x64xf32> to vector<256x64xf32>
    %71 = vector.shape_cast %68 : vector<256x64xf32> to vector<1x1x256x64xf32>
    tpu.vector_store %arg12[%c0_40, %c1_41, %c0_42, %c0_43], %71 {strides = array<i32>} : memref<1x2x256x64xf32, #tpu.memory_space<vmem>>, vector<1x1x256x64xf32>,
    %72 = vector.extract_strided_slice %16 {offsets = [0, 16], sizes = [8, 16], strides = [1, 1]} : vector<8x32xf32> to vector<8x16xf32>
    %cst_44 = arith.constant dense<0.000000e+00> : vector<8x64xf32>
    %73 = tpu.matmul %72, %48, %cst_44 {dimension_numbers = #tpu.dot_dimension_numbers<[1], [0], [0], [1], [0, 0, 1, 1], [], []>} : vector<8x16xf32>, vector<16x64xf32>, vector<8x64xf32> -> vector<8x64xf32>
    %cst_45 = arith.constant dense<0.000000e+00> : vector<8x256xf32>
    %74 = tpu.matmul %73, %68, %cst_45 {dimension_numbers = #tpu.dot_dimension_numbers<[1], [1], [0], [0], [0, 0, 1, 0], [], []>} : vector<8x64xf32>, vector<256x64xf32>, vector<8x256xf32> -> vector<8x256xf32>
    %75 = arith.addf %45, %74 : vector<8x256xf32>
    %c0_46 = arith.constant 0 : index
    %c0_47 = arith.constant 0 : index
    %76 = vector.load %arg10[%c0_46, %c0_47] : memref<8x1xf32, #tpu.memory_space<vmem>>, vector<8x1xf32>
    %77 = vector.broadcast %76 : vector<8x1xf32> to vector<8x256xf32>
    %78 = arith.addf %75, %77 : vector<8x256xf32>
    %c0_48 = arith.constant 0 : index
    %c0_49 = arith.constant 0 : index
    %c0_50 = arith.constant 0 : index
    %79 = vector.load %arg11[%c0_48, %c0_49, %c0_50] : memref<1x8x256xf32, #tpu.memory_space<vmem>>, vector<1x8x256xf32>
    %80 = vector.shape_cast %79 : vector<1x8x256xf32> to vector<8x256xf32>
    %81 = vector.shape_cast %78 : vector<8x256xf32> to vector<1x8x256xf32>
    tpu.vector_store %arg11[%c0_48, %c0_49, %c0_50], %81 {strides = array<i32>} : memref<1x8x256xf32, #tpu.memory_space<vmem>>, vector<1x8x256xf32>,
    return
  }
  func.func @transform_0(%arg0: i32) -> (i32, i32, i32) {
    %c0_i32 = arith.constant 0 : i32
    %c0_i32_0 = arith.constant 0 : i32
    %c0_i32_1 = arith.constant 0 : i32
    return %arg0, %c0_i32, %c0_i32_0 : i32, i32, i32
  }
  func.func @transform_1(%arg0: i32) -> (i32, i32, i32) {
    %c0_i32 = arith.constant 0 : i32
    %c0_i32_0 = arith.constant 0 : i32
    %c0_i32_1 = arith.constant 0 : i32
    return %arg0, %c0_i32, %c0_i32_0 : i32, i32, i32
  }
  func.func @transform_2(%arg0: i32) -> (i32, i32) {
    %c0_i32 = arith.constant 0 : i32
    %c0_i32_0 = arith.constant 0 : i32
    %c0_i32_1 = arith.constant 0 : i32
    return %c0_i32, %c0_i32_0 : i32, i32
  }
  func.func @transform_3(%arg0: i32) -> (i32, i32) {
    %c0_i32 = arith.constant 0 : i32
    %c0_i32_0 = arith.constant 0 : i32
    %c0_i32_1 = arith.constant 0 : i32
    return %c0_i32, %c0_i32_0 : i32, i32
  }
  func.func @transform_4(%arg0: i32) -> (i32, i32) {
    %c0_i32 = arith.constant 0 : i32
    %c0_i32_0 = arith.constant 0 : i32
    %c0_i32_1 = arith.constant 0 : i32
    return %c0_i32, %c0_i32_0 : i32, i32
  }
  func.func @transform_5(%arg0: i32) -> (i32, i32) {
    %c0_i32 = arith.constant 0 : i32
    %c0_i32_0 = arith.constant 0 : i32
    %c0_i32_1 = arith.constant 0 : i32
    return %c0_i32, %c0_i32_0 : i32, i32
  }
  func.func @transform_6(%arg0: i32) -> (i32, i32) {
    %c0_i32 = arith.constant 0 : i32
    %c0_i32_0 = arith.constant 0 : i32
    %c0_i32_1 = arith.constant 0 : i32
    return %c0_i32, %c0_i32_0 : i32, i32
  }
  func.func @transform_7(%arg0: i32) -> (i32, i32, i32) {
    %c0_i32 = arith.constant 0 : i32
    %c0_i32_0 = arith.constant 0 : i32
    %c0_i32_1 = arith.constant 0 : i32
    %c0_i32_2 = arith.constant 0 : i32
    return %c0_i32, %c0_i32_0, %c0_i32_1 : i32, i32, i32
  }
  func.func @transform_8(%arg0: i32) -> (i32, i32) {
    %c0_i32 = arith.constant 0 : i32
    %c0_i32_0 = arith.constant 0 : i32
    %c0_i32_1 = arith.constant 0 : i32
    return %c0_i32, %c0_i32_0 : i32, i32
  }
  func.func @transform_9(%arg0: i32) -> (i32, i32) {
    %c0_i32 = arith.constant 0 : i32
    %c0_i32_0 = arith.constant 0 : i32
    %c0_i32_1 = arith.constant 0 : i32
    return %c0_i32, %c0_i32_0 : i32, i32
  }
  func.func @transform_10(%arg0: i32) -> (i32, i32, i32) {
    %c0_i32 = arith.constant 0 : i32
    %c0_i32_0 = arith.constant 0 : i32
    %c0_i32_1 = arith.constant 0 : i32
    return %arg0, %c0_i32, %c0_i32_0 : i32, i32, i32
  }
  func.func @transform_11(%arg0: i32) -> (i32, i32, i32, i32) {
    %c0_i32 = arith.constant 0 : i32
    %c0_i32_0 = arith.constant 0 : i32
    %c0_i32_1 = arith.constant 0 : i32
    %c0_i32_2 = arith.constant 0 : i32
    return %arg0, %c0_i32, %c0_i32_0, %c0_i32_1 : i32, i32, i32, i32
  }
}

</mosaic_0001>

<bundles_post_ra>
// kernel: linear_attention_forward.1
= control target key start
LH: loop header
LB: loop body
LE: loop exit
PB: predicated region body
PF: predicated region fallthrough
CT: control target
= control target key end

     0   :  { %s4477_s17 = smov 0   ;;  %s6465_s0 = inlined_call_operand.vmem [shape: f32[2,8,256], index: 0, kind: input, shape index: {}]   ;;  %s6466_s1 = inlined_call_operand.vmem [shape: f32[2,256,8], index: 1, kind: input, shape index: {}]   ;;  %s6467_s2 = inlined_call_operand.vmem [shape: f32[8,32], index: 2, kind: input, shape index: {}]   ;;  %s6468_s3 = inlined_call_operand.vmem [shape: f32[1,32], index: 3, kind: input, shape index: {}]   ;;  %s6469_s4 = inlined_call_operand.vmem [shape: f32[64,8], index: 4, kind: input, shape index: {}]   ;;  %s6470_s5 = inlined_call_operand.vmem [shape: f32[64,1], index: 5, kind: input, shape index: {}]   ;;  %s6471_s6 = inlined_call_operand.vmem [shape: f32[256,64], index: 6, kind: input, shape index: {}]   ;;  %s6472_s7 = inlined_call_operand.vmem [shape: f32[2,256,64], index: 7, kind: input, shape index: {}]   ;;  %s6473_s8 = inlined_call_operand.vmem [shape: f32[8,32], index: 8, kind: input, shape index: {}]   ;;  %s6474_s9 = inlined_call_operand.vmem [shape: f32[8,1], index: 9, kind: input, shape index: {}]   ;;  %s6475_s10 = inlined_call_operand.vmem [shape: f32[2,8,256], index: 10, kind: output, shape index: {0}]   ;;  %s6476_s11 = inlined_call_operand.vmem [shape: f32[2,2,256,64], index: 11, kind: output, shape index: {1}]  }
   0x1 LB: > { %s3478_s18 = sadd.s32 4294967295, %s4411_s17   ;;  %p3482_p0 = scmp.ge.s32.totalorder %s4411_s17, 1  ;;  %s4411_s17 = sphi %s4477_s17, %s22_s17  }
   0x2   : > { %p350_p1 = scmp.lt.s32.totalorder %s4411_s17, 3 }
   0x4   : > { %p351_p2 = pnand %p3482_p0, %p350_p1 }
   0x6   : > { %354 = sbr.rel (%p351_p2) target bundleno = 1354 (0x54a), region = 60 }
   0xb   : > { %v454_v0 = vld [vmem:[%s6467_s2] sm:$0xff]  ;;  %p400_p3 = scmp.lt.s32.totalorder %s3478_s18, 1  ;;  %v4413_v1 = vmov 0   ;;  %v794_v3 = vld [vmem:[%s6470_s5 + $0x10] sm:$0xff]  ;;  %vm462_vm0 = vcmask 64512   ;;  %v793_v4 = vld [vmem:[%s6470_s5 + $0x8] sm:$0xff] }
   0xc   : > { %3965 = vmatprep.subr.mxu0 %v454_v0  ;;  %4133 = vmatprep.subr.mxu1 %v454_v0  ;;  %v792_v2 = vld [vmem:[%s6470_s5] sm:$0xff]  ;;  %v795_v5 = vld [vmem:[%s6470_s5 + $0x18] sm:$0xff]  ;;  %v797_v17 = vld [vmem:[%s6470_s5 + $0x28] sm:$0xff]  ;;  %v4414_v41 = vmov 0.0   ;;  %s4415_s12 = smov 112   ;;  %vm1147_vm1 = vcmask 130048  }
   0xd   : > { %3966 = vmatpush3.msra.mxu0 %v454_v0  ;;  %4134 = vmatpush3.msra.mxu1 %v454_v0  ;;  %s6636_s18 = smov (!%p400_p3, %s3478_s18), 1  ;;  %v796_v16 = vld [vmem:[%s6470_s5 + $0x20] sm:$0xff]  ;;  %v798_v23 = vld [vmem:[%s6470_s5 + $0x30] sm:$0xff]  ;;  %v799_v25 = vld [vmem:[%s6470_s5 + $0x38] sm:$0xff]  ;;  %vm4416_vm2 = vmmov 0   ;;  %vm1501_vm3 = vcmask 523264  }
   0xe   : > { %4147 = vset.pattern.permute.xlu0 %v4413_v1  ;;  %4148 = vset.pattern.permute.xlu1 %v4413_v1  ;;  %s3731_s25 = sshll.u32 %s6636_s18, 8  ;;  %s3730_s14 = sshll.u32 %s6636_s18, 4  ;;  %v784_v43 = vld [vmem:[%s6469_s4] sm:$0xff]  ;;  %v785_v46 = vld [vmem:[%s6469_s4 + $0x8] sm:$0xff]  ;;  %v786_v47 = vld [vmem:[%s6469_s4 + $0x10] sm:$0xff] }
   0xf   : > { %802 = vperm.xlu0 %4147, %v792_v2   ;;  %812 = vperm.xlu1 %4148, %v794_v3   ;;  %s4500_s28 = scalar_lea.vmem %s6466_s1, %s3731_s25  ;;  %s404_s23 = scalar_lea.vmem %s6465_s0, %s3730_s14  ;;  %v787_v48 = vld [vmem:[%s6469_s4 + $0x18] sm:$0xff]  ;;  %v788_v49 = vld [vmem:[%s6469_s4 + $0x20] sm:$0xff]  ;;  %v789_v50 = vld [vmem:[%s6469_s4 + $0x28] sm:$0xff] }
  0x10   : > { %v422_v6 = vld [vmem:[%s4500_s28] sm:$0xff]  ;;  %v440_v7 = vld [vmem:[%s4500_s28 + $0x90] sm:$0xff]  ;;  %v423_v8 = vld [vmem:[%s4500_s28 + $0x8] sm:$0xff]  ;;  %s3733_s16 = sshll.u32 %s6636_s18, 9  ;;  %s414_s25 = scalar_lea.vmem %s6475_s10, %s3730_s14 }
  0x11   : > { %3967 = vmatprep.mubr.msk.f32.mxu0 %vm462_vm0, %v422_v6  ;;  %3994 = vmatprep.mubr.msk.f32.mxu1 %vm462_vm0, %v440_v7  ;;  %v441_v9 = vld [vmem:[%s4500_s28 + $0x98] sm:$0xff]  ;;  %v424_v10 = vld [vmem:[%s4500_s28 + $0x10] sm:$0xff]  ;;  %v442_v11 = vld [vmem:[%s4500_s28 + $0xa0] sm:$0xff]  ;;  %s5906_s20 = scalar_lea.vmem %s6476_s11, %s3733_s16 }
  0x12   : > { %3968 = vmatmul.mubr.msk.f32.vlgmr.msra.gmra.mxu0 %vm462_vm0, %v423_v8  ;;  %3995 = vmatmul.mubr.msk.f32.vlgmr.msra.gmra.mxu1 %vm462_vm0, %v441_v9  ;;  %v425_v12 = vld [vmem:[%s4500_s28 + $0x18] sm:$0xff]  ;;  %v443_v13 = vld [vmem:[%s4500_s28 + $0xa8] sm:$0xff]  ;;  %v426_v14 = vld [vmem:[%s4500_s28 + $0x20] sm:$0xff] }
  0x13   : > { %3970 = vmatprep.mubr.msk.f32.mxu0 %vm462_vm0, %v424_v10  ;;  %3997 = vmatprep.mubr.msk.f32.mxu1 %vm462_vm0, %v442_v11  ;;  %v444_v15 = vld [vmem:[%s4500_s28 + $0xb0] sm:$0xff]  ;;  %v427_v18 = vld [vmem:[%s4500_s28 + $0x28] sm:$0xff]  ;;  %v445_v19 = vld [vmem:[%s4500_s28 + $0xb8] sm:$0xff] }
  0x14   : > { %807 = vperm.xlu0 %4147, %v793_v4   ;;  %817 = vperm.xlu1 %4148, %v795_v5   ;;  %v428_v20 = vld [vmem:[%s4500_s28 + $0x30] sm:$0xff]  ;;  %v446_v21 = vld [vmem:[%s4500_s28 + $0xc0] sm:$0xff]  ;;  %v421_v22 = vld [vmem:[%s404_s23 + $0x8] sm:$0xff] }
  0x15   : > { %v420_v24 = vld [vmem:[%s404_s23] sm:$0xff]  ;;  %v429_v26 = vld [vmem:[%s4500_s28 + $0x38] sm:$0xff]  ;;  %v447_v27 = vld [vmem:[%s4500_s28 + $0xc8] sm:$0xff]  ;;  %894 = vmatprep.subr.mxu1 %v421_v22 }
  0x16   : > { %3971 = vmatmul.mubr.msk.f32.gmra.mxu0 %vm462_vm0, %v425_v12  ;;  %3998 = vmatmul.mubr.msk.f32.gmra.mxu1 %vm462_vm0, %v443_v13  ;;  %v430_v28 = vld [vmem:[%s4500_s28 + $0x40] sm:$0xff]  ;;  %v448_v29 = vld [vmem:[%s4500_s28 + $0xd0] sm:$0xff]  ;;  %v431_v30 = vld [vmem:[%s4500_s28 + $0x48] sm:$0xff] }
  0x17   : > { %3973 = vmatprep.mubr.msk.f32.mxu0 %vm462_vm0, %v426_v14  ;;  %4000 = vmatprep.mubr.msk.f32.mxu1 %vm462_vm0, %v444_v15  ;;  %v449_v31 = vld [vmem:[%s4500_s28 + $0xd8] sm:$0xff]  ;;  %v432_v32 = vld [vmem:[%s4500_s28 + $0x50] sm:$0xff]  ;;  %v450_v33 = vld [vmem:[%s4500_s28 + $0xe0] sm:$0xff] }
  0x18   : > { %822 = vperm.xlu0 %4147, %v796_v16   ;;  %827 = vperm.xlu1 %4148, %v797_v17   ;;  %v433_v34 = vld [vmem:[%s4500_s28 + $0x58] sm:$0xff]  ;;  %v451_v35 = vld [vmem:[%s4500_s28 + $0xe8] sm:$0xff]  ;;  %v434_v36 = vld [vmem:[%s4500_s28 + $0x60] sm:$0xff] }
  0x19   : > { %895 = vmatpush1.msra.mxu1 %v420_v24  ;;  %v452_v37 = vld [vmem:[%s4500_s28 + $0xf0] sm:$0xff]  ;;  %v435_v38 = vld [vmem:[%s4500_s28 + $0x68] sm:$0xff]  ;;  %v453_v39 = vld [vmem:[%s4500_s28 + $0xf8] sm:$0xff] }
  0x1a   : > { %3974 = vmatmul.mubr.msk.f32.gmra.mxu0 %vm462_vm0, %v427_v18  ;;  %4001 = vmatmul.mubr.msk.f32.gmra.mxu1 %vm462_vm0, %v445_v19  ;;  %v436_v40 = vld [vmem:[%s4500_s28 + $0x70] sm:$0xff]  ;;  %v437_v42 = vld [vmem:[%s4500_s28 + $0x78] sm:$0xff]  ;;  %v438_v44 = vld [vmem:[%s4500_s28 + $0x80] sm:$0xff] }
  0x1b   : > { %3976 = vmatprep.mubr.msk.f32.mxu0 %vm462_vm0, %v428_v20  ;;  %4003 = vmatprep.mubr.msk.f32.mxu1 %vm462_vm0, %v446_v21  ;;  %v439_v45 = vld [vmem:[%s4500_s28 + $0x88] sm:$0xff]  ;;  %v790_v51 = vld [vmem:[%s6469_s4 + $0x30] sm:$0xff]  ;;  %v791_v52 = vld [vmem:[%s6469_s4 + $0x38] sm:$0xff] }
  0x1c   : > { %832 = vperm.xlu0 %4147, %v798_v23   ;;  %837 = vperm.xlu1 %4148, %v799_v25   ;;  %v1008_v53 = vld [vmem:[%s6471_s6 + $0xf8] sm:$0xff]  ;;  %v1007_v55 = vld [vmem:[%s6471_s6 + $0xf0] sm:$0xff]  ;;  %v1006_v57 = vld [vmem:[%s6471_s6 + $0xe8] sm:$0xff] }
  0x1d   : > { %3767 = vmatprep.subr.mxu1 %v1008_v53  ;;  %v992_v54 = vld [vmem:[%s6471_s6 + $0x78] sm:$0xff]  ;;  %v991_v56 = vld [vmem:[%s6471_s6 + $0x70] sm:$0xff]  ;;  %v990_v58 = vld [vmem:[%s6471_s6 + $0x68] sm:$0xff] }
  0x1e   : > { %3977 = vmatmul.mubr.msk.f32.gmra.mxu0 %vm462_vm0, %v429_v26  ;;  %4004 = vmatmul.mubr.msk.f32.gmra.mxu1 %vm462_vm0, %v447_v27  ;;  %v1005_v59 = vld [vmem:[%s6471_s6 + $0xe0] sm:$0xff]  ;;  %v1004_v61 = vld [vmem:[%s6471_s6 + $0xd8] sm:$0xff]  ;;  %v1003_v63 = vld [vmem:[%s6471_s6 + $0xd0] sm:$0xff] }
  0x1f   : > { %3979 = vmatprep.mubr.msk.f32.mxu0 %vm462_vm0, %v430_v28  ;;  %4006 = vmatprep.mubr.msk.f32.mxu1 %vm462_vm0, %v448_v29  ;;  %v989_v60 = vld [vmem:[%s6471_s6 + $0x60] sm:$0xff]  ;;  %v988_v62 = vld [vmem:[%s6471_s6 + $0x58] sm:$0xff]  ;;  %v987_v0 = vld [vmem:[%s6471_s6 + $0x50] sm:$0xff] }
  0x20   : > { %v1002_v1 = vld [vmem:[%s6471_s6 + $0xc8] sm:$0xff]  ;;  %v1001_v3 = vld [vmem:[%s6471_s6 + $0xc0] sm:$0xff]  ;;  %v1000_v5 = vld [vmem:[%s6471_s6 + $0xb8] sm:$0xff] }
  0x21   : > { %v986_v2 = vld [vmem:[%s6471_s6 + $0x48] sm:$0xff]  ;;  %v985_v4 = vld [vmem:[%s6471_s6 + $0x40] sm:$0xff]  ;;  %v984_v6 = vld [vmem:[%s6471_s6 + $0x38] sm:$0xff] }
  0x22   : > { %3980 = vmatmul.mubr.msk.f32.gmra.mxu0 %vm462_vm0, %v431_v30  ;;  %4007 = vmatmul.mubr.msk.f32.gmra.mxu1 %vm462_vm0, %v449_v31  ;;  %v999_v7 = vld [vmem:[%s6471_s6 + $0xb0] sm:$0xff]  ;;  %v998_v9 = vld [vmem:[%s6471_s6 + $0xa8] sm:$0xff]  ;;  %v997_v11 = vld [vmem:[%s6471_s6 + $0xa0] sm:$0xff] }
  0x23   : > { %3982 = vmatprep.mubr.msk.f32.mxu0 %vm462_vm0, %v432_v32  ;;  %4009 = vmatprep.mubr.msk.f32.mxu1 %vm462_vm0, %v450_v33  ;;  %v983_v8 = vld [vmem:[%s6471_s6 + $0x30] sm:$0xff]  ;;  %v982_v10 = vld [vmem:[%s6471_s6 + $0x28] sm:$0xff]  ;;  %v981_v12 = vld [vmem:[%s6471_s6 + $0x20] sm:$0xff] }
  0x24   : > { %v996_v13 = vld [vmem:[%s6471_s6 + $0x98] sm:$0xff]  ;;  %v995_v15 = vld [vmem:[%s6471_s6 + $0x90] sm:$0xff]  ;;  %v994_v17 = vld [vmem:[%s6471_s6 + $0x88] sm:$0xff] }
  0x25   : > { %v980_v14 = vld [vmem:[%s6471_s6 + $0x18] sm:$0xff]  ;;  %v979_v16 = vld [vmem:[%s6471_s6 + $0x10] sm:$0xff]  ;;  %v978_v18 = vld [vmem:[%s6471_s6 + $0x8] sm:$0xff] }
  0x26   : > { %3983 = vmatmul.mubr.msk.f32.gmra.mxu0 %vm462_vm0, %v433_v34  ;;  %4010 = vmatmul.mubr.msk.f32.gmra.mxu1 %vm462_vm0, %v451_v35  ;;  %v993_v19 = vld [vmem:[%s6471_s6 + $0x80] sm:$0xff] }
  0x27   : > { %3985 = vmatprep.mubr.msk.f32.mxu0 %vm462_vm0, %v434_v36  ;;  %4012 = vmatprep.mubr.msk.f32.mxu1 %vm462_vm0, %v452_v37  ;;  %v977_v20 = vld [vmem:[%s6471_s6] sm:$0xff] }
  0x28   : > { %v4730_v21 = vld [vmem:[%s6468_s3] ss:$0 sm:$0xff] }
  0x2a   : > { %3986 = vmatmul.mubr.msk.f32.gmra.mxu0 %vm462_vm0, %v435_v38  ;;  %4013 = vmatmul.mubr.msk.f32.gmra.mxu1 %vm462_vm0, %v453_v39 }
  0x2b   : > { %3988 = vmatprep.mubr.msk.f32.mxu0 %vm462_vm0, %v436_v40  ;;  %928 = vmatprep.mubr.f32.mxu1 %v4414_v41 }
  0x2e   : > { %3989 = vmatmul.mubr.msk.f32.gmra.mxu0 %vm462_vm0, %v437_v42  ;;  %3524 = vmatmul.mubr.msk.f32.vlgmr.msra.gmra.mxu1 %vm462_vm0, %v784_v43 }
  0x2f   : > { %3991 = vmatprep.mubr.msk.f32.mxu0 %vm462_vm0, %v438_v44  ;;  %934 = vmatprep.mubr.f32.mxu1 %v4414_v41 }
  0x30   : > { %3768 = vmatpush3.msra.mxu1 %v992_v54 }
  0x31   : > { %3769 = vmatprep.subr.mxu1 %v1007_v55 }
  0x32   : > { %3992 = vmatmul.mubr.msk.f32.gmra.mxu0 %vm462_vm0, %v439_v45  ;;  %3525 = vmatmul.mubr.msk.f32.gmra.mxu1 %vm462_vm0, %v785_v46 }
  0x33   : > { %940 = vmatprep.mubr.f32.mxu1 %v4414_v41  ;;  %3770 = vmatpush3.msra.mxu1 %v991_v56 }
  0x34   : > { %3771 = vmatprep.subr.mxu1 %v1006_v57 }
  0x35   : > { %3772 = vmatpush3.msra.mxu1 %v990_v58 }
  0x36   : > { %3526 = vmatmul.mubr.msk.f32.gmra.mxu1 %vm462_vm0, %v786_v47  ;;  %3773 = vmatprep.subr.mxu1 %v1005_v59 }
  0x37   : > { %946 = vmatprep.mubr.f32.mxu1 %v4414_v41  ;;  %3774 = vmatpush3.msra.mxu1 %v989_v60 }
  0x38   : > { %3775 = vmatprep.subr.mxu1 %v1004_v61 }
  0x39   : > { %3776 = vmatpush3.msra.mxu1 %v988_v62 }
  0x3a   : > { %3527 = vmatmul.mubr.msk.f32.gmra.mxu1 %vm462_vm0, %v787_v48  ;;  %3777 = vmatprep.subr.mxu1 %v1003_v63 }
  0x3b   : > { %952 = vmatprep.mubr.f32.mxu1 %v4414_v41  ;;  %3778 = vmatpush3.msra.mxu1 %v987_v0 }
  0x3c   : > { %3779 = vmatprep.subr.mxu1 %v1002_v1 }
  0x3d   : > { %3780 = vmatpush3.msra.mxu1 %v986_v2 }
  0x3e   : > { %3528 = vmatmul.mubr.msk.f32.gmra.mxu1 %vm462_vm0, %v788_v49  ;;  %3781 = vmatprep.subr.mxu1 %v1001_v3 }
  0x3f   : > { %958 = vmatprep.mubr.f32.mxu1 %v4414_v41  ;;  %3782 = vmatpush3.msra.mxu1 %v985_v4 }
  0x40   : > { %3783 = vmatprep.subr.mxu1 %v1000_v5 }
  0x41   : > { %3784 = vmatpush3.msra.mxu1 %v984_v6 }
  0x42   : > { %3529 = vmatmul.mubr.msk.f32.gmra.mxu1 %vm462_vm0, %v789_v50  ;;  %3785 = vmatprep.subr.mxu1 %v999_v7 }
  0x43   : > { %964 = vmatprep.mubr.f32.mxu1 %v4414_v41  ;;  %3786 = vmatpush3.msra.mxu1 %v983_v8 }
  0x44   : > { %3787 = vmatprep.subr.mxu1 %v998_v9 }
  0x45   : > { %3788 = vmatpush3.msra.mxu1 %v982_v10 }
  0x46   : > { %3530 = vmatmul.mubr.msk.f32.gmra.mxu1 %vm462_vm0, %v790_v51  ;;  %3789 = vmatprep.subr.mxu1 %v997_v11 }
  0x47   : > { %970 = vmatprep.mubr.f32.mxu1 %v4414_v41  ;;  %3790 = vmatpush3.msra.mxu1 %v981_v12 }
  0x48   : > { %3791 = vmatprep.subr.mxu1 %v996_v13 }
  0x49   : > { %3792 = vmatpush3.msra.mxu1 %v980_v14 }
  0x4a   : > { %3531 = vmatmul.mubr.msk.f32.gmra.mxu1 %vm462_vm0, %v791_v52  ;;  %3793 = vmatprep.subr.mxu1 %v995_v15 }
  0x4b   : > { %3794 = vmatpush3.msra.mxu1 %v979_v16 }
  0x4c   : > { %3795 = vmatprep.subr.mxu1 %v994_v17 }
  0x4d   : > { %3796 = vmatpush3.msra.mxu1 %v978_v18 }
  0x4e   : > { %3797 = vmatprep.subr.mxu1 %v993_v19 }
  0x4f   : > { %3798 = vmatpush3.msra.mxu1 %v977_v20 }
  0x50   : > { %4067 = vmatprep.subr.mxu1 %v4414_v41 }
  0x8a   : > { %v803_v0 = vpop.permute.xlu0 %802  ;;  %v813_v18 = vpop.permute.xlu1 %812 }
  0x8f   : > { %v808_v12 = vpop.permute.xlu0 %807 }
  0xd2   : > { %v3969_v22 = vpop.f32.mrf.mxu0  ;;  %v4732_v23 = vpop.f32.mrf.mxu1 }
  0xd3   : > { %v4735_v24 = vadd.f32 %v3969_v22, %v4730_v21  ;;  %v4848_v22 = vadd.f32 %v4732_v23, %v4730_v21 }
  0xd4   : > { %v625_v25 = vpop.f32.mrf.mxu0  ;;  %v4737_v26 = vpop.f32.mrf.mxu1 }
  0xd5   : > { %v626_v27 = vadd.f32 %v4730_v21, %v625_v25  ;;  %2090 = vrot.lane.b32.xlu1 %v4735_v24, %s4415_s12 }
  0xd6   : > { %v3972_v28 = vpop.f32.mrf.mxu0  ;;  %v4742_v29 = vpop.f32.mrf.mxu1 }
  0xd7   : > { %v4745_v30 = vadd.f32 %v3972_v28, %v4730_v21  ;;  %2088 = vrot.lane.b32.xlu0 %v626_v27, %s4415_s12  ;;  %4019 = vmatprep.mubr.msk.f32.mxu0 %vm1147_vm1, %v626_v27  ;;  %v4854_v27 = vadd.f32 %v4730_v21, %v4737_v26  ;;  %v4860_v23 = vadd.f32 %v4742_v29, %v4730_v21 }
  0xd8   : > { %v635_v31 = vpop.f32.mrf.mxu0  ;;  %v4748_v32 = vpop.f32.mrf.mxu1 }
  0xd9   : > { %v4751_v33 = vadd.f32 %v4730_v21, %v635_v31  ;;  %2094 = vrot.lane.b32.xlu1 %v4745_v30, %s4415_s12  ;;  %v4866_v26 = vadd.f32 %v4730_v21, %v4748_v32 }
  0xda   : > { %v3975_v34 = vpop.f32.mrf.mxu0  ;;  %v4755_v35 = vpop.f32.mrf.mxu1 }
  0xdb   : > { %v4758_v36 = vadd.f32 %v3975_v34, %v4730_v21  ;;  %2092 = vrot.lane.b32.xlu0 %v4751_v33, %s4415_s12  ;;  %v4872_v29 = vadd.f32 %v4755_v35, %v4730_v21 }
  0xdc   : > { %v645_v37 = vpop.f32.mrf.mxu0  ;;  %v4762_v38 = vpop.f32.mrf.mxu1 }
  0xdd   : > { %v4765_v39 = vadd.f32 %v4730_v21, %v645_v37  ;;  %2098 = vrot.lane.b32.xlu1 %v4758_v36, %s4415_s12  ;;  %v818_v37 = vpop.permute.xlu1 %817  ;;  %v4878_v32 = vadd.f32 %v4730_v21, %v4762_v38 }
  0xde   : > { %v3978_v40 = vpop.f32.mrf.mxu0  ;;  %v4769_v42 = vpop.f32.mrf.mxu1 }
  0xdf   : > { %v4773_v43 = vadd.f32 %v3978_v40, %v4730_v21  ;;  %2096 = vrot.lane.b32.xlu0 %v4765_v39, %s4415_s12  ;;  %v4884_v35 = vadd.f32 %v4769_v42, %v4730_v21 }
  0xe0   : > { %v655_v44 = vpop.f32.mrf.mxu0  ;;  %v4777_v45 = vpop.f32.mrf.mxu1 }
  0xe1   : > { %v4780_v46 = vadd.f32 %v4730_v21, %v655_v44  ;;  %2102 = vrot.lane.b32.xlu1 %v4773_v43, %s4415_s12  ;;  %v4890_v38 = vadd.f32 %v4730_v21, %v4777_v45 }
  0xe2   : > { %v3981_v47 = vpop.f32.mrf.mxu0  ;;  %v4784_v48 = vpop.f32.mrf.mxu1 }
  0xe3   : > { %v4787_v49 = vadd.f32 %v3981_v47, %v4730_v21  ;;  %2100 = vrot.lane.b32.xlu0 %v4780_v46, %s4415_s12  ;;  %v4896_v42 = vadd.f32 %v4784_v48, %v4730_v21 }
  0xe4   : > { %v665_v50 = vpop.f32.mrf.mxu0  ;;  %v4791_v51 = vpop.f32.mrf.mxu1 }
  0xe5   : > { %v4794_v52 = vadd.f32 %v4730_v21, %v665_v50  ;;  %2106 = vrot.lane.b32.xlu1 %v4787_v49, %s4415_s12  ;;  %v4902_v45 = vadd.f32 %v4730_v21, %v4791_v51 }
  0xe6   : > { %v3984_v53 = vpop.f32.mrf.mxu0  ;;  %v4798_v54 = vpop.f32.mrf.mxu1 }
  0xe7   : > { %v4801_v55 = vadd.f32 %v3984_v53, %v4730_v21  ;;  %2104 = vrot.lane.b32.xlu0 %v4794_v52, %s4415_s12  ;;  %v823_v53 = vpop.permute.xlu0 %822  ;;  %v4908_v48 = vadd.f32 %v4798_v54, %v4730_v21 }
  0xe8   : > { %v675_v56 = vpop.f32.mrf.mxu0  ;;  %v4805_v57 = vpop.f32.mrf.mxu1 }
  0xe9   : > { %v4808_v58 = vadd.f32 %v4730_v21, %v675_v56  ;;  %2110 = vrot.lane.b32.xlu1 %v4801_v55, %s4415_s12  ;;  %v4914_v51 = vadd.f32 %v4730_v21, %v4805_v57  ;;  %v1114_v57 = vld [vmem:[%s6473_s8] sm:$0xff] }
  0xea   : > { %v3987_v59 = vpop.f32.mrf.mxu0  ;;  %v4812_v60 = vpop.f32.mrf.mxu1 }
  0xeb   : > { %v4815_v61 = vadd.f32 %v3987_v59, %v4730_v21  ;;  %2108 = vrot.lane.b32.xlu0 %v4808_v58, %s4415_s12  ;;  %v4920_v54 = vadd.f32 %v4812_v60, %v4730_v21 }
  0xec   : > { %v685_v62 = vpop.f32.mrf.mxu0  ;;  %v4819_v63 = vpop.f32.mrf.mxu1 }
  0xed   : > { %v4822_v1 = vadd.f32 %v4730_v21, %v685_v62  ;;  %2114 = vrot.lane.b32.xlu1 %v4815_v61, %s4415_s12 }
  0xee   : > { %v3990_v2 = vpop.f32.mrf.mxu0  ;;  %v930_v3 = vpop.f32.mrf.mxu1 }
  0xef   : > { %v4827_v4 = vadd.f32 %v3990_v2, %v4730_v21  ;;  %2112 = vrot.lane.b32.xlu0 %v4822_v1, %s4415_s12  ;;  %v931_v9 = vadd.f32 %v930_v3, %v803_v0  ;;  %v828_v2 = vpop.permute.xlu1 %827 }
  0xf0   : > { %v695_v5 = vpop.f32.mrf.mxu0  ;;  %v932_v6 = vpop.f32.mrf.mxu1 }
  0xf1   : > { %v4832_v7 = vadd.f32 %v4730_v21, %v695_v5  ;;  %v933_v8 = vadd.f32 %v932_v6, %v803_v0  ;;  %2118 = vrot.lane.b32.xlu1 %v4827_v4, %s4415_s12 }
  0xf2   : > { %v3993_v10 = vpop.f32.mrf.mxu0  ;;  %v936_v11 = vpop.f32.mrf.mxu1 }
  0xf3   : > { %v4837_v13 = vadd.f32 %v3993_v10, %v4730_v21  ;;  %2116 = vrot.lane.b32.xlu0 %v4832_v7, %s4415_s12  ;;  %1073 = vmatprep.mubr.f32.mxu1 %v933_v8  ;;  %v937_v19 = vadd.f32 %v936_v11, %v808_v12 }
  0xf4   : > { %v705_v14 = vpop.f32.mrf.mxu0  ;;  %v938_v15 = vpop.f32.mrf.mxu1  ;;  %1074 = vmatmul.mubr.f32.vlgmr.msra.gmra.mxu1 %v931_v9 }
  0xf5   : > { %v4842_v16 = vadd.f32 %v4730_v21, %v705_v14  ;;  %v939_v17 = vadd.f32 %v938_v15, %v808_v12  ;;  %2122 = vrot.lane.b32.xlu1 %v4837_v13, %s4415_s12  ;;  %v833_v9 = vpop.permute.xlu0 %832  ;;  %v838_v15 = vpop.permute.xlu1 %837 }
  0xf6   : > { %v942_v20 = vpop.f32.mrf.mxu1 }
  0xf7   : > { %2120 = vrot.lane.b32.xlu0 %v4842_v16, %s4415_s12  ;;  %1078 = vmatprep.mubr.f32.mxu1 %v939_v17  ;;  %v943_v31 = vadd.f32 %v942_v20, %v813_v18  ;;  %v4926_v20 = vadd.f32 %v4730_v21, %v4819_v63 }
  0xf8   : > { %v944_v25 = vpop.f32.mrf.mxu1  ;;  %1079 = vmatmul.mubr.f32.gmra.mxu1 %v937_v19 }
  0xf9   : > { %v945_v28 = vadd.f32 %v944_v25, %v813_v18  ;;  %2126 = vrot.lane.b32.xlu1 %v4848_v22, %s4415_s12 }
  0xfa   : > { %v948_v34 = vpop.f32.mrf.mxu1 }
  0xfb   : > { %2124 = vrot.lane.b32.xlu0 %v4854_v27, %s4415_s12  ;;  %1083 = vmatprep.mubr.f32.mxu1 %v945_v28  ;;  %v949_v47 = vadd.f32 %v948_v34, %v818_v37 }
  0xfc   : > { %v950_v40 = vpop.f32.mrf.mxu1  ;;  %1084 = vmatmul.mubr.f32.gmra.mxu1 %v943_v31 }
  0xfd   : > { %v951_v44 = vadd.f32 %v950_v40, %v818_v37  ;;  %2130 = vrot.lane.b32.xlu1 %v4860_v23, %s4415_s12 }
  0xfe   : > { %v954_v50 = vpop.f32.mrf.mxu1 }
  0xff   : > { %2128 = vrot.lane.b32.xlu0 %v4866_v26, %s4415_s12  ;;  %1088 = vmatprep.mubr.f32.mxu1 %v951_v44  ;;  %v955_v62 = vadd.f32 %v954_v50, %v823_v53 }
 0x100   : > { %v956_v56 = vpop.f32.mrf.mxu1  ;;  %1089 = vmatmul.mubr.f32.gmra.mxu1 %v949_v47 }
 0x101   : > { %v957_v59 = vadd.f32 %v956_v56, %v823_v53  ;;  %2134 = vrot.lane.b32.xlu1 %v4872_v29, %s4415_s12 }
 0x102   : > { %v960_v0 = vpop.f32.mrf.mxu1 }
 0x103   : > { %2132 = vrot.lane.b32.xlu0 %v4878_v32, %s4415_s12  ;;  %1093 = vmatprep.mubr.f32.mxu1 %v957_v59  ;;  %v961_v6 = vadd.f32 %v960_v0, %v828_v2 }
 0x104   : > { %v962_v3 = vpop.f32.mrf.mxu1  ;;  %1094 = vmatmul.mubr.f32.gmra.mxu1 %v955_v62 }
 0x105   : > { %v963_v5 = vadd.f32 %v962_v3, %v828_v2  ;;  %2138 = vrot.lane.b32.xlu1 %v4884_v35, %s4415_s12 }
 0x106   : > { %v966_v8 = vpop.f32.mrf.mxu1 }
 0x107   : > { %2136 = vrot.lane.b32.xlu0 %v4890_v38, %s4415_s12  ;;  %1098 = vmatprep.mubr.f32.mxu1 %v963_v5  ;;  %v967_v12 = vadd.f32 %v966_v8, %v833_v9 }
 0x108   : > { %v968_v10 = vpop.f32.mrf.mxu1  ;;  %1099 = vmatmul.mubr.f32.gmra.mxu1 %v961_v6 }
 0x109   : > { %v969_v11 = vadd.f32 %v968_v10, %v833_v9  ;;  %2142 = vrot.lane.b32.xlu1 %v4896_v42, %s4415_s12 }
 0x10a   : > { %v972_v14 = vpop.f32.mrf.mxu1 }
 0x10b   : > { %2140 = vrot.lane.b32.xlu0 %v4902_v45, %s4415_s12  ;;  %1103 = vmatprep.mubr.f32.mxu1 %v969_v11  ;;  %v973_v19 = vadd.f32 %v972_v14, %v838_v15 }
 0x10c   : > { %v974_v17 = vpop.f32.mrf.mxu1  ;;  %1104 = vmatmul.mubr.f32.gmra.mxu1 %v967_v12 }
 0x10d   : > { %v975_v18 = vadd.f32 %v974_v17, %v838_v15  ;;  %2146 = vrot.lane.b32.xlu1 %v4908_v48, %s4415_s12 }
 0x10f   : > { %2144 = vrot.lane.b32.xlu0 %v4914_v51, %s4415_s12  ;;  %1108 = vmatprep.mubr.f32.mxu1 %v975_v18  ;;  %v1118_v18 = vld [vmem:[%s6472_s7 + $0x18] sm:$0xff] }
 0x110   : > { %1109 = vmatmul.mubr.f32.gmra.mxu1 %v973_v19 }
 0x111   : > { %2150 = vrot.lane.b32.xlu1 %v4920_v54, %s4415_s12  ;;  %4071 = vmatprep.mubr.msk.f32.mxu1 %vm4416_vm2, %v4414_v41 }
 0x113   : > { %2148 = vrot.lane.b32.xlu0 %v4926_v20, %s4415_s12 }
 0x117   : > { %2954 = vrot.lane.b32.xlu0 %v1114_v57, %s4415_s12 }
 0x147   : > { %v2091_v21 = vpop.permute.xlu1 %2090 }
 0x149   : > { %v2089_v60 = vpop.permute.xlu0 %2088 }
 0x14b   : > { %v2095_v37 = vpop.permute.xlu1 %2094 }
 0x14d   : > { %v2093_v28 = vpop.permute.xlu0 %2092 }
 0x14f   : > { %v2099_v59 = vpop.permute.xlu1 %2098 }
 0x151   : > { %v2097_v50 = vpop.permute.xlu0 %2096 }
 0x153   : > { %v2103_v5 = vpop.permute.xlu1 %2102 }
 0x155   : > { %v2101_v0 = vpop.permute.xlu0 %2100 }
 0x157   : > { %v2107_v10 = vpop.permute.xlu1 %2106 }
 0x1b4   : > { %v3799_v25 = vpop.f32.mrf.mxu1 }
 0x1b6   : > { %v3800_v63 = vpop.f32.mrf.mxu1 }
 0x1b7   : > { %v3801_v47 = vadd.f32 %v3800_v63, %v3799_v25 }
 0x1b8   : > { %v3802_v31 = vpop.f32.mrf.mxu1 }
 0x1ba   : > { %v3803_v34 = vpop.f32.mrf.mxu1 }
 0x1bb   : > { %v3804_v40 = vadd.f32 %v3803_v34, %v3802_v31  ;;  %v1122_v34 = vld [vmem:[%s6472_s7 + $0x38] sm:$0xff] }
 0x1bc   : > { %v3805_v44 = vpop.f32.mrf.mxu1 }
 0x1bd   : > { %4015 = vmatprep.subr.mxu0 %v3804_v40 }
 0x1be   : > { %v3806_v53 = vpop.f32.mrf.mxu1  ;;  %4016 = vmatpush3.msra.mxu0 %v3804_v40 }
 0x1bf   : > { %4017 = vmatprep.subr.mxu0 %v3801_v47  ;;  %v3807_v12 = vadd.f32 %v3806_v53, %v3805_v44 }
 0x1c0   : > { %v3808_v56 = vpop.f32.mrf.mxu1  ;;  %4018 = vmatpush3.msra.mxu0 %v3801_v47 }
 0x1c1   : > { %4020 = vmatmul.mubr.msk.f32.vlgmr.msra.gmra.mxu0 %vm1147_vm1, %v4735_v24  ;;  %4126 = vmatprep.subr.mxu0 %v4414_v41  ;;  %v2105_v24 = vpop.permute.xlu0 %2104 }
 0x1c2   : > { %v3809_v62 = vpop.f32.mrf.mxu1  ;;  %4022 = vmatprep.mubr.msk.f32.mxu0 %vm1147_vm1, %v4751_v33 }
 0x1c4   : > { %v3811_v2 = vpop.f32.mrf.mxu1 }
 0x1c5   : > { %4023 = vmatmul.mubr.msk.f32.gmra.mxu0 %vm1147_vm1, %v4745_v30  ;;  %v3810_v30 = vadd.f32 %v3809_v62, %v3808_v56 }
 0x1c6   : > { %v3812_v3 = vpop.f32.mrf.mxu1  ;;  %4025 = vmatprep.mubr.msk.f32.mxu0 %vm1147_vm1, %v4765_v39 }
 0x1c7   : > { %v3813_v11 = vadd.f32 %v3812_v3, %v3811_v2 }
 0x1c8   : > { %v3814_v6 = vpop.f32.mrf.mxu1 }
 0x1c9   : > { %4026 = vmatmul.mubr.msk.f32.gmra.mxu0 %vm1147_vm1, %v4758_v36  ;;  %v2109_v36 = vpop.permute.xlu0 %2108 }
 0x1ca   : > { %v3815_v8 = vpop.f32.mrf.mxu1  ;;  %4028 = vmatprep.mubr.msk.f32.mxu0 %vm1147_vm1, %v4780_v46  ;;  %v2111_v46 = vpop.permute.xlu1 %2110 }
 0x1cb   : > { %v3816_v33 = vadd.f32 %v3815_v8, %v3814_v6 }
 0x1cc   : > { %v3817_v9 = vpop.f32.mrf.mxu1 }
 0x1cd   : > { %4029 = vmatmul.mubr.msk.f32.gmra.mxu0 %vm1147_vm1, %v4773_v43  ;;  %4068 = vmatpush3.msra.mxu1 %v3816_v33  ;;  %v2113_v15 = vpop.permute.xlu0 %2112 }
 0x1ce   : > { %v3818_v39 = vpop.f32.mrf.mxu1  ;;  %4031 = vmatprep.mubr.msk.f32.mxu0 %vm1147_vm1, %v4794_v52  ;;  %4069 = vmatprep.subr.mxu1 %v4414_v41 }
 0x1cf   : > { %4070 = vmatpush3.msra.mxu1 %v3813_v11 }
 0x1d0   : > { %v3820_v14 = vpop.f32.mrf.mxu1  ;;  %4072 = vmatmul.mubr.msk.f32.vlgmr.msra.gmra.mxu1 %vm1147_vm1, %v1114_v57  ;;  %4074 = vmatprep.subr.mxu1 %v3810_v30  ;;  %v1120_v57 = vld [vmem:[%s6472_s7 + $0x28] sm:$0xff] }
 0x1d1   : > { %4032 = vmatmul.mubr.msk.f32.gmra.mxu0 %vm1147_vm1, %v4787_v49  ;;  %4075 = vmatpush3.msra.mxu1 %v3810_v30  ;;  %v3819_v49 = vadd.f32 %v3818_v39, %v3817_v9 }
 0x1d2   : > { %v3821_v43 = vpop.f32.mrf.mxu1  ;;  %4034 = vmatprep.mubr.msk.f32.mxu0 %vm1147_vm1, %v4808_v58  ;;  %4076 = vmatprep.subr.mxu1 %v3807_v12  ;;  %v2115_v58 = vpop.permute.xlu1 %2114 }
 0x1d3   : > { %v3822_v52 = vadd.f32 %v3821_v43, %v3820_v14  ;;  %4077 = vmatpush3.msra.mxu1 %v3807_v12  ;;  %4078 = vmatprep.mubr.msk.f32.mxu1 %vm1147_vm1, %v2089_v60  ;;  %v1123_v12 = vld [vmem:[%s6472_s7 + $0x40] sm:$0xff] }
 0x1d4   : > { %4079 = vmatmul.mubr.msk.f32.vlgmr.msra.gmra.mxu1 %vm1147_vm1, %v2091_v21  ;;  %v1119_v21 = vld [vmem:[%s6472_s7 + $0x20] sm:$0xff] }
 0x1d5   : > { %4035 = vmatmul.mubr.msk.f32.gmra.mxu0 %vm1147_vm1, %v4801_v55  ;;  %4081 = vmatprep.mubr.msk.f32.mxu1 %vm1147_vm1, %v2093_v28  ;;  %v2117_v55 = vpop.permute.xlu0 %2116 }
 0x1d6   : > { %4127 = vmatpush3.msra.mxu0 %v3822_v52  ;;  %4037 = vmatprep.mubr.msk.f32.mxu0 %vm1147_vm1, %v4822_v1  ;;  %v2119_v1 = vpop.permute.xlu1 %2118 }
 0x1d7   : > { %4128 = vmatprep.subr.mxu0 %v4414_v41 }
 0x1d8   : > { %4129 = vmatpush3.msra.mxu0 %v3819_v49  ;;  %4082 = vmatmul.mubr.msk.f32.gmra.mxu1 %vm1147_vm1, %v2095_v37 }
 0x1d9   : > { %4038 = vmatmul.mubr.msk.f32.gmra.mxu0 %vm1147_vm1, %v4815_v61  ;;  %4084 = vmatprep.mubr.msk.f32.mxu1 %vm1147_vm1, %v2097_v50  ;;  %v2121_v61 = vpop.permute.xlu0 %2120 }
 0x1da   : > { %4040 = vmatprep.mubr.msk.f32.mxu0 %vm1147_vm1, %v4832_v7 }
 0x1dc   : > { %4085 = vmatmul.mubr.msk.f32.gmra.mxu1 %vm1147_vm1, %v2099_v59  ;;  %v1121_v59 = vld [vmem:[%s6472_s7 + $0x30] sm:$0xff] }
 0x1dd   : > { %4041 = vmatmul.mubr.msk.f32.gmra.mxu0 %vm1147_vm1, %v4827_v4  ;;  %4087 = vmatprep.mubr.msk.f32.mxu1 %vm1147_vm1, %v2101_v0  ;;  %v2123_v4 = vpop.permute.xlu1 %2122  ;;  %v2125_v7 = vpop.permute.xlu0 %2124 }
 0x1de   : > { %4043 = vmatprep.mubr.msk.f32.mxu0 %vm1147_vm1, %v4842_v16 }
 0x1e0   : > { %4088 = vmatmul.mubr.msk.f32.gmra.mxu1 %vm1147_vm1, %v2103_v5 }
 0x1e1   : > { %4044 = vmatmul.mubr.msk.f32.gmra.mxu0 %vm1147_vm1, %v4837_v13  ;;  %4090 = vmatprep.mubr.msk.f32.mxu1 %vm1147_vm1, %v2105_v24  ;;  %v2127_v13 = vpop.permute.xlu1 %2126  ;;  %v2129_v16 = vpop.permute.xlu0 %2128  ;;  %v1124_v24 = vld [vmem:[%s6472_s7 + $0x48] sm:$0xff] }
 0x1e2   : > { %4046 = vmatprep.mubr.msk.f32.mxu0 %vm1147_vm1, %v4854_v27 }
 0x1e4   : > { %4091 = vmatmul.mubr.msk.f32.gmra.mxu1 %vm1147_vm1, %v2107_v10 }
 0x1e5   : > { %4047 = vmatmul.mubr.msk.f32.gmra.mxu0 %vm1147_vm1, %v4848_v22  ;;  %4093 = vmatprep.mubr.msk.f32.mxu1 %vm1147_vm1, %v2109_v36  ;;  %v2131_v22 = vpop.permute.xlu1 %2130  ;;  %v2133_v27 = vpop.permute.xlu0 %2132  ;;  %v3568_v36 = vld [vmem:[%s6472_s7 + $0x118] sm:$0xff] }
 0x1e6   : > { %4049 = vmatprep.mubr.msk.f32.mxu0 %vm1147_vm1, %v4866_v26 }
 0x1e8   : > { %4094 = vmatmul.mubr.msk.f32.gmra.mxu1 %vm1147_vm1, %v2111_v46 }
 0x1e9   : > { %4050 = vmatmul.mubr.msk.f32.gmra.mxu0 %vm1147_vm1, %v4860_v23  ;;  %4096 = vmatprep.mubr.msk.f32.mxu1 %vm1147_vm1, %v2113_v15  ;;  %v2135_v23 = vpop.permute.xlu1 %2134  ;;  %v2137_v26 = vpop.permute.xlu0 %2136 }
 0x1ea   : > { %4052 = vmatprep.mubr.msk.f32.mxu0 %vm1147_vm1, %v4878_v32 }
 0x1ec   : > { %4097 = vmatmul.mubr.msk.f32.gmra.mxu1 %vm1147_vm1, %v2115_v58 }
 0x1ed   : > { %4053 = vmatmul.mubr.msk.f32.gmra.mxu0 %vm1147_vm1, %v4872_v29  ;;  %4099 = vmatprep.mubr.msk.f32.mxu1 %vm1147_vm1, %v2117_v55  ;;  %v2139_v29 = vpop.permute.xlu1 %2138  ;;  %v2141_v32 = vpop.permute.xlu0 %2140 }
 0x1ee   : > { %4055 = vmatprep.mubr.msk.f32.mxu0 %vm1147_vm1, %v4890_v38 }
 0x1f0   : > { %4100 = vmatmul.mubr.msk.f32.gmra.mxu1 %vm1147_vm1, %v2119_v1  ;;  %v3570_v1 = vld [vmem:[%s6472_s7 + $0x128] sm:$0xff] }
 0x1f1   : > { %4056 = vmatmul.mubr.msk.f32.gmra.mxu0 %vm1147_vm1, %v4884_v35  ;;  %4102 = vmatprep.mubr.msk.f32.mxu1 %vm1147_vm1, %v2121_v61  ;;  %v2143_v35 = vpop.permute.xlu1 %2142  ;;  %v2145_v38 = vpop.permute.xlu0 %2144  ;;  %v1126_v61 = vld [vmem:[%s6472_s7 + $0x58] sm:$0xff] }
 0x1f2   : > { %4058 = vmatprep.mubr.msk.f32.mxu0 %vm1147_vm1, %v4902_v45 }
 0x1f4   : > { %4103 = vmatmul.mubr.msk.f32.gmra.mxu1 %vm1147_vm1, %v2123_v4 }
 0x1f5   : > { %4059 = vmatmul.mubr.msk.f32.gmra.mxu0 %vm1147_vm1, %v4896_v42  ;;  %4105 = vmatprep.mubr.msk.f32.mxu1 %vm1147_vm1, %v2125_v7  ;;  %v2147_v42 = vpop.permute.xlu1 %2146  ;;  %v2149_v45 = vpop.permute.xlu0 %2148 }
 0x1f6   : > { %4061 = vmatprep.mubr.msk.f32.mxu0 %vm1147_vm1, %v4914_v51 }
 0x1f8   : > { %4106 = vmatmul.mubr.msk.f32.gmra.mxu1 %vm1147_vm1, %v2127_v13 }
 0x1f9   : > { %4062 = vmatmul.mubr.msk.f32.gmra.mxu0 %vm1147_vm1, %v4908_v48  ;;  %4108 = vmatprep.mubr.msk.f32.mxu1 %vm1147_vm1, %v2129_v16  ;;  %v2955_v48 = vpop.permute.xlu0 %2954  ;;  %v3569_v16 = vld [vmem:[%s6472_s7 + $0x120] sm:$0xff] }
 0x1fa   : > { %4064 = vmatprep.mubr.msk.f32.mxu0 %vm1147_vm1, %v4926_v20 }
 0x1fc   : > { %4109 = vmatmul.mubr.msk.f32.gmra.mxu1 %vm1147_vm1, %v2131_v22 }
 0x1fd   : > { %4065 = vmatmul.mubr.msk.f32.gmra.mxu0 %vm1147_vm1, %v4920_v54  ;;  %4111 = vmatprep.mubr.msk.f32.mxu1 %vm1147_vm1, %v2133_v27 }
 0x1fe   : > { %4130 = vmatprep.mubr.msk.f32.mxu0 %vm4416_vm2, %v4414_v41  ;;  %v2151_v41 = vpop.permute.xlu1 %2150 }
 0x200   : > { %4112 = vmatmul.mubr.msk.f32.gmra.mxu1 %vm1147_vm1, %v2135_v23 }
 0x201   : > { %4114 = vmatprep.mubr.msk.f32.mxu1 %vm1147_vm1, %v2137_v26  ;;  %4131 = vmatmul.mubr.msk.f32.vlgmr.msra.gmra.mxu0 %vm1147_vm1, %v2955_v48 }
 0x204   : > { %4115 = vmatmul.mubr.msk.f32.gmra.mxu1 %vm1147_vm1, %v2139_v29 }
 0x205   : > { %4117 = vmatprep.mubr.msk.f32.mxu1 %vm1147_vm1, %v2141_v32 }
 0x208   : > { %4118 = vmatmul.mubr.msk.f32.gmra.mxu1 %vm1147_vm1, %v2143_v35 }
 0x209   : > { %4120 = vmatprep.mubr.msk.f32.mxu1 %vm1147_vm1, %v2145_v38  ;;  %v3572_v38 = vld [vmem:[%s6472_s7 + $0x138] sm:$0xff] }
 0x20c   : > { %4121 = vmatmul.mubr.msk.f32.gmra.mxu1 %vm1147_vm1, %v2147_v42  ;;  %v1125_v42 = vld [vmem:[%s6472_s7 + $0x50] sm:$0xff] }
 0x20d   : > { %4123 = vmatprep.mubr.msk.f32.mxu1 %vm1147_vm1, %v2149_v45 }
 0x210   : > { %4124 = vmatmul.mubr.msk.f32.gmra.mxu1 %vm1147_vm1, %v2151_v41 }
 0x281   : > { %v5039_v17 = vpop.f32.mrf.mxu0 }
 0x283   : > { %v5041_v51 = vpop.f32.mrf.mxu0 }
 0x285   : > { %v4024_v19 = vpop.f32.mrf.mxu0 }
 0x286   : > { %v1326_v54 = vadd.f32 %v4024_v19, %v1118_v18 }
 0x287   : > { %v5046_v20 = vpop.f32.mrf.mxu0 }
 0x288   : > { %v5051_v60 = vmul.f32 0.25, %v1326_v54 }
 0x289   : > { %v4027_v25 = vpop.f32.mrf.mxu0 }
 0x28a   : > { %6529 = vst [vmem:[#allocation2_spill] sm:$0xff] %v5051_v60  ;;  %v1336_v63 = vadd.f32 %v4027_v25, %v1120_v57  ;;  %v1511_v28 = vsel %vm1501_vm3, %v5051_v60, -inf }
 0x28b   : > { %1512 = vmax.xlane.f32.xlu0 %v1511_v28  ;;  %v1330_v31 = vpop.f32.mrf.mxu0 }
 0x28c   : > { %v5061_v37 = vmul.f32 0.25, %v1336_v63  ;;  %v1331_v40 = vadd.f32 %v1330_v31, %v1119_v21  ;;  %v3571_v31 = vld [vmem:[%s6472_s7 + $0x130] sm:$0xff] }
 0x28d   : > { %v4030_v44 = vpop.f32.mrf.mxu0 }
 0x28e   : > { %v5063_v47 = vmul.f32 0.25, %v1331_v40  ;;  %v1346_v50 = vadd.f32 %v4030_v44, %v1122_v34  ;;  %v1517_v53 = vsel %vm1501_vm3, %v5061_v37, -inf  ;;  %v1128_v40 = vld [vmem:[%s6472_s7 + $0x68] sm:$0xff] }
 0x28f   : > { %1518 = vmax.xlane.f32.xlu0 %v1517_v53  ;;  %v1340_v56 = vpop.f32.mrf.mxu0 }
 0x290   : > { %v5070_v62 = vpop.f32.mrf.mxu1  ;;  %v5074_v2 = vmul.f32 0.25, %v1346_v50  ;;  %v1341_v3 = vadd.f32 %v1340_v56, %v1121_v59  ;;  %v1514_v6 = vsel %vm1501_vm3, %v5063_v47, -inf }
 0x291   : > { %6530 = vst [vmem:[#allocation3_spill] sm:$0xff] %v5070_v62  ;;  %v4033_v0 = vpop.f32.mrf.mxu0  ;;  %3963 = vmatprep.mubr.msk.f32.mxu0 %vm1501_vm3, %v5070_v62 }
 0x292   : > { %v4073_v5 = vpop.f32.mrf.mxu1  ;;  %v5083_v10 = vmul.f32 0.25, %v1341_v3  ;;  %v1356_v11 = vadd.f32 %v4033_v0, %v1124_v24  ;;  %v1523_v39 = vsel %vm1501_vm3, %v5074_v2, -inf }
 0x293   : > { %v1350_v8 = vpop.f32.mrf.mxu0  ;;  %1515 = vmax.xlane.f32.xlu0 %v1514_v6  ;;  %v3574_v6 = vld [vmem:[%s6472_s7 + $0x148] sm:$0xff] }
 0x294   : > { %v5081_v33 = vpop.f32.mrf.mxu1  ;;  %v5095_v15 = vmul.f32 0.25, %v1356_v11  ;;  %v1351_v49 = vadd.f32 %v1350_v8, %v1123_v12  ;;  %v1520_v55 = vsel %vm1501_vm3, %v5083_v10, -inf }
 0x295   : > { %v4036_v9 = vpop.f32.mrf.mxu0 }
 0x296   : > { %v5085_v30 = vpop.f32.mrf.mxu1  ;;  %v5114_v26 = vmul.f32 0.25, %v1351_v49  ;;  %v1366_v29 = vadd.f32 %v4036_v9, %v1126_v61  ;;  %v1529_v35 = vsel %vm1501_vm3, %v5095_v15, -inf  ;;  %v1127_v9 = vld [vmem:[%s6472_s7 + $0x60] sm:$0xff]  ;;  %v1130_v61 = vld [vmem:[%s6472_s7 + $0x78] sm:$0xff] }
 0x297   : > { %v1360_v14 = vpop.f32.mrf.mxu0  ;;  %1524 = vmax.xlane.f32.xlu0 %v1523_v39  ;;  %v3573_v49 = vld [vmem:[%s6472_s7 + $0x140] sm:$0xff] }
 0x298   : > { %v4083_v43 = vpop.f32.mrf.mxu1  ;;  %v5132_v21 = vmul.f32 0.25, %v1366_v29  ;;  %v1361_v63 = vadd.f32 %v1360_v14, %v1125_v42  ;;  %v1526_v34 = vsel %vm1501_vm3, %v5114_v26, -inf }
 0x299   : > { %v2298_v46 = vadd.f32 %v4083_v43, %v3568_v36  ;;  %v4039_v52 = vpop.f32.mrf.mxu0 }
 0x29a   : > { %v5097_v58 = vpop.f32.mrf.mxu1  ;;  %v5148_v3 = vmul.f32 0.25, %v1361_v63  ;;  %v1376_v5 = vadd.f32 %v4039_v52, %v1128_v40  ;;  %v1535_v8 = vsel %vm1501_vm3, %v5132_v21, -inf }
 0x29b   : > { %v5107_v4 = vmul.f32 0.25, %v2298_v46  ;;  %v1370_v7 = vpop.f32.mrf.mxu0  ;;  %1521 = vmax.xlane.f32.xlu0 %v1520_v55 }
 0x29c   : > { %v4086_v13 = vpop.f32.mrf.mxu1  ;;  %v5164_v46 = vmul.f32 0.25, %v1376_v5  ;;  %v1371_v52 = vadd.f32 %v1370_v7, %v1127_v9 }
 0x29d   : > { %6531 = vst [vmem:[#allocation4_spill] sm:$0xff] %v5107_v4  ;;  %v2308_v22 = vadd.f32 %v4086_v13, %v3570_v1  ;;  %v4042_v27 = vpop.f32.mrf.mxu0  ;;  %v2482_v23 = vsel %vm1501_vm3, %v5107_v4, -inf  ;;  %v1532_v1 = vsel %vm1501_vm3, %v5148_v3, -inf }
 0x29e   : > { %2483 = vmax.xlane.f32.xlu1 %v2482_v23  ;;  %v2302_v32 = vpop.f32.mrf.mxu1  ;;  %v5178_v29 = vmul.f32 0.25, %v1371_v52 }
 0x29f   : > { %v5124_v45 = vmul.f32 0.25, %v2308_v22  ;;  %v2303_v41 = vadd.f32 %v3569_v16, %v2302_v32  ;;  %v1380_v48 = vpop.f32.mrf.mxu0  ;;  %1530 = vmax.xlane.f32.xlu0 %v1529_v35  ;;  %v1386_v32 = vadd.f32 %v4042_v27, %v1130_v61  ;;  %v3576_v35 = vld [vmem:[%s6472_s7 + $0x158] sm:$0xff] }
 0x2a0   : > { %v4089_v18 = vpop.f32.mrf.mxu1 }
 0x2a1   : > { %6532 = vst [vmem:[#allocation5_spill] sm:$0xff] %v5124_v45  ;;  %v5126_v19 = vmul.f32 0.25, %v2303_v41  ;;  %v2318_v54 = vadd.f32 %v4089_v18, %v3572_v38  ;;  %v5128_v57 = vpop.f32.mrf.mxu0  ;;  %v2488_v25 = vsel %vm1501_vm3, %v5124_v45, -inf  ;;  %v1541_v41 = vsel %vm1501_vm3, %v5164_v46, -inf  ;;  %v1129_v18 = vld [vmem:[%s6472_s7 + $0x70] sm:$0xff] }
 0x2a2   : > { %2489 = vmax.xlane.f32.xlu1 %v2488_v25  ;;  %v2312_v28 = vpop.f32.mrf.mxu1 }
 0x2a3   : > { %6533 = vst [vmem:[#allocation6_spill] sm:$0xff] %v5126_v19  ;;  %v5142_v44 = vpop.f32.mrf.mxu0  ;;  %1527 = vmax.xlane.f32.xlu0 %v1526_v34  ;;  %v5144_v53 = vmul.f32 0.25, %v2318_v54  ;;  %v2313_v56 = vadd.f32 %v3571_v31, %v2312_v28  ;;  %v2485_v0 = vsel %vm1501_vm3, %v5126_v19, -inf  ;;  %v5192_v28 = vmul.f32 0.25, %v1386_v32  ;;  %v3575_v34 = vld [vmem:[%s6472_s7 + $0x150] sm:$0xff]  ;;  %v3577_v32 = vld [vmem:[%s6472_s7 + $0x160] sm:$0xff] }
 0x2a4   : > { %v4092_v50 = vpop.f32.mrf.mxu1  ;;  %v1381_v31 = vadd.f32 %v1380_v48, %v1129_v18 }
 0x2a5   : > { %v4048_v59 = vpop.f32.mrf.mxu0  ;;  %v5160_v36 = vmul.f32 0.25, %v2313_v56  ;;  %v2328_v12 = vadd.f32 %v4092_v50, %v3574_v6  ;;  %v2494_v43 = vsel %vm1501_vm3, %v5144_v53, -inf  ;;  %v1538_v56 = vsel %vm1501_vm3, %v5178_v29, -inf }
 0x2a6   : > { %v2322_v24 = vpop.f32.mrf.mxu1  ;;  %2486 = vmax.xlane.f32.xlu1 %v2485_v0  ;;  %v1134_v0 = vld [vmem:[%s6472_s7 + $0x98] sm:$0xff]  ;;  %v1547_v52 = vsel %vm1501_vm3, %v5192_v28, -inf }
 0x2a7   : > { %v5158_v11 = vpop.f32.mrf.mxu0  ;;  %1536 = vmax.xlane.f32.xlu0 %v1535_v8  ;;  %6534 = vst [vmem:[#allocation7_spill] sm:$0xff] %v5160_v36  ;;  %v5174_v22 = vmul.f32 0.25, %v2328_v12  ;;  %v2323_v23 = vadd.f32 %v3573_v49, %v2322_v24  ;;  %v2491_v7 = vsel %vm1501_vm3, %v5160_v36, -inf  ;;  %v5208_v8 = vmul.f32 0.25, %v1381_v31  ;;  %v1136_v49 = vld [vmem:[%s6472_s7 + $0xa8] sm:$0xff] }
 0x2a8   : > { %v4095_v39 = vpop.f32.mrf.mxu1  ;;  %v1406_v9 = vadd.f32 %v4048_v59, %v1134_v0  ;;  %v3580_v0 = vld [vmem:[%s6472_s7 + $0x178] sm:$0xff] }
 0x2a9   : > { %v4051_v14 = vpop.f32.mrf.mxu0  ;;  %v5188_v25 = vmul.f32 0.25, %v2323_v23  ;;  %v2338_v63 = vadd.f32 %v4095_v39, %v3576_v35  ;;  %v2500_v27 = vsel %vm1501_vm3, %v5174_v22, -inf  ;;  %v3578_v39 = vld [vmem:[%s6472_s7 + $0x168] sm:$0xff]  ;;  %v1544_v18 = vsel %vm1501_vm3, %v5208_v8, -inf }
 0x2aa   : > { %v2332_v55 = vpop.f32.mrf.mxu1  ;;  %2495 = vmax.xlane.f32.xlu1 %v2494_v43  ;;  %v5224_v23 = vmul.f32 0.25, %v1406_v9  ;;  %v1138_v9 = vld [vmem:[%s6472_s7 + $0xb8] sm:$0xff] }
 0x2ab   : > { %v1410_v13 = vpop.f32.mrf.mxu0  ;;  %1533 = vmax.xlane.f32.xlu0 %v1532_v1  ;;  %v5204_v6 = vmul.f32 0.25, %v2338_v63  ;;  %v2333_v48 = vadd.f32 %v3575_v34, %v2332_v55  ;;  %v2497_v24 = vsel %vm1501_vm3, %v5188_v25, -inf }
 0x2ac   : > { %v4098_v16 = vpop.f32.mrf.mxu1  ;;  %6535 = vst [vmem:[#allocation8_spill] sm:$0xff] %v5224_v23 }
 0x2ad   : > { %v4054_v38 = vpop.f32.mrf.mxu0  ;;  %v5220_v1 = vmul.f32 0.25, %v2333_v48  ;;  %v2348_v59 = vadd.f32 %v4098_v16, %v3578_v39  ;;  %v2506_v61 = vsel %vm1501_vm3, %v5204_v6, -inf  ;;  %v1135_v16 = vld [vmem:[%s6472_s7 + $0xa0] sm:$0xff] }
 0x2ae   : > { %v2342_v42 = vpop.f32.mrf.mxu1  ;;  %2492 = vmax.xlane.f32.xlu1 %v2491_v7  ;;  %v1416_v7 = vadd.f32 %v4051_v14, %v1136_v49 }
 0x2af   : > { %1542 = vmax.xlane.f32.xlu0 %v1541_v41  ;;  %v1420_v40 = vpop.f32.mrf.mxu0  ;;  %v2343_v14 = vadd.f32 %v3577_v32, %v2342_v42  ;;  %v2503_v31 = vsel %vm1501_vm3, %v5220_v1, -inf }
 0x2b0   : > { %v4101_v54 = vpop.f32.mrf.mxu1  ;;  %v5240_v34 = vmul.f32 0.25, %v1416_v7 }
 0x2b1   : > { %v4057_v12 = vpop.f32.mrf.mxu0  ;;  %v5250_v39 = vmul.f32 0.25, %v2343_v14 }
 0x2b2   : > { %v2352_v50 = vpop.f32.mrf.mxu1  ;;  %2501 = vmax.xlane.f32.xlu1 %v2500_v27  ;;  %v5236_v27 = vmul.f32 0.25, %v2348_v59  ;;  %v1426_v59 = vadd.f32 %v4054_v38, %v1138_v9  ;;  %v1565_v32 = vsel %vm1501_vm3, %v5240_v34, -inf }
 0x2b3   : > { %1539 = vmax.xlane.f32.xlu0 %v1538_v56  ;;  %v1430_v35 = vpop.f32.mrf.mxu0  ;;  %v1411_v56 = vadd.f32 %v1410_v13, %v1135_v16  ;;  %v2509_v38 = vsel %vm1501_vm3, %v5250_v39, -inf }
 0x2b4   : > { %v5202_v5 = vpop.f32.mrf.mxu1  ;;  %v2512_v13 = vsel %vm1501_vm3, %v5236_v27, -inf }
 0x2b5   : > { %v4060_v48 = vpop.f32.mrf.mxu0  ;;  %v5254_v49 = vmul.f32 0.25, %v1411_v56 }
 0x2b6   : > { %v5213_v43 = vpop.f32.mrf.mxu1  ;;  %2498 = vmax.xlane.f32.xlu1 %v2497_v24  ;;  %v1559_v24 = vsel %vm1501_vm3, %v5224_v23, -inf }
 0x2b7   : > { %1548 = vmax.xlane.f32.xlu0 %v1547_v52  ;;  %v2358_v52 = vadd.f32 %v4101_v54, %v3580_v0  ;;  %v1440_v7 = vpop.f32.mrf.mxu0  ;;  %v3584_v0 = vld [vmem:[%s6472_s7 + $0x198] sm:$0xff]  ;;  %v1562_v9 = vsel %vm1501_vm3, %v5254_v49, -inf }
 0x2b8   : > { %v4107_v55 = vpop.f32.mrf.mxu1 }
 0x2b9   : > { %v5264_v16 = vmul.f32 0.25, %v2358_v52  ;;  %v1140_v52 = vld [vmem:[%s6472_s7 + $0xc8] sm:$0xff] }
 0x2ba   : > { %v5229_v41 = vpop.f32.mrf.mxu1  ;;  %2507 = vmax.xlane.f32.xlu1 %v2506_v61  ;;  %v3579_v61 = vld [vmem:[%s6472_s7 + $0x170] sm:$0xff] }
 0x2bb   : > { %1545 = vmax.xlane.f32.xlu0 %v1544_v18  ;;  %v1137_v18 = vld [vmem:[%s6472_s7 + $0xb0] sm:$0xff]  ;;  %v2353_v14 = vadd.f32 %v3579_v61, %v2352_v50 }
 0x2bc   : > { %v4110_v63 = vpop.f32.mrf.mxu1  ;;  %v1421_v56 = vadd.f32 %v1420_v40, %v1137_v18  ;;  %v2518_v40 = vsel %vm1501_vm3, %v5264_v16, -inf }
 0x2be   : > { %2504 = vmax.xlane.f32.xlu1 %v2503_v31  ;;  %v2382_v42 = vpop.f32.mrf.mxu1  ;;  %v5268_v31 = vmul.f32 0.25, %v1426_v59  ;;  %v2378_v59 = vadd.f32 %v4107_v55, %v3584_v0  ;;  %v5282_v61 = vmul.f32 0.25, %v1421_v56 }
 0x2bf   : > { %1560 = vmax.xlane.f32.xlu0 %v1559_v24  ;;  %v4063_v24 = vpop.f32.mrf.mxu0 }
 0x2c0   : > { %v4113_v54 = vpop.f32.mrf.mxu1  ;;  %v1571_v62 = vsel %vm1501_vm3, %v5268_v31, -inf  ;;  %v5292_v0 = vmul.f32 0.25, %v2378_v59  ;;  %v1568_v19 = vsel %vm1501_vm3, %v5282_v61, -inf }
 0x2c1   : > { %v1450_v18 = vpop.f32.mrf.mxu0 }
 0x2c2   : > { %2513 = vmax.xlane.f32.xlu1 %v2512_v13  ;;  %v2392_v50 = vpop.f32.mrf.mxu1  ;;  %v5278_v13 = vmul.f32 0.25, %v2353_v14  ;;  %v1139_v14 = vld [vmem:[%s6472_s7 + $0xc0] sm:$0xff]  ;;  %6536 = vst [vmem:[#allocation9_spill] sm:$0xff] %v5292_v0 }
 0x2c3   : > { %1566 = vmax.xlane.f32.xlu0 %v1565_v32  ;;  %v1436_v32 = vadd.f32 %v4057_v12, %v1140_v52  ;;  %v1431_v52 = vadd.f32 %v1430_v35, %v1139_v14  ;;  %v4066_v4 = vpop.f32.mrf.mxu0  ;;  %v2530_v35 = vsel %vm1501_vm3, %v5292_v0, -inf }
 0x2c4   : > { %v4116_v55 = vpop.f32.mrf.mxu1  ;;  %v2515_v12 = vsel %vm1501_vm3, %v5278_v13, -inf }
 0x2c5   : > { %v1460_v36 = vpop.f32.mrf.mxu0 }
 0x2c6   : > { %2510 = vmax.xlane.f32.xlu1 %v2509_v38  ;;  %v3586_v38 = vld [vmem:[%s6472_s7 + $0x1a8] sm:$0xff] }
 0x2c7   : > { %1563 = vmax.xlane.f32.xlu0 %v1562_v9  ;;  %v2388_v56 = vadd.f32 %v4110_v63, %v3586_v38  ;;  %v5296_v9 = vmul.f32 0.25, %v1436_v32  ;;  %v2402_v63 = vpop.f32.mrf.mxu1  ;;  %v5310_v38 = vmul.f32 0.25, %v1431_v52 }
 0x2c9   : > { %v5306_v59 = vmul.f32 0.25, %v2388_v56  ;;  %v1577_v45 = vsel %vm1501_vm3, %v5296_v9, -inf  ;;  %v4119_v56 = vpop.f32.mrf.mxu1  ;;  %v1574_v0 = vsel %vm1501_vm3, %v5310_v38, -inf }
 0x2ca   : > { %2519 = vmax.xlane.f32.xlu1 %v2518_v40  ;;  %v1146_v40 = vld [vmem:[%s6472_s7 + $0xf8] sm:$0xff] }
 0x2cb   : > { %1572 = vmax.xlane.f32.xlu0 %v1571_v62  ;;  %v1142_v62 = vld [vmem:[%s6472_s7 + $0xd8] sm:$0xff]  ;;  %6537 = vst [vmem:[#allocation10_spill] sm:$0xff] %v5306_v59  ;;  %v1466_v32 = vadd.f32 %v4066_v4, %v1146_v40 }
 0x2cc   : > { %v1446_v14 = vadd.f32 %v4060_v48, %v1142_v62  ;;  %v2536_v48 = vsel %vm1501_vm3, %v5306_v59, -inf }
 0x2cd   : > { %v5320_v4 = vmul.f32 0.25, %v1466_v32  ;;  %v2412_v32 = vpop.f32.mrf.mxu1 }
 0x2ce   : > { %2516 = vmax.xlane.f32.xlu1 %v2515_v12  ;;  %v3585_v12 = vld [vmem:[%s6472_s7 + $0x1a0] sm:$0xff]  ;;  %v5324_v52 = vmul.f32 0.25, %v1446_v14 }
 0x2cf   : > { %1569 = vmax.xlane.f32.xlu0 %v1568_v19  ;;  %v1141_v19 = vld [vmem:[%s6472_s7 + $0xd0] sm:$0xff]  ;;  %v2383_v40 = vadd.f32 %v3585_v12, %v2382_v42 }
 0x2d0   : > { %v1441_v62 = vadd.f32 %v1440_v7, %v1141_v19  ;;  %v1595_v7 = vsel %vm1501_vm3, %v5320_v4, -inf  ;;  %v1583_v59 = vsel %vm1501_vm3, %v5324_v52, -inf }
 0x2d1   : > { %v5334_v42 = vmul.f32 0.25, %v2383_v40  ;;  %v4122_v40 = vpop.f32.mrf.mxu1 }
 0x2d2   : > { %2531 = vmax.xlane.f32.xlu1 %v2530_v35  ;;  %v3588_v35 = vld [vmem:[%s6472_s7 + $0x1b8] sm:$0xff]  ;;  %v5338_v14 = vmul.f32 0.25, %v1441_v62 }
 0x2d3   : > { %1578 = vmax.xlane.f32.xlu0 %v1577_v45  ;;  %v1144_v45 = vld [vmem:[%s6472_s7 + $0xe8] sm:$0xff]  ;;  %6538 = vst [vmem:[#allocation11_spill] sm:$0xff] %v5334_v42  ;;  %v2398_v12 = vadd.f32 %v4113_v54, %v3588_v35 }
 0x2d4   : > { %v1456_v19 = vadd.f32 %v4063_v24, %v1144_v45  ;;  %v2533_v24 = vsel %vm1501_vm3, %v5334_v42, -inf  ;;  %v1580_v60 = vsel %vm1501_vm3, %v5338_v14, -inf }
 0x2d5   : > { %v5348_v54 = vmul.f32 0.25, %v2398_v12 }
 0x2d6   : > { %2537 = vmax.xlane.f32.xlu1 %v2536_v48  ;;  %v3587_v48 = vld [vmem:[%s6472_s7 + $0x1b0] sm:$0xff]  ;;  %v5352_v62 = vmul.f32 0.25, %v1456_v19 }
 0x2d7   : > { %1575 = vmax.xlane.f32.xlu0 %v1574_v0  ;;  %v1143_v0 = vld [vmem:[%s6472_s7 + $0xe0] sm:$0xff]  ;;  %v2393_v35 = vadd.f32 %v3587_v48, %v2392_v50  ;;  %v2422_v50 = vpop.f32.mrf.mxu1 }
 0x2d8   : > { %v1451_v45 = vadd.f32 %v1450_v18, %v1143_v0  ;;  %v2542_v18 = vsel %vm1501_vm3, %v5348_v54, -inf  ;;  %v1589_v42 = vsel %vm1501_vm3, %v5352_v62, -inf }
 0x2d9   : > { %v5362_v12 = vmul.f32 0.25, %v2393_v35  ;;  %v4125_v35 = vpop.f32.mrf.mxu1 }
 0x2da   : > { %1596 = vmax.xlane.f32.xlu1 %v1595_v7  ;;  %v3590_v7 = vld [vmem:[%s6472_s7 + $0x1c8] sm:$0xff]  ;;  %v5366_v48 = vmul.f32 0.25, %v1451_v45 }
 0x2db   : > { %1584 = vmax.xlane.f32.xlu0 %v1583_v59  ;;  %v1145_v59 = vld [vmem:[%s6472_s7 + $0xf0] sm:$0xff]  ;;  %v2408_v19 = vadd.f32 %v4116_v55, %v3590_v7 }
 0x2dc   : > { %v1461_v0 = vadd.f32 %v1460_v36, %v1145_v59  ;;  %v2539_v36 = vsel %vm1501_vm3, %v5362_v12, -inf  ;;  %v3592_v59 = vld [vmem:[%s6472_s7 + $0x1d8] sm:$0xff]  ;;  %v1586_v23 = vsel %vm1501_vm3, %v5366_v48, -inf }
 0x2dd   : > { %v5376_v55 = vmul.f32 0.25, %v2408_v19  ;;  %v2418_v19 = vadd.f32 %v4119_v56, %v3592_v59 }
 0x2de   : > { %2534 = vmax.xlane.f32.xlu1 %v2533_v24  ;;  %v3589_v24 = vld [vmem:[%s6472_s7 + $0x1c0] sm:$0xff]  ;;  %v5380_v45 = vmul.f32 0.25, %v1461_v0 }
 0x2df   : > { %1581 = vmax.xlane.f32.xlu0 %v1580_v60  ;;  %v3596_v60 = vld [vmem:[%s6472_s7 + $0x1f8] sm:$0xff]  ;;  %v2403_v7 = vadd.f32 %v3589_v24, %v2402_v63  ;;  %v2548_v0 = vsel %vm1501_vm3, %v5376_v55, -inf  ;;  %v5405_v56 = vmul.f32 0.25, %v2418_v19  ;;  %v1132_v19 = vld [vmem:[%s6472_s7 + $0x88] sm:$0xff] }
 0x2e1   : > { %v5390_v63 = vmul.f32 0.25, %v2403_v7 }
 0x2e2   : > { %2543 = vmax.xlane.f32.xlu1 %v2542_v18  ;;  %v2438_v18 = vadd.f32 %v4125_v35, %v3596_v60  ;;  %v3591_v60 = vld [vmem:[%s6472_s7 + $0x1d0] sm:$0xff] }
 0x2e3   : > { %1590 = vmax.xlane.f32.xlu0 %v1589_v42  ;;  %v1133_v42 = vld [vmem:[%s6472_s7 + $0x90] sm:$0xff]  ;;  %v2413_v7 = vadd.f32 %v3591_v60, %v2412_v32 }
 0x2e4   : > { %v1401_v24 = vadd.f32 %v5158_v11, %v1133_v42  ;;  %v5398_v35 = vmul.f32 0.25, %v2438_v18  ;;  %v2545_v11 = vsel %vm1501_vm3, %v5390_v63, -inf  ;;  %v3594_v18 = vld [vmem:[%s6472_s7 + $0x1e8] sm:$0xff] }
 0x2e5   : > { %v5420_v32 = vmul.f32 0.25, %v2413_v7  ;;  %v2428_v60 = vadd.f32 %v4122_v40, %v3594_v18  ;;  %v1116_v7 = vld [vmem:[%s6472_s7 + $0x8] sm:$0xff] }
 0x2e6   : > { %2540 = vmax.xlane.f32.xlu1 %v2539_v36  ;;  %v1592_v36 = vsel %vm1501_vm3, %v5380_v45, -inf  ;;  %v5410_v42 = vmul.f32 0.25, %v1401_v24 }
 0x2e7   : > { %1587 = vmax.xlane.f32.xlu0 %v1586_v23  ;;  %v1117_v23 = vld [vmem:[%s6472_s7 + $0x10] sm:$0xff]  ;;  %v5435_v40 = vmul.f32 0.25, %v2428_v60  ;;  %v1131_v60 = vld [vmem:[%s6472_s7 + $0x80] sm:$0xff] }
 0x2e8   : > { %v1321_v59 = vadd.f32 %v5046_v20, %v1117_v23  ;;  %v2554_v20 = vsel %vm1501_vm3, %v5405_v56, -inf  ;;  %v3593_v23 = vld [vmem:[%s6472_s7 + $0x1e0] sm:$0xff] }
 0x2e9   : > { %v2423_v18 = vadd.f32 %v3593_v23, %v2422_v50 }
 0x2ea   : > { %2549 = vmax.xlane.f32.xlu1 %v2548_v0  ;;  %v2566_v0 = vsel %vm1501_vm3, %v5398_v35, -inf  ;;  %v5424_v24 = vmul.f32 0.25, %v1321_v59  ;;  %v2551_v59 = vsel %vm1501_vm3, %v5420_v32, -inf }
 0x2eb   : > { %1593 = vmax.xlane.f32.xlu0 %v1592_v36  ;;  %v1396_v36 = vadd.f32 %v5128_v57, %v1132_v19  ;;  %v1316_v57 = vadd.f32 %v5039_v17, %v1116_v7  ;;  %v3583_v19 = vld [vmem:[%s6472_s7 + $0x190] sm:$0xff]  ;;  %v5451_v23 = vmul.f32 0.25, %v2423_v18  ;;  %v2560_v17 = vsel %vm1501_vm3, %v5435_v40, -inf  ;;  %v2432_v7 = vpop.f32.mrf.mxu1 }
 0x2ec   : > { %v2373_v50 = vadd.f32 %v3583_v19, %v5229_v41  ;;  %v1115_v41 = vld [vmem:[%s6472_s7] sm:$0xff] }
 0x2ed   : > { %v1311_v19 = vadd.f32 %v5041_v51, %v1115_v41  ;;  %v3582_v51 = vld [vmem:[%s6472_s7 + $0x188] sm:$0xff] }
 0x2ee   : > { %2546 = vmax.xlane.f32.xlu1 %v2545_v11  ;;  %v1556_v11 = vsel %vm1501_vm3, %v5410_v42, -inf  ;;  %v5466_v18 = vmul.f32 0.25, %v2373_v50 }
 0x2ef   : > { %2567 = vmax.xlane.f32.xlu0 %v2566_v0  ;;  %v5440_v0 = vmul.f32 0.25, %v1396_v36  ;;  %v5455_v36 = vmul.f32 0.25, %v1316_v57 }
 0x2f0   : > { %6540 = vst [vmem:[#allocation13_spill] sm:$0xff] %v5466_v18 }
 0x2f1   : > { %6539 = vst [vmem:[#allocation12_spill] sm:$0xff] %v5440_v0 }
 0x2f2   : > { %2555 = vmax.xlane.f32.xlu1 %v2554_v20  ;;  %v1508_v20 = vsel %vm1501_vm3, %v5424_v24, -inf }
 0x2f3   : > { %1557 = vmax.xlane.f32.xlu0 %v1556_v11  ;;  %v1391_v11 = vadd.f32 %v5142_v44, %v1131_v60  ;;  %v2557_v44 = vsel %vm1501_vm3, %v5451_v23, -inf  ;;  %v3567_v60 = vld [vmem:[%s6472_s7 + $0x110] sm:$0xff] }
 0x2f4   : > { %v2293_v50 = vadd.f32 %v3567_v60, %v5097_v58  ;;  %v2368_v58 = vadd.f32 %v5202_v5, %v3582_v51  ;;  %v3581_v5 = vld [vmem:[%s6472_s7 + $0x180] sm:$0xff] }
 0x2f5   : > { %v2363_v51 = vadd.f32 %v3581_v5, %v5213_v43 }
 0x2f6   : > { %2552 = vmax.xlane.f32.xlu1 %v2551_v59  ;;  %v3595_v59 = vld [vmem:[%s6472_s7 + $0x1f0] sm:$0xff]  ;;  %v5490_v41 = vmul.f32 0.25, %v2293_v50  ;;  %v5501_v60 = vmul.f32 0.25, %v2368_v58 }
 0x2f7   : > { %1509 = vmax.xlane.f32.xlu0 %v1508_v20  ;;  %v1553_v20 = vsel %vm1501_vm3, %v5440_v0, -inf  ;;  %v2433_v57 = vadd.f32 %v3595_v59, %v2432_v7  ;;  %v1505_v0 = vsel %vm1501_vm3, %v5455_v36, -inf  ;;  %v2527_v7 = vsel %vm1501_vm3, %v5466_v18, -inf }
 0x2f8   : > { %v5483_v59 = vmul.f32 0.25, %v1311_v19  ;;  %6543 = vst [vmem:[#allocation16_spill] sm:$0xff] %v5490_v41  ;;  %6544 = vst [vmem:[#allocation17_spill] sm:$0xff] %v5501_v60  ;;  %v2479_v50 = vsel %vm1501_vm3, %v5490_v41, -inf }
 0x2fa   : > { %2561 = vmax.xlane.f32.xlu1 %v2560_v17  ;;  %v5474_v17 = vmul.f32 0.25, %v1391_v11  ;;  %6542 = vst [vmem:[#allocation15_spill] sm:$0xff] %v5483_v59 }
 0x2fb   : > { %1554 = vmax.xlane.f32.xlu0 %v1553_v20  ;;  %v5479_v20 = vmul.f32 0.25, %v2433_v57  ;;  %v3566_v57 = vld [vmem:[%s6472_s7 + $0x108] sm:$0xff] }
 0x2fc   : > { %6541 = vst [vmem:[#allocation14_spill] sm:$0xff] %v5474_v17  ;;  %v1550_v11 = vsel %vm1501_vm3, %v5474_v17, -inf  ;;  %v2288_v19 = vadd.f32 %v5081_v33, %v3566_v57  ;;  %v3565_v33 = vld [vmem:[%s6472_s7 + $0x100] sm:$0xff] }
 0x2fd   : > { %v2283_v58 = vadd.f32 %v3565_v33, %v5085_v30 }
 0x2fe   : > { %2558 = vmax.xlane.f32.xlu1 %v2557_v44  ;;  %v1502_v44 = vsel %vm1501_vm3, %v5483_v59, -inf  ;;  %v5546_v59 = vpop.f32.mrf.mxu0 }
 0x2ff   : > { %1506 = vmax.xlane.f32.xlu0 %v1505_v0  ;;  %v2563_v0 = vsel %vm1501_vm3, %v5479_v20, -inf  ;;  %6549 = vst [vmem:[#allocation22_spill] sm:$0xff] %v5546_v59  ;;  %3929 = vmatprep.mubr.msk.f32.mxu1 %vm1501_vm3, %v5546_v59 }
 0x302   : > { %2528 = vmax.xlane.f32.xlu1 %v2527_v7  ;;  %v5508_v7 = vmul.f32 0.25, %v2288_v19  ;;  %v5523_v19 = vmul.f32 0.25, %v2283_v58 }
 0x303   : > { %1551 = vmax.xlane.f32.xlu0 %v1550_v11  ;;  %v2524_v11 = vsel %vm1501_vm3, %v5501_v60, -inf }
 0x304   : > { %6545 = vst [vmem:[#allocation18_spill] sm:$0xff] %v5508_v7  ;;  %v2476_v57 = vsel %vm1501_vm3, %v5508_v7, -inf  ;;  %6547 = vst [vmem:[#allocation20_spill] sm:$0xff] %v5523_v19  ;;  %v2473_v5 = vsel %vm1501_vm3, %v5523_v19, -inf }
 0x306   : > { %2564 = vmax.xlane.f32.xlu1 %v2563_v0  ;;  %v5517_v0 = vmul.f32 0.25, %v2363_v51 }
 0x307   : > { %1503 = vmax.xlane.f32.xlu0 %v1502_v44 }
 0x308   : > { %6546 = vst [vmem:[#allocation19_spill] sm:$0xff] %v5517_v0  ;;  %v2521_v43 = vsel %vm1501_vm3, %v5517_v0, -inf }
 0x30a   : > { %2480 = vmax.xlane.f32.xlu1 %v2479_v50 }
 0x30e   : > { %2525 = vmax.xlane.f32.xlu1 %v2524_v11 }
 0x312   : > { %2477 = vmax.xlane.f32.xlu1 %v2476_v57 }
 0x314   : > { %v5521_v44 = vpop.xlane.xlu0 %1512 }
 0x316   : > { %2522 = vmax.xlane.f32.xlu1 %v2521_v43 }
 0x318   : > { %v5527_v50 = vpop.xlane.xlu0 %1518 }
 0x31a   : > { %2474 = vmax.xlane.f32.xlu1 %v2473_v5 }
 0x31c   : > { %v5531_v30 = vpop.xlane.xlu0 %1515 }
 0x320   : > { %v5533_v51 = vpop.xlane.xlu0 %1524 }
 0x324   : > { %v5535_v11 = vpop.xlane.xlu0 %1521 }
 0x327   : > { %v5537_v33 = vpop.xlane.xlu1 %2483 }
 0x328   : > { %6548 = vst [vmem:[#allocation21_spill] sm:$0xff] %v5537_v33  ;;  %v1531_v58 = vpop.xlane.xlu0 %1530 }
 0x329   : > { %v1607_v57 = vsub.f32 %v5095_v15, %v1531_v58  ;;  %v4132_v58 = vpop.f32.mrf.mxu0 }
 0x32b   : > { %v1648_v7 = vmul.f32 1.442695, %v1607_v57  ;;  %v5540_v0 = vpop.xlane.xlu1 %2489 }
 0x32c   : > { %v1528_v43 = vpop.xlane.xlu0 %1527 }
 0x32d   : > { %4149 = vpow2.f32 %v1648_v7  ;;  %v1606_v60 = vsub.f32 %v5114_v26, %v1528_v43 }
 0x32f   : > { %v1646_v19 = vmul.f32 1.442695, %v1606_v60  ;;  %v5543_v5 = vpop.xlane.xlu1 %2486 }
 0x330   : > { %v1537_v41 = vpop.xlane.xlu0 %1536 }
 0x331   : > { %4151 = vpow2.f32 %v1646_v19  ;;  %v1609_v18 = vsub.f32 %v5132_v21, %v1537_v41 }
 0x333   : > { %v1652_v33 = vmul.f32 1.442695, %v1609_v18  ;;  %v5548_v17 = vpop.xlane.xlu1 %2495 }
 0x334   : > { %v1534_v15 = vpop.xlane.xlu0 %1533 }
 0x335   : > { %4153 = vpow2.f32 %v1652_v33  ;;  %v1608_v26 = vsub.f32 %v5148_v3, %v1534_v15 }
 0x337   : > { %v1650_v60 = vmul.f32 1.442695, %v1608_v26  ;;  %v5553_v7 = vpop.xlane.xlu1 %2492 }
 0x338   : > { %v1543_v57 = vpop.xlane.xlu0 %1542 }
 0x339   : > { %4155 = vpow2.f32 %v1650_v60  ;;  %v1611_v21 = vsub.f32 %v5164_v46, %v1543_v57 }
 0x33a   : > { %v5556_v41 = vpop.eup %4149 }
 0x33b   : > { %v1656_v18 = vmul.f32 1.442695, %v1611_v21  ;;  %v2502_v19 = vpop.xlane.xlu1 %2501  ;;  %v1721_v43 = vsel %vm1501_vm3, %v5556_v41, 0.0 }
 0x33c   : > { %v2578_v59 = vsub.f32 %v5174_v22, %v2502_v19  ;;  %v1540_v58 = vpop.xlane.xlu0 %1539  ;;  %1722 = vadd.xlane.f32.xlu0 %v1721_v43 }
 0x33d   : > { %4157 = vpow2.f32 %v1656_v18  ;;  %v1610_v3 = vsub.f32 %v5178_v29, %v1540_v58 }
 0x33e   : > { %v5562_v33 = vpop.eup %4151  ;;  %v2619_v15 = vmul.f32 1.442695, %v2578_v59 }
 0x33f   : > { %v1654_v26 = vmul.f32 1.442695, %v1610_v3  ;;  %v2499_v60 = vpop.xlane.xlu1 %2498  ;;  %v1718_v46 = vsel %vm1501_vm3, %v5562_v33, 0.0 }
 0x340   : > { %4159 = vpow2.f32 %v2619_v15  ;;  %v2577_v57 = vsub.f32 %v5188_v25, %v2499_v60  ;;  %v1549_v21 = vpop.xlane.xlu0 %1548  ;;  %1719 = vadd.xlane.f32.xlu0 %v1718_v46 }
 0x341   : > { %4161 = vpow2.f32 %v1654_v26  ;;  %v1613_v22 = vsub.f32 %v5192_v28, %v1549_v21 }
 0x342   : > { %v5568_v19 = vpop.eup %4153  ;;  %v2617_v18 = vmul.f32 1.442695, %v2577_v57 }
 0x343   : > { %v1660_v29 = vmul.f32 1.442695, %v1613_v22  ;;  %v2508_v43 = vpop.xlane.xlu1 %2507  ;;  %v1727_v59 = vsel %vm1501_vm3, %v5568_v19, 0.0 }
 0x344   : > { %4163 = vpow2.f32 %v2617_v18  ;;  %v2580_v58 = vsub.f32 %v5204_v6, %v2508_v43  ;;  %v1546_v3 = vpop.xlane.xlu0 %1545  ;;  %1728 = vadd.xlane.f32.xlu0 %v1727_v59 }
 0x345   : > { %4165 = vpow2.f32 %v1660_v29  ;;  %v1612_v25 = vsub.f32 %v5208_v8, %v1546_v3 }
 0x346   : > { %v5574_v15 = vpop.eup %4155  ;;  %v2623_v26 = vmul.f32 1.442695, %v2580_v58 }
 0x347   : > { %v1658_v28 = vmul.f32 1.442695, %v1612_v25  ;;  %v2505_v60 = vpop.xlane.xlu1 %2504  ;;  %v1724_v46 = vsel %vm1501_vm3, %v5574_v15, 0.0 }
 0x348   : > { %4167 = vpow2.f32 %v2623_v26  ;;  %v2579_v57 = vsub.f32 %v5220_v1, %v2505_v60  ;;  %v5579_v21 = vpop.xlane.xlu0 %1560  ;;  %1725 = vadd.xlane.f32.xlu0 %v1724_v46 }
 0x349   : > { %4169 = vpow2.f32 %v1658_v28 }
 0x34a   : > { %v5581_v6 = vpop.eup %4157  ;;  %v2621_v22 = vmul.f32 1.442695, %v2579_v57 }
 0x34b   : > { %v2514_v18 = vpop.xlane.xlu1 %2513  ;;  %v1733_v8 = vsel %vm1501_vm3, %v5581_v6, 0.0 }
 0x34c   : > { %4171 = vpow2.f32 %v2621_v22  ;;  %v2582_v29 = vsub.f32 %v5236_v27, %v2514_v18  ;;  %v5586_v43 = vpop.xlane.xlu0 %1566  ;;  %1734 = vadd.xlane.f32.xlu0 %v1733_v8 }
 0x34d   : > { %v5588_v59 = vpop.eup %4159 }
 0x34e   : > { %v5590_v1 = vpop.eup %4161  ;;  %v2627_v58 = vmul.f32 1.442695, %v2582_v29  ;;  %v2692_v3 = vsel %vm1501_vm3, %v5588_v59, 0.0 }
 0x34f   : > { %v2511_v25 = vpop.xlane.xlu1 %2510  ;;  %2693 = vadd.xlane.f32.xlu1 %v2692_v3  ;;  %v1730_v26 = vsel %vm1501_vm3, %v5590_v1, 0.0 }
 0x350   : > { %4173 = vpow2.f32 %v2627_v58  ;;  %v2581_v28 = vsub.f32 %v5250_v39, %v2511_v25  ;;  %v5597_v27 = vpop.xlane.xlu0 %1563  ;;  %1731 = vadd.xlane.f32.xlu0 %v1730_v26 }
 0x351   : > { %v5599_v60 = vpop.eup %4163 }
 0x352   : > { %6550 = vst [vmem:[#allocation23_spill] sm:$0xff] %v5599_v60  ;;  %v5601_v46 = vpop.eup %4165  ;;  %v2625_v57 = vmul.f32 1.442695, %v2581_v28  ;;  %v2689_v22 = vsel %vm1501_vm3, %v5599_v60, 0.0 }
 0x353   : > { %6551 = vst [vmem:[#allocation24_spill] sm:$0xff] %v5601_v46  ;;  %v2520_v18 = vpop.xlane.xlu1 %2519  ;;  %2690 = vadd.xlane.f32.xlu1 %v2689_v22  ;;  %v1739_v8 = vsel %vm1501_vm3, %v5601_v46, 0.0 }
 0x354   : > { %4175 = vpow2.f32 %v2625_v57  ;;  %v2584_v29 = vsub.f32 %v5264_v16, %v2520_v18  ;;  %v1573_v39 = vpop.xlane.xlu0 %1572  ;;  %1740 = vadd.xlane.f32.xlu0 %v1739_v8 }
 0x355   : > { %v5608_v58 = vpop.eup %4167  ;;  %v1621_v3 = vsub.f32 %v5268_v31, %v1573_v39 }
 0x356   : > { %6552 = vst [vmem:[#allocation25_spill] sm:$0xff] %v5608_v58  ;;  %v5611_v25 = vpop.eup %4169  ;;  %v2631_v26 = vmul.f32 1.442695, %v2584_v29  ;;  %v2698_v28 = vsel %vm1501_vm3, %v5608_v58, 0.0 }
 0x357   : > { %6553 = vst [vmem:[#allocation26_spill] sm:$0xff] %v5611_v25  ;;  %v1676_v60 = vmul.f32 1.442695, %v1621_v3  ;;  %v2517_v22 = vpop.xlane.xlu1 %2516  ;;  %2699 = vadd.xlane.f32.xlu1 %v2698_v28  ;;  %v1736_v57 = vsel %vm1501_vm3, %v5611_v25, 0.0 }
 0x358   : > { %4177 = vpow2.f32 %v2631_v26  ;;  %v2583_v16 = vsub.f32 %v5278_v13, %v2517_v22  ;;  %v5618_v18 = vpop.xlane.xlu0 %1569  ;;  %1737 = vadd.xlane.f32.xlu0 %v1736_v57 }
 0x359   : > { %v5620_v8 = vpop.eup %4171  ;;  %4179 = vpow2.f32 %v1676_v60 }
 0x35a   : > { %6554 = vst [vmem:[#allocation27_spill] sm:$0xff] %v5620_v8  ;;  %v2629_v31 = vmul.f32 1.442695, %v2583_v16  ;;  %v2695_v29 = vsel %vm1501_vm3, %v5620_v8, 0.0 }
 0x35b   : > { %v5624_v39 = vpop.xlane.xlu1 %2531  ;;  %2696 = vadd.xlane.f32.xlu1 %v2695_v29 }
 0x35c   : > { %4181 = vpow2.f32 %v2629_v31  ;;  %v1579_v3 = vpop.xlane.xlu0 %1578 }
 0x35d   : > { %v5626_v28 = vpop.eup %4173  ;;  %v1623_v26 = vsub.f32 %v5296_v9, %v1579_v3 }
 0x35e   : > { %6555 = vst [vmem:[#allocation28_spill] sm:$0xff] %v5626_v28  ;;  %v2704_v13 = vsel %vm1501_vm3, %v5626_v28, 0.0 }
 0x35f   : > { %v1680_v22 = vmul.f32 1.442695, %v1623_v26  ;;  %v5631_v57 = vpop.xlane.xlu1 %2537  ;;  %2705 = vadd.xlane.f32.xlu1 %v2704_v13 }
 0x360   : > { %v1576_v60 = vpop.xlane.xlu0 %1575 }
 0x361   : > { %v5633_v16 = vpop.eup %4175  ;;  %4183 = vpow2.f32 %v1680_v22  ;;  %v1622_v8 = vsub.f32 %v5310_v38, %v1576_v60 }
 0x362   : > { %6556 = vst [vmem:[#allocation29_spill] sm:$0xff] %v5633_v16  ;;  %v2701_v31 = vsel %vm1501_vm3, %v5633_v16, 0.0 }
 0x363   : > { %v1678_v29 = vmul.f32 1.442695, %v1622_v8  ;;  %2702 = vadd.xlane.f32.xlu1 %v2701_v31  ;;  %v1597_v25 = vpop.xlane.xlu1 %1596 }
 0x364   : > { %v1585_v9 = vpop.xlane.xlu0 %1584  ;;  %v1629_v58 = vsub.f32 %v5320_v4, %v1597_v25 }
 0x365   : > { %v5638_v3 = vpop.eup %4177  ;;  %4185 = vpow2.f32 %v1678_v29  ;;  %v1625_v26 = vsub.f32 %v5324_v52, %v1585_v9 }
 0x366   : > { %6557 = vst [vmem:[#allocation30_spill] sm:$0xff] %v5638_v3  ;;  %v5641_v28 = vpop.eup %4179  ;;  %v2710_v13 = vsel %vm1501_vm3, %v5638_v3, 0.0 }
 0x367   : > { %6558 = vst [vmem:[#allocation31_spill] sm:$0xff] %v5641_v28  ;;  %v1684_v22 = vmul.f32 1.442695, %v1625_v26  ;;  %2711 = vadd.xlane.f32.xlu1 %v2710_v13  ;;  %v5645_v38 = vpop.xlane.xlu1 %2534  ;;  %v1763_v8 = vsel %vm1501_vm3, %v5641_v28, 0.0 }
 0x368   : > { %v1582_v60 = vpop.xlane.xlu0 %1581  ;;  %1764 = vadd.xlane.f32.xlu0 %v1763_v8 }
 0x369   : > { %v5649_v31 = vpop.eup %4181  ;;  %4187 = vpow2.f32 %v1684_v22  ;;  %v1624_v29 = vsub.f32 %v5338_v14, %v1582_v60 }
 0x36a   : > { %v2707_v52 = vsel %vm1501_vm3, %v5649_v31, 0.0 }
 0x36b   : > { %v1682_v9 = vmul.f32 1.442695, %v1624_v29  ;;  %2708 = vadd.xlane.f32.xlu1 %v2707_v52  ;;  %v2544_v3 = vpop.xlane.xlu1 %2543 }
 0x36c   : > { %v2592_v26 = vsub.f32 %v5348_v54, %v2544_v3  ;;  %v1591_v13 = vpop.xlane.xlu0 %1590 }
 0x36d   : > { %4189 = vpow2.f32 %v1682_v9  ;;  %v1627_v16 = vsub.f32 %v5352_v62, %v1591_v13  ;;  %v1692_v62 = vmul.f32 1.442695, %v1629_v58 }
 0x36e   : > { %v5656_v28 = vpop.eup %4183  ;;  %v2647_v8 = vmul.f32 1.442695, %v2592_v26 }
 0x36f   : > { %v1688_v22 = vmul.f32 1.442695, %v1627_v16  ;;  %v5659_v46 = vpop.xlane.xlu1 %2540  ;;  %v1769_v14 = vsel %vm1501_vm3, %v5656_v28, 0.0 }
 0x370   : > { %4191 = vpow2.f32 %v2647_v8  ;;  %v1588_v60 = vpop.xlane.xlu0 %1587  ;;  %1770 = vadd.xlane.f32.xlu0 %v1769_v14 }
 0x371   : > { %4193 = vpow2.f32 %v1688_v22  ;;  %v1626_v54 = vsub.f32 %v5366_v48, %v1588_v60  ;;  %v1605_v48 = vsub.f32 %v5074_v2, %v5533_v51 }
 0x372   : > { %v5664_v3 = vpop.eup %4185 }
 0x373   : > { %v1686_v29 = vmul.f32 1.442695, %v1626_v54  ;;  %v2550_v52 = vpop.xlane.xlu1 %2549  ;;  %v1766_v4 = vsel %vm1501_vm3, %v5664_v3, 0.0  ;;  %v1620_v54 = vsub.f32 %v5282_v61, %v5618_v18  ;;  %v1604_v61 = vsub.f32 %v5083_v10, %v5535_v11 }
 0x374   : > { %v2594_v25 = vsub.f32 %v5376_v55, %v2550_v52  ;;  %v1594_v16 = vpop.xlane.xlu0 %1593  ;;  %1767 = vadd.xlane.f32.xlu0 %v1766_v4 }
 0x375   : > { %4195 = vpow2.f32 %v1686_v29  ;;  %v1628_v9 = vsub.f32 %v5380_v45, %v1594_v16  ;;  %v1644_v45 = vmul.f32 1.442695, %v1605_v48  ;;  %v1674_v18 = vmul.f32 1.442695, %v1620_v54 }
 0x376   : > { %v5670_v26 = vpop.eup %4187  ;;  %v2651_v13 = vmul.f32 1.442695, %v2594_v25  ;;  %4197 = vpow2.f32 %v1692_v62  ;;  %v1642_v48 = vmul.f32 1.442695, %v1604_v61  ;;  %v1618_v61 = vsub.f32 %v5254_v49, %v5597_v27 }
 0x377   : > { %v1690_v58 = vmul.f32 1.442695, %v1628_v9  ;;  %v2547_v8 = vpop.xlane.xlu1 %2546  ;;  %v1775_v22 = vsel %vm1501_vm3, %v5670_v26, 0.0  ;;  %v1602_v27 = vsub.f32 %v5063_v47, %v5531_v30 }
 0x378   : > { %4199 = vpow2.f32 %v2651_v13  ;;  %v2593_v55 = vsub.f32 %v5390_v63, %v2547_v8  ;;  %1776 = vadd.xlane.f32.xlu0 %v1775_v22  ;;  %v2568_v8 = vpop.xlane.xlu0 %2567 }
 0x379   : > { %4201 = vpow2.f32 %v1690_v58  ;;  %v1619_v58 = vsub.f32 %v5240_v34, %v5586_v43  ;;  %v1603_v43 = vsub.f32 %v5061_v37, %v5527_v50  ;;  %v1638_v30 = vmul.f32 1.442695, %v1602_v27 }
 0x37a   : > { %v5677_v14 = vpop.eup %4189  ;;  %v2649_v60 = vmul.f32 1.442695, %v2593_v55 }
 0x37b   : > { %v2556_v29 = vpop.xlane.xlu1 %2555  ;;  %v1772_v2 = vsel %vm1501_vm3, %v5677_v14, 0.0  ;;  %v1672_v54 = vmul.f32 1.442695, %v1619_v58  ;;  %v1640_v50 = vmul.f32 1.442695, %v1603_v43 }
 0x37c   : > { %4203 = vpow2.f32 %v2649_v60  ;;  %v2596_v51 = vsub.f32 %v5405_v56, %v2556_v29  ;;  %1773 = vadd.xlane.f32.xlu0 %v1772_v2  ;;  %v2600_v60 = vsub.f32 %v5398_v35, %v2568_v8 }
 0x37d   : > { %v5684_v62 = vpop.eup %4191  ;;  %4205 = vpow2.f32 %v1644_v45 }
 0x37e   : > { %v5686_v63 = vpop.eup %4193  ;;  %v2655_v52 = vmul.f32 1.442695, %v2596_v51  ;;  %v2734_v4 = vsel %vm1501_vm3, %v5684_v62, 0.0 }
 0x37f   : > { %2735 = vadd.xlane.f32.xlu1 %v2734_v4  ;;  %v2553_v25 = vpop.xlane.xlu1 %2552  ;;  %v1781_v16 = vsel %vm1501_vm3, %v5686_v63, 0.0 }
 0x380   : > { %4207 = vpow2.f32 %v2655_v52  ;;  %v2595_v56 = vsub.f32 %v5420_v32, %v2553_v25  ;;  %1782 = vadd.xlane.f32.xlu0 %v1781_v16  ;;  %v2663_v52 = vmul.f32 1.442695, %v2600_v60 }
 0x381   : > { %4209 = vpow2.f32 %v1674_v18 }
 0x382   : > { %v5695_v9 = vpop.eup %4195  ;;  %v2653_v13 = vmul.f32 1.442695, %v2595_v56  ;;  %v2576_v56 = vsub.f32 %v5144_v53, %v5548_v17 }
 0x383   : > { %v2562_v10 = vpop.xlane.xlu1 %2561  ;;  %v1778_v11 = vsel %vm1501_vm3, %v5695_v9, 0.0  ;;  %v5701_v22 = vpop.eup %4197 }
 0x384   : > { %4211 = vpow2.f32 %v2653_v13  ;;  %v2598_v55 = vsub.f32 %v5435_v40, %v2562_v10  ;;  %1779 = vadd.xlane.f32.xlu0 %v1778_v11  ;;  %v1787_v2 = vsel %vm1501_vm3, %v5701_v22, 0.0  ;;  %v1558_v13 = vpop.xlane.xlu0 %1557  ;;  %v2615_v17 = vmul.f32 1.442695, %v2576_v56 }
 0x385   : > { %v5704_v32 = vpop.eup %4199  ;;  %4213 = vpow2.f32 %v1642_v48  ;;  %v1670_v48 = vmul.f32 1.442695, %v1618_v61 }
 0x386   : > { %v2659_v45 = vmul.f32 1.442695, %v2598_v55  ;;  %v2740_v34 = vsel %vm1501_vm3, %v5704_v32, 0.0  ;;  %v5713_v40 = vpop.eup %4201  ;;  %v2591_v55 = vsub.f32 %v5362_v12, %v5659_v46  ;;  %v6560_v12 = vld [vmem:[#allocation7_spill] sm:$0xff] }
 0x387   : > { %2741 = vadd.xlane.f32.xlu1 %v2740_v34  ;;  %v2559_v29 = vpop.xlane.xlu1 %2558  ;;  %v1784_v25 = vsel %vm1501_vm3, %v5713_v40, 0.0  ;;  %v2575_v46 = vsub.f32 %v6560_v12, %v5553_v7  ;;  %v6562_v7 = vld [vmem:[#allocation10_spill] sm:$0xff] }
 0x388   : > { %4215 = vpow2.f32 %v2659_v45  ;;  %v2597_v51 = vsub.f32 %v5451_v23, %v2559_v29  ;;  %1788 = vadd.xlane.f32.xlu0 %v1787_v2  ;;  %v6559_v45 = vld [vmem:[#allocation8_spill] sm:$0xff]  ;;  %v2645_v2 = vmul.f32 1.442695, %v2591_v55  ;;  %v2590_v56 = vsub.f32 %v6562_v7, %v5631_v57  ;;  %v6563_v57 = vld [vmem:[#allocation5_spill] sm:$0xff] }
 0x389   : > { %v5716_v35 = vpop.eup %4203  ;;  %4217 = vpow2.f32 %v1672_v54  ;;  %v1617_v34 = vsub.f32 %v6559_v45, %v5579_v21  ;;  %v1510_v54 = vpop.xlane.xlu0 %1509 }
 0x38a   : > { %v2657_v4 = vmul.f32 1.442695, %v2597_v51  ;;  %v2737_v37 = vsel %vm1501_vm3, %v5716_v35, 0.0  ;;  %v5726_v23 = vpop.eup %4205  ;;  %v6561_v51 = vld [vmem:[#allocation2_spill] sm:$0xff]  ;;  %v2643_v55 = vmul.f32 1.442695, %v2590_v56 }
 0x38b   : > { %2738 = vadd.xlane.f32.xlu1 %v2737_v37  ;;  %v5722_v18 = vpop.xlane.xlu1 %2528  ;;  %v1715_v8 = vsel %vm1501_vm3, %v5726_v23, 0.0 }
 0x38c   : > { %4219 = vpow2.f32 %v2657_v4  ;;  %1785 = vadd.xlane.f32.xlu0 %v1784_v25  ;;  %v1668_v4 = vmul.f32 1.442695, %v1617_v34  ;;  %v2613_v25 = vmul.f32 1.442695, %v2575_v46 }
 0x38d   : > { %v5728_v16 = vpop.eup %4207  ;;  %4221 = vpow2.f32 %v2663_v52  ;;  %v1601_v52 = vsub.f32 %v6561_v51, %v5521_v44 }
 0x38e   : > { %v2746_v49 = vsel %vm1501_vm3, %v5728_v16, 0.0  ;;  %4223 = vpow2.f32 %v1640_v50  ;;  %v5738_v10 = vpop.eup %4209 }
 0x38f   : > { %2747 = vadd.xlane.f32.xlu1 %v2746_v49  ;;  %v2565_v58 = vpop.xlane.xlu1 %2564  ;;  %4225 = vpow2.f32 %v1670_v48  ;;  %v1555_v49 = vpop.xlane.xlu0 %1554  ;;  %v1636_v48 = vmul.f32 1.442695, %v1601_v52 }
 0x390   : > { %v2599_v11 = vsub.f32 %v5479_v20, %v2565_v58  ;;  %1716 = vadd.xlane.f32.xlu0 %v1715_v8  ;;  %v1760_v20 = vsel %vm1501_vm3, %v5738_v10, 0.0  ;;  %v1616_v58 = vsub.f32 %v5410_v42, %v1558_v13 }
 0x391   : > { %v5741_v53 = vpop.eup %4211 }
 0x392   : > { %v2661_v60 = vmul.f32 1.442695, %v2599_v11  ;;  %v2743_v47 = vsel %vm1501_vm3, %v5741_v53, 0.0  ;;  %v5751_v43 = vpop.eup %4213 }
 0x393   : > { %2744 = vadd.xlane.f32.xlu1 %v2743_v47  ;;  %v1712_v37 = vsel %vm1501_vm3, %v5751_v43, 0.0  ;;  %v1666_v47 = vmul.f32 1.442695, %v1616_v58  ;;  %v1507_v45 = vpop.xlane.xlu0 %1506 }
 0x394   : > { %4227 = vpow2.f32 %v2661_v60  ;;  %1761 = vadd.xlane.f32.xlu0 %v1760_v20  ;;  %v6564_v20 = vld [vmem:[#allocation11_spill] sm:$0xff] }
 0x395   : > { %v5753_v29 = vpop.eup %4215  ;;  %4229 = vpow2.f32 %v2615_v17  ;;  %v2574_v17 = vsub.f32 %v6563_v57, %v5540_v0  ;;  %v2589_v12 = vsub.f32 %v6564_v20, %v5645_v38  ;;  %v6570_v20 = vld [vmem:[#allocation4_spill] sm:$0xff] }
 0x396   : > { %v2752_v21 = vsel %vm1501_vm3, %v5753_v29, 0.0  ;;  %4231 = vpow2.f32 %v1638_v30  ;;  %v5763_v50 = vpop.eup %4217  ;;  %v1600_v30 = vsub.f32 %v5424_v24, %v1510_v54  ;;  %v6565_v54 = vld [vmem:[#allocation12_spill] sm:$0xff] }
 0x397   : > { %2753 = vadd.xlane.f32.xlu1 %v2752_v21  ;;  %4233 = vpow2.f32 %v2645_v2  ;;  %v1757_v8 = vsel %vm1501_vm3, %v5763_v50, 0.0  ;;  %v2611_v0 = vmul.f32 1.442695, %v2574_v17  ;;  %v1615_v21 = vsub.f32 %v6565_v54, %v1555_v49  ;;  %v2481_v17 = vpop.xlane.xlu1 %2480 }
 0x398   : > { %1713 = vadd.xlane.f32.xlu0 %v1712_v37  ;;  %4235 = vpow2.f32 %v1668_v4  ;;  %v1634_v24 = vmul.f32 1.442695, %v1600_v30  ;;  %v6566_v4 = vld [vmem:[#allocation6_spill] sm:$0xff]  ;;  %v2641_v37 = vmul.f32 1.442695, %v2589_v12 }
 0x399   : > { %v5765_v61 = vpop.eup %4219  ;;  %4237 = vpow2.f32 %v2613_v25  ;;  %v2573_v38 = vsub.f32 %v6566_v4, %v5543_v5  ;;  %v1552_v25 = vpop.xlane.xlu0 %1551  ;;  %v1664_v49 = vmul.f32 1.442695, %v1615_v21  ;;  %v6567_v5 = vld [vmem:[#allocation9_spill] sm:$0xff] }
 0x39a   : > { %v2749_v44 = vsel %vm1501_vm3, %v5765_v61, 0.0  ;;  %v5771_v27 = vpop.eup %4221  ;;  %4239 = vpow2.f32 %v1636_v48  ;;  %v2588_v57 = vsub.f32 %v6567_v5, %v5624_v39  ;;  %v6569_v39 = vld [vmem:[#allocation21_spill] sm:$0xff] }
 0x39b   : > { %2750 = vadd.xlane.f32.xlu1 %v2749_v44  ;;  %v5776_v11 = vpop.eup %4223  ;;  %v2758_v60 = vsel %vm1501_vm3, %v5771_v27, 0.0  ;;  %4241 = vpow2.f32 %v2643_v55  ;;  %v1599_v44 = vsub.f32 %v5455_v36, %v1507_v45  ;;  %v2572_v12 = vsub.f32 %v6570_v20, %v6569_v39 }
 0x39c   : > { %1758 = vadd.xlane.f32.xlu0 %v1757_v8  ;;  %v1709_v42 = vsel %vm1501_vm3, %v5776_v11, 0.0  ;;  %v5785_v13 = vpop.eup %4225  ;;  %4243 = vpow2.f32 %v1666_v47  ;;  %v2609_v8 = vmul.f32 1.442695, %v2573_v38  ;;  %v6568_v47 = vld [vmem:[#allocation14_spill] sm:$0xff] }
 0x39d   : > { %v1754_v51 = vsel %vm1501_vm3, %v5785_v13, 0.0  ;;  %4245 = vpow2.f32 %v2611_v0  ;;  %v1632_v36 = vmul.f32 1.442695, %v1599_v44  ;;  %v1614_v30 = vsub.f32 %v6568_v47, %v1552_v25  ;;  %v1504_v0 = vpop.xlane.xlu0 %1503  ;;  %v2526_v25 = vpop.xlane.xlu1 %2525  ;;  %v6577_v47 = vld [vmem:[#allocation16_spill] sm:$0xff] }
 0x39e   : > { %4247 = vpow2.f32 %v1634_v24 }
 0x39f   : > { %2759 = vadd.xlane.f32.xlu1 %v2758_v60  ;;  %4249 = vpow2.f32 %v2641_v37  ;;  %v1662_v21 = vmul.f32 1.442695, %v1614_v30  ;;  %v2571_v30 = vsub.f32 %v6577_v47, %v2481_v17  ;;  %v6586_v47 = vld [vmem:[#allocation19_spill] sm:$0xff] }
 0x3a0   : > { %1710 = vadd.xlane.f32.xlu0 %v1709_v42  ;;  %4251 = vpow2.f32 %v1664_v49  ;;  %v6574_v49 = vld [vmem:[#allocation13_spill] sm:$0xff] }
 0x3a1   : > { %v5787_v34 = vpop.eup %4227  ;;  %4253 = vpow2.f32 %v2609_v8  ;;  %v2587_v44 = vsub.f32 %v6574_v49, %v5722_v18 }
 0x3a2   : > { %v2755_v46 = vsel %vm1501_vm3, %v5787_v34, 0.0  ;;  %v5793_v2 = vpop.eup %4229  ;;  %4255 = vpow2.f32 %v1632_v36 }
 0x3a3   : > { %2756 = vadd.xlane.f32.xlu1 %v2755_v46  ;;  %v5798_v52 = vpop.eup %4231  ;;  %v2686_v7 = vsel %vm1501_vm3, %v5793_v2, 0.0  ;;  %v2639_v46 = vmul.f32 1.442695, %v2588_v57  ;;  %v2637_v36 = vmul.f32 1.442695, %v2587_v44 }
 0x3a4   : > { %1755 = vadd.xlane.f32.xlu0 %v1754_v51  ;;  %v5804_v56 = vpop.eup %4233  ;;  %v1706_v48 = vsel %vm1501_vm3, %v5798_v52, 0.0  ;;  %v6572_v51 = vld [vmem:[#allocation15_spill] sm:$0xff] }
 0x3a5   : > { %v5809_v58 = vpop.eup %4235  ;;  %v2731_v55 = vsel %vm1501_vm3, %v5804_v56, 0.0  ;;  %v1598_v4 = vsub.f32 %v6572_v51, %v1504_v0  ;;  %4257 = vpow2.f32 %v2639_v46  ;;  %v6580_v46 = vld [vmem:[#allocation17_spill] sm:$0xff] }
 0x3a6   : > { %v5815_v60 = vpop.eup %4237  ;;  %v1751_v42 = vsel %vm1501_vm3, %v5809_v58, 0.0  ;;  %4259 = vpow2.f32 %v1662_v21 }
 0x3a7   : > { %2687 = vadd.xlane.f32.xlu1 %v2686_v7  ;;  %v5820_v45 = vpop.eup %4239  ;;  %v2683_v24 = vsel %vm1501_vm3, %v5815_v60, 0.0  ;;  %v2607_v7 = vmul.f32 1.442695, %v2572_v12  ;;  %v1630_v5 = vmul.f32 1.442695, %v1598_v4 }
 0x3a8   : > { %1707 = vadd.xlane.f32.xlu0 %v1706_v48  ;;  %v5826_v54 = vpop.eup %4241  ;;  %v1703_v38 = vsel %vm1501_vm3, %v5820_v45, 0.0  ;;  %v2605_v12 = vmul.f32 1.442695, %v2571_v30 }
 0x3a9   : > { %6571 = vst [vmem:[#allocation8_spill] sm:$0xff] %v5826_v54  ;;  %v5831_v37 = vpop.eup %4243  ;;  %v2728_v48 = vsel %vm1501_vm3, %v5826_v54, 0.0  ;;  %4261 = vpow2.f32 %v2607_v7  ;;  %v6583_v7 = vld [vmem:[#allocation18_spill] sm:$0xff] }
 0x3aa   : > { %6573 = vst [vmem:[#allocation7_spill] sm:$0xff] %v5831_v37  ;;  %v5837_v8 = vpop.eup %4245  ;;  %v1748_v57 = vsel %vm1501_vm3, %v5831_v37, 0.0  ;;  %4263 = vpow2.f32 %v1630_v5 }
 0x3ab   : > { %2732 = vadd.xlane.f32.xlu1 %v2731_v55  ;;  %6575 = vst [vmem:[#allocation2_spill] sm:$0xff] %v5837_v8  ;;  %v5841_v55 = vpop.eup %4247  ;;  %v2680_v18 = vsel %vm1501_vm3, %v5837_v8, 0.0  ;;  %4265 = vpow2.f32 %v2637_v36 }
 0x3ac   : > { %1752 = vadd.xlane.f32.xlu0 %v1751_v42  ;;  %6576 = vst [vmem:[#allocation10_spill] sm:$0xff] %v5841_v55  ;;  %v2478_v42 = vpop.xlane.xlu1 %2477  ;;  %v5846_v0 = vpop.eup %4249  ;;  %v1700_v39 = vsel %vm1501_vm3, %v5841_v55, 0.0  ;;  %4267 = vpow2.f32 %v2605_v12 }
 0x3ad   : > { %6578 = vst [vmem:[#allocation5_spill] sm:$0xff] %v5846_v0  ;;  %v5850_v20 = vpop.eup %4251  ;;  %v2725_v17 = vsel %vm1501_vm3, %v5846_v0, 0.0  ;;  %v2570_v49 = vsub.f32 %v6583_v7, %v2478_v42 }
 0x3ae   : > { %6579 = vst [vmem:[#allocation11_spill] sm:$0xff] %v5850_v20  ;;  %v5855_v21 = vpop.eup %4253  ;;  %v1745_v51 = vsel %vm1501_vm3, %v5850_v20, 0.0 }
 0x3af   : > { %2684 = vadd.xlane.f32.xlu1 %v2683_v24  ;;  %v2586_v24 = vsub.f32 %v6580_v46, %v2526_v25  ;;  %6581 = vst [vmem:[#allocation12_spill] sm:$0xff] %v5855_v21  ;;  %v5859_v4 = vpop.eup %4255  ;;  %v2677_v25 = vsel %vm1501_vm3, %v5855_v21, 0.0  ;;  %v2603_v36 = vmul.f32 1.442695, %v2570_v49 }
 0x3b0   : > { %1704 = vadd.xlane.f32.xlu0 %v1703_v38  ;;  %6582 = vst [vmem:[#allocation6_spill] sm:$0xff] %v5859_v4  ;;  %v2523_v38 = vpop.xlane.xlu1 %2522  ;;  %v1697_v5 = vsel %vm1501_vm3, %v5859_v4, 0.0 }
 0x3b1   : > { %v2635_v44 = vmul.f32 1.442695, %v2586_v24  ;;  %v2585_v30 = vsub.f32 %v6586_v47, %v2523_v38 }
 0x3b3   : > { %2729 = vadd.xlane.f32.xlu1 %v2728_v48  ;;  %v5864_v48 = vpop.eup %4257  ;;  %4269 = vpow2.f32 %v2635_v44  ;;  %v2633_v24 = vmul.f32 1.442695, %v2585_v30 }
 0x3b4   : > { %1749 = vadd.xlane.f32.xlu0 %v1748_v57  ;;  %6584 = vst [vmem:[#allocation9_spill] sm:$0xff] %v5864_v48  ;;  %v5868_v57 = vpop.eup %4259  ;;  %v2722_v42 = vsel %vm1501_vm3, %v5864_v48, 0.0  ;;  %4271 = vpow2.f32 %v2603_v36 }
 0x3b5   : > { %6585 = vst [vmem:[#allocation14_spill] sm:$0xff] %v5868_v57  ;;  %v1742_v12 = vsel %vm1501_vm3, %v5868_v57, 0.0 }
 0x3b7   : > { %2681 = vadd.xlane.f32.xlu1 %v2680_v18  ;;  %v2475_v18 = vpop.xlane.xlu1 %2474 }
 0x3b8   : > { %1701 = vadd.xlane.f32.xlu0 %v1700_v39  ;;  %v5873_v39 = vpop.eup %4261 }
 0x3b9   : > { %6587 = vst [vmem:[#allocation21_spill] sm:$0xff] %v5873_v39  ;;  %v5877_v46 = vpop.eup %4263  ;;  %v2674_v38 = vsel %vm1501_vm3, %v5873_v39, 0.0 }
 0x3ba   : > { %6588 = vst [vmem:[#allocation4_spill] sm:$0xff] %v5877_v46  ;;  %v5882_v49 = vpop.eup %4265  ;;  %v1694_v44 = vsel %vm1501_vm3, %v5877_v46, 0.0 }
 0x3bb   : > { %2726 = vadd.xlane.f32.xlu1 %v2725_v17  ;;  %v6589_v17 = vld [vmem:[#allocation20_spill] sm:$0xff]  ;;  %6590 = vst [vmem:[#allocation15_spill] sm:$0xff] %v5882_v49  ;;  %v2719_v36 = vsel %vm1501_vm3, %v5882_v49, 0.0  ;;  %v5888_v47 = vpop.eup %4267 }
 0x3bc   : > { %1746 = vadd.xlane.f32.xlu0 %v1745_v51  ;;  %v2569_v51 = vsub.f32 %v6589_v17, %v2475_v18  ;;  %6591 = vst [vmem:[#allocation13_spill] sm:$0xff] %v5888_v47  ;;  %v2671_v18 = vsel %vm1501_vm3, %v5888_v47, 0.0 }
 0x3bf   : > { %2678 = vadd.xlane.f32.xlu1 %v2677_v25  ;;  %v2601_v25 = vmul.f32 1.442695, %v2569_v51 }
 0x3c0   : > { %1698 = vadd.xlane.f32.xlu0 %v1697_v5 }
 0x3c3   : > { %2723 = vadd.xlane.f32.xlu1 %v2722_v42  ;;  %v5892_v42 = vpop.eup %4269 }
 0x3c4   : > { %1743 = vadd.xlane.f32.xlu0 %v1742_v12  ;;  %6592 = vst [vmem:[#allocation16_spill] sm:$0xff] %v5892_v42  ;;  %v2716_v17 = vsel %vm1501_vm3, %v5892_v42, 0.0 }
 0x3c5   : > { %v1723_v7 = vpop.xlane.xlu0 %1722 }
 0x3c6   : > { %4273 = vrcp.f32 %v1723_v7 }
 0x3c7   : > { %2675 = vadd.xlane.f32.xlu1 %v2674_v38  ;;  %4275 = vpow2.f32 %v2633_v24  ;;  %v5894_v24 = vpop.eup %4271 }
 0x3c8   : > { %1695 = vadd.xlane.f32.xlu0 %v1694_v44  ;;  %6593 = vst [vmem:[#allocation17_spill] sm:$0xff] %v5894_v24  ;;  %v2668_v47 = vsel %vm1501_vm3, %v5894_v24, 0.0 }
 0x3c9   : > { %v1720_v5 = vpop.xlane.xlu0 %1719 }
 0x3ca   : > { %4277 = vrcp.f32 %v1720_v5 }
 0x3cb   : > { %2720 = vadd.xlane.f32.xlu1 %v2719_v36  ;;  %4279 = vpow2.f32 %v2601_v25 }
 0x3cd   : > { %v1729_v30 = vpop.xlane.xlu0 %1728 }
 0x3ce   : > { %4281 = vrcp.f32 %v1729_v30 }
 0x3cf   : > { %2672 = vadd.xlane.f32.xlu1 %v2671_v18 }
 0x3d1   : > { %v1726_v12 = vpop.xlane.xlu0 %1725 }
 0x3d2   : > { %4283 = vrcp.f32 %v1726_v12 }
 0x3d3   : > { %v4274_v51 = vpop.eup %4273  ;;  %2717 = vadd.xlane.f32.xlu1 %v2716_v17 }
 0x3d4   : > { %v1831_v38 = vmul.f32 %v4274_v51, %v1723_v7  ;;  %v5898_v25 = vpop.eup %4275 }
 0x3d5   : > { %v1735_v44 = vpop.xlane.xlu0 %1734  ;;  %6594 = vst [vmem:[#allocation18_spill] sm:$0xff] %v5898_v25 }
 0x3d6   : > { %v1863_v36 = vsub.f32 2.0, %v1831_v38  ;;  %4285 = vrcp.f32 %v1735_v44 }
 0x3d7   : > { %v4278_v18 = vpop.eup %4277  ;;  %2669 = vadd.xlane.f32.xlu1 %v2668_v47  ;;  %v2713_v47 = vsel %vm1501_vm3, %v5898_v25, 0.0 }
 0x3d8   : > { %v1895_v49 = vmul.f32 %v4274_v51, %v1863_v36  ;;  %v1830_v46 = vmul.f32 %v4278_v18, %v1720_v5  ;;  %v2694_v39 = vpop.xlane.xlu1 %2693  ;;  %v5908_v17 = vpop.eup %4279  ;;  %v3368_v51 = vld [vmem:[%s6474_s9] sm:$0xff] }
 0x3d9   : > { %4287 = vrcp.f32 %v2694_v39  ;;  %v1732_v7 = vpop.xlane.xlu0 %1731  ;;  %6595 = vst [vmem:[#allocation19_spill] sm:$0xff] %v5908_v17 }
 0x3da   : > { %v5911_v38 = vmul.f32 %v5556_v41, %v1895_v49  ;;  %v1862_v42 = vsub.f32 2.0, %v1830_v46  ;;  %4289 = vrcp.f32 %v1732_v7 }
 0x3db   : > { %v4282_v5 = vpop.eup %4281  ;;  %2714 = vadd.xlane.f32.xlu1 %v2713_v47  ;;  %v2665_v47 = vsel %vm1501_vm3, %v5908_v17, 0.0 }
 0x3dc   : > { %1959 = vst.msk [vmem:[%s5906_s20 + $0x48] sm:$0xff] %vm1501_vm3, %v5911_v38  ;;  %v1894_v36 = vmul.f32 %v4278_v18, %v1862_v42  ;;  %v1833_v24 = vmul.f32 %v4282_v5, %v1729_v30  ;;  %v2691_v57 = vpop.xlane.xlu1 %2690 }
 0x3dd   : > { %4291 = vrcp.f32 %v2691_v57  ;;  %v1741_v41 = vpop.xlane.xlu0 %1740 }
 0x3de   : > { %v5922_v46 = vmul.f32 %v5562_v33, %v1894_v36  ;;  %v1865_v49 = vsub.f32 2.0, %v1833_v24  ;;  %4293 = vrcp.f32 %v1741_v41  ;;  %3371 = vperm.xlu0 %4147, %v3368_v51  }
 0x3df   : > { %v4284_v25 = vpop.eup %4283  ;;  %2666 = vadd.xlane.f32.xlu1 %v2665_v47 }
 0x3e0   : > { %1958 = vst.msk [vmem:[%s5906_s20 + $0x40] sm:$0xff] %vm1501_vm3, %v5922_v46  ;;  %v1897_v42 = vmul.f32 %v4282_v5, %v1865_v49  ;;  %v1832_v30 = vmul.f32 %v4284_v25, %v1726_v12  ;;  %v2700_v18 = vpop.xlane.xlu1 %2699 }
 0x3e1   : > { %4295 = vrcp.f32 %v2700_v18  ;;  %v1738_v48 = vpop.xlane.xlu0 %1737 }
 0x3e2   : > { %v5930_v33 = vmul.f32 %v5568_v19, %v1897_v42  ;;  %v1864_v24 = vsub.f32 2.0, %v1832_v30  ;;  %4297 = vrcp.f32 %v1738_v48 }
 0x3e3   : > { %v4286_v51 = vpop.eup %4285 }
 0x3e4   : > { %1961 = vst.msk [vmem:[%s5906_s20 + $0x58] sm:$0xff] %vm1501_vm3, %v5930_v33  ;;  %v1896_v36 = vmul.f32 %v4284_v25, %v1864_v24  ;;  %v1835_v47 = vmul.f32 %v4286_v51, %v1735_v44  ;;  %v2697_v17 = vpop.xlane.xlu1 %2696 }
 0x3e5   : > { %4299 = vrcp.f32 %v2697_v17 }
 0x3e6   : > { %v4288_v4 = vpop.eup %4287  ;;  %v5936_v12 = vmul.f32 %v5574_v15, %v1896_v36  ;;  %v1867_v5 = vsub.f32 2.0, %v1835_v47 }
 0x3e7   : > { %v4290_v49 = vpop.eup %4289  ;;  %v2802_v21 = vmul.f32 %v4288_v4, %v2694_v39 }
 0x3e8   : > { %1960 = vst.msk [vmem:[%s5906_s20 + $0x50] sm:$0xff] %vm1501_vm3, %v5936_v12  ;;  %v1899_v19 = vmul.f32 %v4286_v51, %v1867_v5  ;;  %v1834_v42 = vmul.f32 %v4290_v49, %v1732_v7  ;;  %v2706_v30 = vpop.xlane.xlu1 %2705 }
 0x3e9   : > { %v2834_v20 = vsub.f32 2.0, %v2802_v21  ;;  %4301 = vrcp.f32 %v2706_v30 }
 0x3ea   : > { %v4292_v25 = vpop.eup %4291  ;;  %v5942_v44 = vmul.f32 %v5581_v6, %v1899_v19  ;;  %v1866_v24 = vsub.f32 2.0, %v1834_v42 }
 0x3eb   : > { %v4294_v15 = vpop.eup %4293  ;;  %v2866_v36 = vmul.f32 %v4288_v4, %v2834_v20  ;;  %v2801_v47 = vmul.f32 %v4292_v25, %v2691_v57 }
 0x3ec   : > { %1963 = vst.msk [vmem:[%s5906_s20 + $0x68] sm:$0xff] %vm1501_vm3, %v5942_v44  ;;  %v1898_v39 = vmul.f32 %v4290_v49, %v1866_v24  ;;  %v1837_v0 = vmul.f32 %v4294_v15, %v1741_v41  ;;  %v2703_v51 = vpop.xlane.xlu1 %2702  ;;  %v6597_v49 = vld [vmem:[#allocation23_spill] sm:$0xff] }
 0x3ed   : > { %v5948_v7 = vmul.f32 %v5588_v59, %v2866_v36  ;;  %v2833_v21 = vsub.f32 2.0, %v2801_v47  ;;  %4303 = vrcp.f32 %v2703_v51  ;;  %v6599_v47 = vld [vmem:[#allocation24_spill] sm:$0xff] }
 0x3ee   : > { %v4296_v5 = vpop.eup %4295  ;;  %v5951_v6 = vmul.f32 %v5590_v1, %v1898_v39  ;;  %v1869_v19 = vsub.f32 2.0, %v1837_v0 }
 0x3ef   : > { %6596 = vst [vmem:[#allocation20_spill] sm:$0xff] %v5948_v7  ;;  %v4298_v42 = vpop.eup %4297  ;;  %3638 = vst.msk [vmem:[%s5906_s20 + $0x148] sm:$0xff] %vm1501_vm3, %v5948_v7  ;;  %v2865_v20 = vmul.f32 %v4292_v25, %v2833_v21  ;;  %v2804_v4 = vmul.f32 %v4296_v5, %v2700_v18  ;;  %v6606_v7 = vld [vmem:[#allocation29_spill] sm:$0xff] }
 0x3f0   : > { %1962 = vst.msk [vmem:[%s5906_s20 + $0x60] sm:$0xff] %vm1501_vm3, %v5951_v6  ;;  %v1901_v59 = vmul.f32 %v4294_v15, %v1869_v19  ;;  %v1836_v57 = vmul.f32 %v4298_v42, %v1738_v48  ;;  %v2712_v41 = vpop.xlane.xlu1 %2711  ;;  %v6600_v19 = vld [vmem:[#allocation25_spill] sm:$0xff] }
 0x3f1   : > { %v5960_v24 = vmul.f32 %v6597_v49, %v2865_v20  ;;  %v2836_v1 = vsub.f32 2.0, %v2804_v4  ;;  %4305 = vrcp.f32 %v2712_v41  ;;  %v1765_v0 = vpop.xlane.xlu0 %1764 }
 0x3f2   : > { %v4300_v36 = vpop.eup %4299  ;;  %v5963_v39 = vmul.f32 %v6599_v47, %v1901_v59  ;;  %v1868_v25 = vsub.f32 2.0, %v1836_v57  ;;  %4307 = vrcp.f32 %v1765_v0  ;;  %v6602_v57 = vld [vmem:[#allocation26_spill] sm:$0xff] }
 0x3f3   : > { %6598 = vst [vmem:[#allocation23_spill] sm:$0xff] %v5960_v24  ;;  %3637 = vst.msk [vmem:[%s5906_s20 + $0x140] sm:$0xff] %vm1501_vm3, %v5960_v24  ;;  %v2868_v18 = vmul.f32 %v4296_v5, %v2836_v1  ;;  %v2803_v48 = vmul.f32 %v4300_v36, %v2697_v17 }
 0x3f4   : > { %1965 = vst.msk [vmem:[%s5906_s20 + $0x78] sm:$0xff] %vm1501_vm3, %v5963_v39  ;;  %v1900_v15 = vmul.f32 %v4298_v42, %v1868_v25  ;;  %v2709_v21 = vpop.xlane.xlu1 %2708  ;;  %v6603_v42 = vld [vmem:[#allocation27_spill] sm:$0xff] }
 0x3f5   : > { %v5972_v20 = vmul.f32 %v6600_v19, %v2868_v18  ;;  %v2835_v4 = vsub.f32 2.0, %v2803_v48  ;;  %4309 = vrcp.f32 %v2709_v21  ;;  %v6605_v19 = vld [vmem:[#allocation28_spill] sm:$0xff] }
 0x3f6   : > { %v4302_v59 = vpop.eup %4301  ;;  %v5975_v49 = vmul.f32 %v6602_v57, %v1900_v15 }
 0x3f7   : > { %6601 = vst [vmem:[#allocation24_spill] sm:$0xff] %v5972_v20  ;;  %3640 = vst.msk [vmem:[%s5906_s20 + $0x158] sm:$0xff] %vm1501_vm3, %v5972_v20  ;;  %v2867_v5 = vmul.f32 %v4300_v36, %v2835_v4  ;;  %v2806_v17 = vmul.f32 %v4302_v59, %v2706_v30 }
 0x3f8   : > { %1964 = vst.msk [vmem:[%s5906_s20 + $0x70] sm:$0xff] %vm1501_vm3, %v5975_v49 }
 0x3f9   : > { %v5984_v1 = vmul.f32 %v6603_v42, %v2867_v5  ;;  %v2838_v47 = vsub.f32 2.0, %v2806_v17  ;;  %v1771_v25 = vpop.xlane.xlu0 %1770 }
 0x3fa   : > { %v4304_v18 = vpop.eup %4303  ;;  %4311 = vrcp.f32 %v1771_v25 }
 0x3fb   : > { %6604 = vst [vmem:[#allocation25_spill] sm:$0xff] %v5984_v1  ;;  %3639 = vst.msk [vmem:[%s5906_s20 + $0x150] sm:$0xff] %vm1501_vm3, %v5984_v1  ;;  %v2870_v48 = vmul.f32 %v4302_v59, %v2838_v47  ;;  %v2805_v15 = vmul.f32 %v4304_v18, %v2703_v51  ;;  %v6607_v1 = vld [vmem:[#allocation30_spill] sm:$0xff] }
 0x3fd   : > { %v5990_v57 = vmul.f32 %v6605_v19, %v2870_v48  ;;  %v2837_v30 = vsub.f32 2.0, %v2805_v15  ;;  %v1768_v36 = vpop.xlane.xlu0 %1767 }
 0x3fe   : > { %v4306_v4 = vpop.eup %4305  ;;  %4313 = vrcp.f32 %v1768_v36 }
 0x3ff   : > { %v4308_v24 = vpop.eup %4307  ;;  %3642 = vst.msk [vmem:[%s5906_s20 + $0x168] sm:$0xff] %vm1501_vm3, %v5990_v57  ;;  %v2869_v5 = vmul.f32 %v4304_v18, %v2837_v30  ;;  %v2808_v17 = vmul.f32 %v4306_v4, %v2712_v41 }
 0x400   : > { %v1845_v42 = vmul.f32 %v4308_v24, %v1765_v0  ;;  %v6608_v0 = vld [vmem:[#allocation31_spill] sm:$0xff] }
 0x401   : > { %v5996_v55 = vmul.f32 %v6606_v7, %v2869_v5  ;;  %v2840_v51 = vsub.f32 2.0, %v2808_v17  ;;  %v1777_v59 = vpop.xlane.xlu0 %1776 }
 0x402   : > { %v4310_v47 = vpop.eup %4309  ;;  %v1877_v48 = vsub.f32 2.0, %v1845_v42  ;;  %4315 = vrcp.f32 %v1777_v59 }
 0x403   : > { %3641 = vst.msk [vmem:[%s5906_s20 + $0x160] sm:$0xff] %vm1501_vm3, %v5996_v55  ;;  %v2872_v15 = vmul.f32 %v4306_v4, %v2840_v51  ;;  %v2807_v19 = vmul.f32 %v4310_v47, %v2709_v21 }
 0x404   : > { %v1909_v8 = vmul.f32 %v4308_v24, %v1877_v48 }
 0x405   : > { %v6002_v18 = vmul.f32 %v6607_v1, %v2872_v15  ;;  %v2839_v41 = vsub.f32 2.0, %v2807_v19  ;;  %v1774_v7 = vpop.xlane.xlu0 %1773 }
 0x406   : > { %v6005_v30 = vmul.f32 %v6608_v0, %v1909_v8  ;;  %4317 = vrcp.f32 %v1774_v7 }
 0x407   : > { %v4312_v5 = vpop.eup %4311  ;;  %3644 = vst.msk [vmem:[%s5906_s20 + $0x178] sm:$0xff] %vm1501_vm3, %v6002_v18  ;;  %v2871_v17 = vmul.f32 %v4310_v47, %v2839_v41 }
 0x408   : > { %1973 = vst.msk [vmem:[%s5906_s20 + $0xb8] sm:$0xff] %vm1501_vm3, %v6005_v30  ;;  %v1847_v21 = vmul.f32 %v4312_v5, %v1771_v25  ;;  %v2736_v24 = vpop.xlane.xlu1 %2735 }
 0x409   : > { %v6014_v1 = vmul.f32 %v5649_v31, %v2871_v17  ;;  %4319 = vrcp.f32 %v2736_v24  ;;  %v1783_v4 = vpop.xlane.xlu0 %1782 }
 0x40a   : > { %v1879_v42 = vsub.f32 2.0, %v1847_v21  ;;  %4321 = vrcp.f32 %v1783_v4 }
 0x40b   : > { %v4314_v8 = vpop.eup %4313  ;;  %3643 = vst.msk [vmem:[%s5906_s20 + $0x170] sm:$0xff] %vm1501_vm3, %v6014_v1 }
 0x40c   : > { %v1911_v51 = vmul.f32 %v4312_v5, %v1879_v42  ;;  %v1846_v48 = vmul.f32 %v4314_v8, %v1768_v36 }
 0x40d   : > { %v1780_v47 = vpop.xlane.xlu0 %1779 }
 0x40e   : > { %v6020_v15 = vmul.f32 %v5656_v28, %v1911_v51  ;;  %v1878_v25 = vsub.f32 2.0, %v1846_v48  ;;  %4323 = vrcp.f32 %v1780_v47 }
 0x40f   : > { %v4316_v19 = vpop.eup %4315 }
 0x410   : > { %1975 = vst.msk [vmem:[%s5906_s20 + $0xc8] sm:$0xff] %vm1501_vm3, %v6020_v15  ;;  %v1910_v31 = vmul.f32 %v4314_v8, %v1878_v25  ;;  %v1849_v41 = vmul.f32 %v4316_v19, %v1777_v59  ;;  %v2742_v0 = vpop.xlane.xlu1 %2741 }
 0x411   : > { %4325 = vrcp.f32 %v2742_v0  ;;  %v1789_v17 = vpop.xlane.xlu0 %1788 }
 0x412   : > { %v6026_v21 = vmul.f32 %v5664_v3, %v1910_v31  ;;  %v1881_v36 = vsub.f32 2.0, %v1849_v41  ;;  %4327 = vrcp.f32 %v1789_v17 }
 0x413   : > { %v4318_v5 = vpop.eup %4317 }
 0x414   : > { %1974 = vst.msk [vmem:[%s5906_s20 + $0xc0] sm:$0xff] %vm1501_vm3, %v6026_v21  ;;  %v1913_v28 = vmul.f32 %v4316_v19, %v1881_v36  ;;  %v1848_v42 = vmul.f32 %v4318_v5, %v1774_v7  ;;  %v2739_v51 = vpop.xlane.xlu1 %2738 }
 0x415   : > { %4329 = vrcp.f32 %v2739_v51  ;;  %v1786_v48 = vpop.xlane.xlu0 %1785 }
 0x416   : > { %v4320_v8 = vpop.eup %4319  ;;  %v6032_v59 = vmul.f32 %v5670_v26, %v1913_v28  ;;  %v1880_v25 = vsub.f32 2.0, %v1848_v42  ;;  %4331 = vrcp.f32 %v1786_v48 }
 0x417   : > { %v4322_v3 = vpop.eup %4321  ;;  %v2816_v31 = vmul.f32 %v4320_v8, %v2736_v24 }
 0x418   : > { %1977 = vst.msk [vmem:[%s5906_s20 + $0xd8] sm:$0xff] %vm1501_vm3, %v6032_v59  ;;  %v1912_v41 = vmul.f32 %v4318_v5, %v1880_v25  ;;  %v1851_v37 = vmul.f32 %v4322_v3, %v1783_v4  ;;  %v2748_v54 = vpop.xlane.xlu1 %2747 }
 0x419   : > { %v2848_v19 = vsub.f32 2.0, %v2816_v31  ;;  %4333 = vrcp.f32 %v2748_v54  ;;  %v1717_v7 = vpop.xlane.xlu0 %1716 }
 0x41a   : > { %v6038_v36 = vmul.f32 %v5677_v14, %v1912_v41  ;;  %v1883_v20 = vsub.f32 2.0, %v1851_v37  ;;  %4335 = vrcp.f32 %v1717_v7 }
 0x41b   : > { %v4324_v26 = vpop.eup %4323  ;;  %v2880_v28 = vmul.f32 %v4320_v8, %v2848_v19 }
 0x41c   : > { %1976 = vst.msk [vmem:[%s5906_s20 + $0xd0] sm:$0xff] %vm1501_vm3, %v6038_v36  ;;  %v1915_v24 = vmul.f32 %v4322_v3, %v1883_v20  ;;  %v1850_v42 = vmul.f32 %v4324_v26, %v1780_v47  ;;  %v2745_v5 = vpop.xlane.xlu1 %2744 }
 0x41d   : > { %v6044_v4 = vmul.f32 %v5684_v62, %v2880_v28  ;;  %4337 = vrcp.f32 %v2745_v5  ;;  %v1762_v25 = vpop.xlane.xlu0 %1761 }
 0x41e   : > { %v4326_v31 = vpop.eup %4325  ;;  %v6047_v14 = vmul.f32 %v5686_v63, %v1915_v24  ;;  %v1882_v37 = vsub.f32 2.0, %v1850_v42  ;;  %4339 = vrcp.f32 %v1762_v25 }
 0x41f   : > { %6609 = vst [vmem:[#allocation26_spill] sm:$0xff] %v6044_v4  ;;  %v4328_v41 = vpop.eup %4327  ;;  %3652 = vst.msk [vmem:[%s5906_s20 + $0x1b8] sm:$0xff] %vm1501_vm3, %v6044_v4  ;;  %v2818_v8 = vmul.f32 %v4326_v31, %v2742_v0 }
 0x420   : > { %1979 = vst.msk [vmem:[%s5906_s20 + $0xe8] sm:$0xff] %vm1501_vm3, %v6047_v14  ;;  %v1914_v20 = vmul.f32 %v4324_v26, %v1882_v37  ;;  %v1853_v62 = vmul.f32 %v4328_v41, %v1789_v17  ;;  %v6055_v47 = vpop.xlane.xlu1 %2753 }
 0x421   : > { %v2850_v3 = vsub.f32 2.0, %v2818_v8  ;;  %4341 = vrcp.f32 %v6055_v47  ;;  %v6058_v63 = vpop.xlane.xlu0 %1713 }
 0x422   : > { %v4330_v19 = vpop.eup %4329  ;;  %v6061_v28 = vmul.f32 %v5695_v9, %v1914_v20  ;;  %v1885_v24 = vsub.f32 2.0, %v1853_v62  ;;  %4343 = vrcp.f32 %v6058_v63 }
 0x423   : > { %v4332_v0 = vpop.eup %4331  ;;  %v2882_v42 = vmul.f32 %v4326_v31, %v2850_v3  ;;  %v2817_v4 = vmul.f32 %v4330_v19, %v2739_v51 }
 0x424   : > { %1978 = vst.msk [vmem:[%s5906_s20 + $0xe0] sm:$0xff] %vm1501_vm3, %v6061_v28  ;;  %v1917_v17 = vmul.f32 %v4328_v41, %v1885_v24  ;;  %v1852_v26 = vmul.f32 %v4332_v0, %v1786_v48  ;;  %v6067_v37 = vpop.xlane.xlu1 %2750 }
 0x425   : > { %v6070_v8 = vmul.f32 %v5704_v32, %v2882_v42  ;;  %v2849_v9 = vsub.f32 2.0, %v2817_v4  ;;  %4345 = vrcp.f32 %v6067_v37  ;;  %v6073_v20 = vpop.xlane.xlu0 %1758 }
 0x426   : > { %v4334_v62 = vpop.eup %4333  ;;  %v1949_v31 = vmul.f32 %v5701_v22, %v1917_v17  ;;  %v1884_v51 = vsub.f32 2.0, %v1852_v26  ;;  %4347 = vrcp.f32 %v6073_v20 }
 0x427   : > { %v4336_v3 = vpop.eup %4335  ;;  %3654 = vst.msk [vmem:[%s5906_s20 + $0x1c8] sm:$0xff] %vm1501_vm3, %v6070_v8  ;;  %v2881_v48 = vmul.f32 %v4330_v19, %v2849_v9  ;;  %v2820_v41 = vmul.f32 %v4334_v62, %v2748_v54 }
 0x428   : > { %1981 = vst.msk [vmem:[%s5906_s20 + $0xf8] sm:$0xff] %vm1501_vm3, %v1949_v31  ;;  %v1916_v32 = vmul.f32 %v4332_v0, %v1884_v51  ;;  %v1829_v4 = vmul.f32 %v4336_v3, %v1717_v7  ;;  %v6082_v24 = vpop.xlane.xlu1 %2759  ;;  %3931 = vmatprep.subr.msk.mxu0 %vm1501_vm3, %v1949_v31 }
 0x429   : > { %v6086_v22 = vmul.f32 %v5716_v35, %v2881_v48  ;;  %v2852_v42 = vsub.f32 2.0, %v2820_v41  ;;  %4349 = vrcp.f32 %v6082_v24  ;;  %3932 = vmatpush3.xpose.msk.msra.mxu0 %vm1501_vm3, %v5963_v39  ;;  %v6091_v54 = vpop.xlane.xlu0 %1710 }
 0x42a   : > { %v4338_v19 = vpop.eup %4337  ;;  %v1948_v0 = vmul.f32 %v5713_v40, %v1916_v32  ;;  %v1861_v7 = vsub.f32 2.0, %v1829_v4  ;;  %4351 = vrcp.f32 %v6091_v54 }
 0x42b   : > { %v4340_v17 = vpop.eup %4339  ;;  %3653 = vst.msk [vmem:[%s5906_s20 + $0x1c0] sm:$0xff] %vm1501_vm3, %v6086_v22  ;;  %v2884_v35 = vmul.f32 %v4334_v62, %v2852_v42  ;;  %v2819_v26 = vmul.f32 %v4338_v19, %v2745_v5 }
 0x42c   : > { %1980 = vst.msk [vmem:[%s5906_s20 + $0xf0] sm:$0xff] %vm1501_vm3, %v1948_v0  ;;  %v1893_v9 = vmul.f32 %v4336_v3, %v1861_v7  ;;  %v1844_v31 = vmul.f32 %v4340_v17, %v1762_v25  ;;  %v6100_v39 = vpop.xlane.xlu1 %2756  ;;  %3933 = vmatprep.subr.msk.mxu0 %vm1501_vm3, %v1948_v0 }
 0x42d   : > { %v6104_v40 = vmul.f32 %v5728_v16, %v2884_v35  ;;  %v2851_v51 = vsub.f32 2.0, %v2819_v26  ;;  %4353 = vrcp.f32 %v6100_v39  ;;  %3934 = vmatpush3.xpose.msk.msra.mxu0 %vm1501_vm3, %v5975_v49  ;;  %v6109_v5 = vpop.xlane.xlu0 %1755 }
 0x42e   : > { %v4342_v62 = vpop.eup %4341  ;;  %v6112_v3 = vmul.f32 %v5726_v23, %v1893_v9  ;;  %v1876_v25 = vsub.f32 2.0, %v1844_v31  ;;  %4355 = vrcp.f32 %v6109_v5  ;;  %3935 = vmatprep.subr.msk.mxu0 %vm1501_vm3, %v6047_v14 }
 0x42f   : > { %v4344_v16 = vpop.eup %4343  ;;  %3656 = vst.msk [vmem:[%s5906_s20 + $0x1d8] sm:$0xff] %vm1501_vm3, %v6104_v40  ;;  %v2883_v48 = vmul.f32 %v4338_v19, %v2851_v51  ;;  %v2822_v41 = vmul.f32 %v4342_v62, %v6055_v47 }
 0x430   : > { %1957 = vst.msk [vmem:[%s5906_s20 + $0x38] sm:$0xff] %vm1501_vm3, %v6112_v3  ;;  %v1908_v49 = vmul.f32 %v4340_v17, %v1876_v25  ;;  %v1828_v23 = vmul.f32 %v4344_v16, %v6058_v63  ;;  %v6125_v32 = vpop.xlane.xlu1 %2687 }
 0x431   : > { %v6128_v4 = vmul.f32 %v5741_v53, %v2883_v48  ;;  %v2854_v14 = vsub.f32 2.0, %v2822_v41  ;;  %4357 = vrcp.f32 %v6125_v32  ;;  %3936 = vmatpush3.xpose.msk.msra.mxu0 %vm1501_vm3, %v5942_v44  ;;  %v6133_v47 = vpop.xlane.xlu0 %1707 }
 0x432   : > { %v4346_v42 = vpop.eup %4345  ;;  %v6136_v19 = vmul.f32 %v5738_v10, %v1908_v49  ;;  %v1860_v0 = vsub.f32 2.0, %v1828_v23  ;;  %4359 = vrcp.f32 %v6133_v47  ;;  %3937 = vmatprep.subr.msk.mxu0 %vm1501_vm3, %v6061_v28 }
 0x433   : > { %v4348_v53 = vpop.eup %4347  ;;  %3655 = vst.msk [vmem:[%s5906_s20 + $0x1d0] sm:$0xff] %vm1501_vm3, %v6128_v4  ;;  %v2886_v63 = vmul.f32 %v4342_v62, %v2854_v14  ;;  %v2821_v7 = vmul.f32 %v4346_v42, %v6067_v37 }
 0x434   : > { %1972 = vst.msk [vmem:[%s5906_s20 + $0xb0] sm:$0xff] %vm1501_vm3, %v6136_v19  ;;  %v1892_v44 = vmul.f32 %v4344_v16, %v1860_v0  ;;  %v1843_v10 = vmul.f32 %v4348_v53, %v6073_v20  ;;  %v6149_v17 = vpop.xlane.xlu1 %2732 }
 0x435   : > { %v6152_v35 = vmul.f32 %v5753_v29, %v2886_v63  ;;  %v2853_v28 = vsub.f32 2.0, %v2821_v7  ;;  %4361 = vrcp.f32 %v6149_v17  ;;  %3938 = vmatpush3.xpose.msk.msra.mxu0 %vm1501_vm3, %v5951_v6  ;;  %v6157_v37 = vpop.xlane.xlu0 %1752 }
 0x436   : > { %v4350_v26 = vpop.eup %4349  ;;  %v6160_v9 = vmul.f32 %v5751_v43, %v1892_v44  ;;  %v1875_v31 = vsub.f32 2.0, %v1843_v10  ;;  %4363 = vrcp.f32 %v6157_v37  ;;  %3939 = vmatprep.subr.msk.mxu0 %vm1501_vm3, %v6032_v59 }
 0x437   : > { %v4352_v29 = vpop.eup %4351  ;;  %3658 = vst.msk [vmem:[%s5906_s20 + $0x1e8] sm:$0xff] %vm1501_vm3, %v6152_v35  ;;  %v2885_v20 = vmul.f32 %v4346_v42, %v2853_v28  ;;  %v2824_v51 = vmul.f32 %v4350_v26, %v6082_v24 }
 0x438   : > { %1956 = vst.msk [vmem:[%s5906_s20 + $0x30] sm:$0xff] %vm1501_vm3, %v6160_v9  ;;  %v1907_v6 = vmul.f32 %v4348_v53, %v1875_v31  ;;  %v1827_v43 = vmul.f32 %v4352_v29, %v6091_v54  ;;  %v6173_v62 = vpop.xlane.xlu1 %2684 }
 0x439   : > { %v6176_v25 = vmul.f32 %v5765_v61, %v2885_v20  ;;  %v2856_v59 = vsub.f32 2.0, %v2824_v51  ;;  %4365 = vrcp.f32 %v6173_v62  ;;  %3940 = vmatpush3.xpose.msk.msra.mxu0 %vm1501_vm3, %v5930_v33  ;;  %v6181_v24 = vpop.xlane.xlu0 %1704 }
 0x43a   : > { %v4354_v16 = vpop.eup %4353  ;;  %v6184_v48 = vmul.f32 %v5763_v50, %v1907_v6  ;;  %v1859_v41 = vsub.f32 2.0, %v1827_v43  ;;  %4367 = vrcp.f32 %v6181_v24  ;;  %3941 = vmatprep.subr.msk.mxu0 %vm1501_vm3, %v6038_v36 }
 0x43b   : > { %v4356_v61 = vpop.eup %4355  ;;  %3657 = vst.msk [vmem:[%s5906_s20 + $0x1e0] sm:$0xff] %vm1501_vm3, %v6176_v25  ;;  %v2888_v54 = vmul.f32 %v4350_v26, %v2856_v59  ;;  %v2823_v49 = vmul.f32 %v4354_v16, %v6100_v39 }
 0x43c   : > { %1971 = vst.msk [vmem:[%s5906_s20 + $0xa8] sm:$0xff] %vm1501_vm3, %v6184_v48  ;;  %v1891_v33 = vmul.f32 %v4352_v29, %v1859_v41  ;;  %v1842_v50 = vmul.f32 %v4356_v61, %v6109_v5  ;;  %v6197_v23 = vpop.xlane.xlu1 %2729 }
 0x43d   : > { %v2920_v14 = vmul.f32 %v5771_v27, %v2888_v54  ;;  %v2855_v36 = vsub.f32 2.0, %v2823_v49  ;;  %4369 = vrcp.f32 %v6197_v23  ;;  %3942 = vmatpush3.xpose.msk.msra.mxu0 %vm1501_vm3, %v5936_v12  ;;  %v6203_v42 = vpop.xlane.xlu0 %1749 }
 0x43e   : > { %v4358_v39 = vpop.eup %4357  ;;  %v6206_v0 = vmul.f32 %v5776_v11, %v1891_v33  ;;  %v1874_v53 = vsub.f32 2.0, %v1842_v50  ;;  %4371 = vrcp.f32 %v6203_v42  ;;  %3943 = vmatprep.subr.msk.mxu0 %vm1501_vm3, %v6020_v15 }
 0x43f   : > { %v4360_v5 = vpop.eup %4359  ;;  %3660 = vst.msk [vmem:[%s5906_s20 + $0x1f8] sm:$0xff] %vm1501_vm3, %v2920_v14  ;;  %v2887_v27 = vmul.f32 %v4354_v16, %v2855_v36  ;;  %v2800_v63 = vmul.f32 %v4358_v39, %v6125_v32  ;;  %3897 = vmatprep.subr.msk.mxu1 %vm1501_vm3, %v2920_v14  ;;  %v6611_v36 = vld [vmem:[#allocation8_spill] sm:$0xff] }
 0x440   : > { %1955 = vst.msk [vmem:[%s5906_s20 + $0x28] sm:$0xff] %vm1501_vm3, %v6206_v0  ;;  %v1906_v11 = vmul.f32 %v4356_v61, %v1874_v53  ;;  %v1826_v12 = vmul.f32 %v4360_v5, %v6133_v47  ;;  %3898 = vmatpush3.xpose.msk.msra.mxu1 %vm1501_vm3, %v6002_v18  ;;  %v6221_v7 = vpop.xlane.xlu1 %2681 }
 0x441   : > { %v2919_v15 = vmul.f32 %v5787_v34, %v2887_v27  ;;  %v2832_v44 = vsub.f32 2.0, %v2800_v63  ;;  %4373 = vrcp.f32 %v6221_v7  ;;  %3944 = vmatpush3.xpose.msk.msra.mxu0 %vm1501_vm3, %v5911_v38  ;;  %v6227_v32 = vpop.xlane.xlu0 %1701 }
 0x442   : > { %v4362_v10 = vpop.eup %4361  ;;  %v6230_v28 = vmul.f32 %v5785_v13, %v1906_v11  ;;  %v1858_v47 = vsub.f32 2.0, %v1826_v12  ;;  %4375 = vrcp.f32 %v6227_v32  ;;  %3945 = vmatprep.subr.msk.mxu0 %vm1501_vm3, %v6026_v21 }
 0x443   : > { %v4364_v18 = vpop.eup %4363  ;;  %3659 = vst.msk [vmem:[%s5906_s20 + $0x1f0] sm:$0xff] %vm1501_vm3, %v2919_v15  ;;  %v2864_v34 = vmul.f32 %v4358_v39, %v2832_v44  ;;  %v2815_v26 = vmul.f32 %v4362_v10, %v6149_v17  ;;  %3899 = vmatprep.subr.msk.mxu1 %vm1501_vm3, %v2919_v15  ;;  %v6613_v15 = vld [vmem:[#allocation25_spill] sm:$0xff] }
 0x444   : > { %1970 = vst.msk [vmem:[%s5906_s20 + $0xa0] sm:$0xff] %vm1501_vm3, %v6230_v28  ;;  %v1890_v38 = vmul.f32 %v4360_v5, %v1858_v47  ;;  %v1841_v13 = vmul.f32 %v4364_v18, %v6157_v37  ;;  %3900 = vmatpush3.xpose.msk.msra.mxu1 %vm1501_vm3, %v6014_v1  ;;  %v6245_v31 = vpop.xlane.xlu1 %2726  ;;  %v6612_v5 = vld [vmem:[#allocation7_spill] sm:$0xff] }
 0x445   : > { %v6248_v21 = vmul.f32 %v5793_v2, %v2864_v34  ;;  %v2847_v29 = vsub.f32 2.0, %v2815_v26  ;;  %4377 = vrcp.f32 %v6245_v31  ;;  %3901 = vmatprep.subr.msk.mxu1 %vm1501_vm3, %v6152_v35  ;;  %3946 = vmatpush3.xpose.msk.msra.mxu0 %vm1501_vm3, %v5922_v46  ;;  %v6255_v17 = vpop.xlane.xlu0 %1746 }
 0x446   : > { %v4366_v37 = vpop.eup %4365  ;;  %v6258_v1 = vmul.f32 %v5798_v52, %v1890_v38  ;;  %v1873_v20 = vsub.f32 2.0, %v1841_v13  ;;  %4379 = vrcp.f32 %v6255_v17  ;;  %3947 = vmatprep.subr.msk.mxu0 %vm1501_vm3, %v6005_v30 }
 0x447   : > { %v4368_v2 = vpop.eup %4367  ;;  %3636 = vst.msk [vmem:[%s5906_s20 + $0x138] sm:$0xff] %vm1501_vm3, %v6248_v21  ;;  %v2879_v35 = vmul.f32 %v4362_v10, %v2847_v29  ;;  %v2799_v51 = vmul.f32 %v4366_v37, %v6173_v62 }
 0x448   : > { %1954 = vst.msk [vmem:[%s5906_s20 + $0x20] sm:$0xff] %vm1501_vm3, %v6258_v1  ;;  %v1905_v46 = vmul.f32 %v4364_v18, %v1873_v20  ;;  %v1825_v52 = vmul.f32 %v4368_v2, %v6181_v24  ;;  %3902 = vmatpush3.xpose.msk.msra.mxu1 %vm1501_vm3, %v5990_v57  ;;  %v6273_v6 = vpop.xlane.xlu1 %2678  ;;  %v6615_v18 = vld [vmem:[#allocation10_spill] sm:$0xff] }
 0x449   : > { %v6276_v30 = vmul.f32 %v5804_v56, %v2879_v35  ;;  %v2831_v43 = vsub.f32 2.0, %v2799_v51  ;;  %4381 = vrcp.f32 %v6273_v6  ;;  %3903 = vmatprep.subr.msk.mxu1 %vm1501_vm3, %v6176_v25  ;;  %3948 = vmatpush3.xpose.msk.msra.mxu0 %vm1501_vm3, %v6112_v3  ;;  %v6283_v62 = vpop.xlane.xlu0 %1698  ;;  %v6618_v51 = vld [vmem:[#allocation11_spill] sm:$0xff] }
 0x44a   : > { %v4370_v59 = vpop.eup %4369  ;;  %v1937_v57 = vmul.f32 %v5809_v58, %v1905_v46  ;;  %v1857_v24 = vsub.f32 2.0, %v1825_v52  ;;  %4383 = vrcp.f32 %v6283_v62  ;;  %3949 = vmatprep.subr.msk.mxu0 %vm1501_vm3, %v6136_v19 }
 0x44b   : > { %v4372_v56 = vpop.eup %4371  ;;  %3651 = vst.msk [vmem:[%s5906_s20 + $0x1b0] sm:$0xff] %vm1501_vm3, %v6276_v30  ;;  %v2863_v16 = vmul.f32 %v4366_v37, %v2831_v43  ;;  %v2814_v25 = vmul.f32 %v4370_v59, %v6197_v23 }
 0x44c   : > { %1969 = vst.msk [vmem:[%s5906_s20 + $0x98] sm:$0xff] %vm1501_vm3, %v1937_v57  ;;  %v1889_v3 = vmul.f32 %v4368_v2, %v1857_v24  ;;  %v1840_v41 = vmul.f32 %v4372_v56, %v6203_v42  ;;  %3904 = vmatpush3.xpose.msk.msra.mxu1 %vm1501_vm3, %v5996_v55  ;;  %v6298_v58 = vpop.xlane.xlu1 %2723 }
 0x44d   : > { %v6301_v19 = vmul.f32 %v5815_v60, %v2863_v16  ;;  %v2846_v61 = vsub.f32 2.0, %v2814_v25  ;;  %4385 = vrcp.f32 %v6298_v58  ;;  %3905 = vmatprep.subr.msk.mxu1 %vm1501_vm3, %v6104_v40  ;;  %3950 = vmatpush3.xpose.msk.msra.mxu0 %vm1501_vm3, %v6160_v9  ;;  %v6308_v54 = vpop.xlane.xlu0 %1743 }
 0x44e   : > { %v4374_v49 = vpop.eup %4373  ;;  %v1921_v55 = vmul.f32 %v5820_v45, %v1889_v3  ;;  %v1872_v33 = vsub.f32 2.0, %v1840_v41  ;;  %4387 = vrcp.f32 %v6308_v54  ;;  %3951 = vmatprep.subr.msk.mxu0 %vm1501_vm3, %v6184_v48  ;;  %v6610_v45 = vld [vmem:[#allocation24_spill] sm:$0xff]  ;;  %v6621_v3 = vld [vmem:[#allocation26_spill] sm:$0xff] }
 0x44f   : > { %v4376_v60 = vpop.eup %4375  ;;  %3635 = vst.msk [vmem:[%s5906_s20 + $0x130] sm:$0xff] %vm1501_vm3, %v6301_v19  ;;  %v2878_v50 = vmul.f32 %v4370_v59, %v2846_v61  ;;  %v2798_v40 = vmul.f32 %v4374_v49, %v6221_v7 }
 0x450   : > { %1953 = vst.msk [vmem:[%s5906_s20 + $0x18] sm:$0xff] %vm1501_vm3, %v1921_v55  ;;  %v1904_v9 = vmul.f32 %v4372_v56, %v1872_v33  ;;  %v1824_v23 = vmul.f32 %v4376_v60, %v6227_v32  ;;  %3906 = vmatpush3.xpose.msk.msra.mxu1 %vm1501_vm3, %v6610_v45  ;;  %v6323_v14 = vpop.xlane.xlu1 %2675  ;;  %v6614_v32 = vld [vmem:[#allocation2_spill] sm:$0xff]  ;;  %v6620_v56 = vld [vmem:[#allocation12_spill] sm:$0xff] }
 0x451   : > { %v6326_v48 = vmul.f32 %v6611_v36, %v2878_v50  ;;  %v2830_v42 = vsub.f32 2.0, %v2798_v40  ;;  %4389 = vrcp.f32 %v6323_v14  ;;  %3907 = vmatprep.subr.msk.mxu1 %vm1501_vm3, %v6128_v4  ;;  %3952 = vmatpush3.xpose.msk.msra.mxu0 %vm1501_vm3, %v6206_v0  ;;  %v6333_v39 = vpop.xlane.xlu0 %1695  ;;  %v6624_v36 = vld [vmem:[#allocation14_spill] sm:$0xff] }
 0x452   : > { %v4378_v53 = vpop.eup %4377  ;;  %v1936_v27 = vmul.f32 %v6612_v5, %v1904_v9  ;;  %v1856_v63 = vsub.f32 2.0, %v1824_v23  ;;  %4391 = vrcp.f32 %v6333_v39  ;;  %3953 = vmatprep.subr.msk.mxu0 %vm1501_vm3, %v6230_v28  ;;  %v6623_v9 = vld [vmem:[#allocation9_spill] sm:$0xff] }
 0x453   : > { %v4380_v11 = vpop.eup %4379  ;;  %3650 = vst.msk [vmem:[%s5906_s20 + $0x1a8] sm:$0xff] %vm1501_vm3, %v6326_v48  ;;  %v2862_v12 = vmul.f32 %v4374_v49, %v2830_v42  ;;  %v2813_v4 = vmul.f32 %v4378_v53, %v6245_v31 }
 0x454   : > { %1968 = vst.msk [vmem:[%s5906_s20 + $0x90] sm:$0xff] %vm1501_vm3, %v1936_v27  ;;  %v1888_v0 = vmul.f32 %v4376_v60, %v1856_v63  ;;  %v1839_v7 = vmul.f32 %v4380_v11, %v6255_v17  ;;  %3908 = vmatpush3.xpose.msk.msra.mxu1 %vm1501_vm3, %v6613_v15  ;;  %v6348_v44 = vpop.xlane.xlu1 %2720  ;;  %v6616_v17 = vld [vmem:[#allocation20_spill] sm:$0xff] }
 0x455   : > { %v6351_v10 = vmul.f32 %v6614_v32, %v2862_v12  ;;  %v2845_v28 = vsub.f32 2.0, %v2813_v4  ;;  %4393 = vrcp.f32 %v6348_v44  ;;  %3909 = vmatprep.subr.msk.mxu1 %vm1501_vm3, %v6070_v8  ;;  %3954 = vmatpush3.xpose.msk.msra.mxu0 %vm1501_vm3, %v6258_v1  ;;  %v6617_v1 = vld [vmem:[#allocation5_spill] sm:$0xff]  ;;  %v6626_v4 = vld [vmem:[#allocation4_spill] sm:$0xff] }
 0x456   : > { %v4382_v47 = vpop.eup %4381  ;;  %v1920_v34 = vmul.f32 %v6615_v18, %v1888_v0  ;;  %v1871_v26 = vsub.f32 2.0, %v1839_v7  ;;  %3955 = vmatprep.subr.msk.mxu0 %vm1501_vm3, %v1937_v57  ;;  %v6619_v57 = vld [vmem:[#allocation23_spill] sm:$0xff] }
 0x457   : > { %v4384_v38 = vpop.eup %4383  ;;  %3634 = vst.msk [vmem:[%s5906_s20 + $0x128] sm:$0xff] %vm1501_vm3, %v6351_v10  ;;  %v2877_v13 = vmul.f32 %v4378_v53, %v2845_v28  ;;  %v2797_v31 = vmul.f32 %v4382_v47, %v6273_v6 }
 0x458   : > { %1952 = vst.msk [vmem:[%s5906_s20 + $0x10] sm:$0xff] %vm1501_vm3, %v1920_v34  ;;  %v1903_v8 = vmul.f32 %v4380_v11, %v1871_v26  ;;  %v1823_v29 = vmul.f32 %v4384_v38, %v6283_v62  ;;  %3910 = vmatpush3.xpose.msk.msra.mxu1 %vm1501_vm3, %v6616_v17  ;;  %v2673_v37 = vpop.xlane.xlu1 %2672 }
 0x459   : > { %v6370_v20 = vmul.f32 %v6617_v1, %v2877_v13  ;;  %v2829_v2 = vsub.f32 2.0, %v2797_v31  ;;  %4395 = vrcp.f32 %v2673_v37  ;;  %3911 = vmatprep.subr.msk.mxu1 %vm1501_vm3, %v6086_v22  ;;  %3956 = vmatpush3.xpose.msk.msra.mxu0 %vm1501_vm3, %v1921_v55 }
 0x45a   : > { %v4386_v35 = vpop.eup %4385  ;;  %v1935_v46 = vmul.f32 %v6618_v51, %v1903_v8  ;;  %v1855_v52 = vsub.f32 2.0, %v1823_v29  ;;  %3957 = vmatprep.subr.msk.mxu0 %vm1501_vm3, %v1936_v27  ;;  %v6625_v27 = vld [vmem:[#allocation21_spill] sm:$0xff]  ;;  %v6630_v29 = vld [vmem:[#allocation16_spill] sm:$0xff] }
 0x45b   : > { %v4388_v6 = vpop.eup %4387  ;;  %3649 = vst.msk [vmem:[%s5906_s20 + $0x1a0] sm:$0xff] %vm1501_vm3, %v6370_v20  ;;  %v2861_v43 = vmul.f32 %v4382_v47, %v2829_v2  ;;  %v2812_v62 = vmul.f32 %v4386_v35, %v6298_v58  ;;  %v6622_v58 = vld [vmem:[#allocation6_spill] sm:$0xff] }
 0x45c   : > { %1967 = vst.msk [vmem:[%s5906_s20 + $0x88] sm:$0xff] %vm1501_vm3, %v1935_v46  ;;  %v1887_v59 = vmul.f32 %v4384_v38, %v1855_v52  ;;  %v1838_v22 = vmul.f32 %v4388_v6, %v6308_v54  ;;  %3912 = vmatpush3.xpose.msk.msra.mxu1 %vm1501_vm3, %v6619_v57  ;;  %v2718_v24 = vpop.xlane.xlu1 %2717 }
 0x45d   : > { %v2893_v16 = vmul.f32 %v6620_v56, %v2861_v43  ;;  %v2844_v25 = vsub.f32 2.0, %v2812_v62  ;;  %4397 = vrcp.f32 %v2718_v24  ;;  %3913 = vmatprep.subr.msk.mxu1 %vm1501_vm3, %v6621_v3  ;;  %3958 = vmatpush3.xpose.msk.msra.mxu0 %vm1501_vm3, %v1920_v34  ;;  %v6628_v34 = vld [vmem:[#allocation3_spill] sm:$0xff]  ;;  %v6632_v62 = vld [vmem:[#allocation18_spill] sm:$0xff] }
 0x45e   : > { %v4390_v41 = vpop.eup %4389  ;;  %v1919_v61 = vmul.f32 %v6622_v58, %v1887_v59  ;;  %v1870_v49 = vsub.f32 2.0, %v1838_v22  ;;  %3959 = vmatprep.subr.msk.mxu0 %vm1501_vm3, %v1935_v46 }
 0x45f   : > { %v4392_v54 = vpop.eup %4391  ;;  %3633 = vst.msk [vmem:[%s5906_s20 + $0x120] sm:$0xff] %vm1501_vm3, %v2893_v16  ;;  %v2876_v55 = vmul.f32 %v4386_v35, %v2844_v25  ;;  %v2796_v33 = vmul.f32 %v4390_v41, %v6323_v14  ;;  %v6631_v35 = vld [vmem:[#allocation17_spill] sm:$0xff] }
 0x460   : > { %1951 = vst.msk [vmem:[%s5906_s20 + $0x8] sm:$0xff] %vm1501_vm3, %v1919_v61  ;;  %v1902_v60 = vmul.f32 %v4388_v6, %v1870_v49  ;;  %v1822_v50 = vmul.f32 %v4392_v54, %v6333_v39  ;;  %3914 = vmatpush3.xpose.msk.msra.mxu1 %vm1501_vm3, %v6248_v21  ;;  %v2670_v40 = vpop.xlane.xlu1 %2669 }
 0x461   : > { %v2908_v23 = vmul.f32 %v6623_v9, %v2876_v55  ;;  %v2828_v45 = vsub.f32 2.0, %v2796_v33  ;;  %4399 = vrcp.f32 %v2670_v40  ;;  %3915 = vmatprep.subr.msk.mxu1 %vm1501_vm3, %v6276_v30  ;;  %3960 = vmatpush3.xpose.msk.msra.mxu0 %vm1501_vm3, %v1919_v61 }
 0x462   : > { %v4394_v14 = vpop.eup %4393  ;;  %v1934_v42 = vmul.f32 %v6624_v36, %v1902_v60  ;;  %v1854_v53 = vsub.f32 2.0, %v1822_v50 }
 0x463   : > { %3648 = vst.msk [vmem:[%s5906_s20 + $0x198] sm:$0xff] %vm1501_vm3, %v2908_v23  ;;  %v2860_v39 = vmul.f32 %v4390_v41, %v2828_v45  ;;  %v2811_v21 = vmul.f32 %v4394_v14, %v6348_v44  ;;  %v6627_v44 = vld [vmem:[#allocation15_spill] sm:$0xff]  ;;  %v3372_v41 = vpop.permute.xlu0 %3371 }
 0x464   : > { %1966 = vst.msk [vmem:[%s5906_s20 + $0x80] sm:$0xff] %vm1501_vm3, %v1934_v42  ;;  %v1886_v5 = vmul.f32 %v4392_v54, %v1854_v53  ;;  %3916 = vmatpush3.xpose.msk.msra.mxu1 %vm1501_vm3, %v6301_v19  ;;  %v2715_v30 = vpop.xlane.xlu1 %2714  ;;  %3961 = vmatprep.subr.msk.mxu0 %vm1501_vm3, %v1934_v42 }
 0x465   : > { %v2892_v63 = vmul.f32 %v6625_v27, %v2860_v39  ;;  %v2843_v11 = vsub.f32 2.0, %v2811_v21  ;;  %4401 = vrcp.f32 %v2715_v30  ;;  %3917 = vmatprep.subr.msk.mxu1 %vm1501_vm3, %v6326_v48 }
 0x466   : > { %v4396_v12 = vpop.eup %4395  ;;  %v1918_v0 = vmul.f32 %v6626_v4, %v1886_v5 }
 0x467   : > { %3632 = vst.msk [vmem:[%s5906_s20 + $0x118] sm:$0xff] %vm1501_vm3, %v2892_v63  ;;  %v2875_v7 = vmul.f32 %v4394_v14, %v2843_v11  ;;  %v2795_v15 = vmul.f32 %v4396_v12, %v2673_v37 }
 0x468   : > { %1950 = vst.msk [vmem:[%s5906_s20] sm:$0xff] %vm1501_vm3, %v1918_v0  ;;  %3918 = vmatpush3.xpose.msk.msra.mxu1 %vm1501_vm3, %v6351_v10  ;;  %v2667_v19 = vpop.xlane.xlu1 %2666  ;;  %3962 = vmatpush3.xpose.msk.msra.mxu0 %vm1501_vm3, %v1918_v0  ;;  %v6629_v10 = vld [vmem:[#allocation13_spill] sm:$0xff] }
 0x469   : > { %v2907_v32 = vmul.f32 %v6627_v44, %v2875_v7  ;;  %v2827_v28 = vsub.f32 2.0, %v2795_v15  ;;  %4403 = vrcp.f32 %v2667_v19  ;;  %3919 = vmatprep.subr.msk.mxu1 %vm1501_vm3, %v6370_v20 }
 0x46a   : > { %v4398_v48 = vpop.eup %4397 }
 0x46b   : > { %3647 = vst.msk [vmem:[%s5906_s20 + $0x190] sm:$0xff] %vm1501_vm3, %v2907_v32  ;;  %v2859_v47 = vmul.f32 %v4396_v12, %v2827_v28  ;;  %v2810_v18 = vmul.f32 %v4398_v48, %v2718_v24  ;;  %3964 = vmatmul.mubr.msk.f32.vlgmr.msra.gmra.mxu0 %vm1501_vm3, %v6628_v34  ;;  %v6633_v24 = vld [vmem:[#allocation19_spill] sm:$0xff] }
 0x46c   : > { %3920 = vmatpush3.xpose.msk.msra.mxu1 %vm1501_vm3, %v2893_v16  ;;  %v6634_v16 = vld [vmem:[#allocation22_spill] sm:$0xff] }
 0x46d   : > { %v2891_v26 = vmul.f32 %v6629_v10, %v2859_v47  ;;  %v2842_v38 = vsub.f32 2.0, %v2810_v18  ;;  %3921 = vmatprep.subr.msk.mxu1 %vm1501_vm3, %v2908_v23 }
 0x46e   : > { %v4400_v13 = vpop.eup %4399 }
 0x46f   : > { %3631 = vst.msk [vmem:[%s5906_s20 + $0x110] sm:$0xff] %vm1501_vm3, %v2891_v26  ;;  %v2874_v31 = vmul.f32 %v4398_v48, %v2842_v38  ;;  %v2794_v8 = vmul.f32 %v4400_v13, %v2670_v40 }
 0x470   : > { %3922 = vmatpush3.xpose.msk.msra.mxu1 %vm1501_vm3, %v2892_v63 }
 0x471   : > { %v2906_v17 = vmul.f32 %v6630_v29, %v2874_v31  ;;  %v2826_v37 = vsub.f32 2.0, %v2794_v8  ;;  %3923 = vmatprep.subr.msk.mxu1 %vm1501_vm3, %v2907_v32 }
 0x472   : > { %v4402_v1 = vpop.eup %4401 }
 0x473   : > { %3646 = vst.msk [vmem:[%s5906_s20 + $0x188] sm:$0xff] %vm1501_vm3, %v2906_v17  ;;  %v2858_v20 = vmul.f32 %v4400_v13, %v2826_v37  ;;  %v2809_v2 = vmul.f32 %v4402_v1, %v2715_v30 }
 0x474   : > { %3924 = vmatpush3.xpose.msk.msra.mxu1 %vm1501_vm3, %v2891_v26 }
 0x475   : > { %v2890_v51 = vmul.f32 %v6631_v35, %v2858_v20  ;;  %v2841_v46 = vsub.f32 2.0, %v2809_v2  ;;  %3925 = vmatprep.subr.msk.mxu1 %vm1501_vm3, %v2906_v17 }
 0x476   : > { %v4404_v52 = vpop.eup %4403 }
 0x477   : > { %3630 = vst.msk [vmem:[%s5906_s20 + $0x108] sm:$0xff] %vm1501_vm3, %v2890_v51  ;;  %v2873_v6 = vmul.f32 %v4402_v1, %v2841_v46  ;;  %v2793_v43 = vmul.f32 %v4404_v52, %v2667_v19 }
 0x478   : > { %3926 = vmatpush3.xpose.msk.msra.mxu1 %vm1501_vm3, %v2890_v51 }
 0x479   : > { %v2905_v59 = vmul.f32 %v6632_v62, %v2873_v6  ;;  %v2825_v22 = vsub.f32 2.0, %v2793_v43 }
 0x47b   : > { %3645 = vst.msk [vmem:[%s5906_s20 + $0x180] sm:$0xff] %vm1501_vm3, %v2905_v59  ;;  %v2857_v57 = vmul.f32 %v4404_v52, %v2825_v22  ;;  %3927 = vmatprep.subr.msk.mxu1 %vm1501_vm3, %v2905_v59 }
 0x47d   : > { %v2889_v56 = vmul.f32 %v6633_v24, %v2857_v57 }
 0x47f   : > { %3629 = vst.msk [vmem:[%s5906_s20 + $0x100] sm:$0xff] %vm1501_vm3, %v2889_v56  ;;  %3928 = vmatpush3.xpose.msk.msra.mxu1 %vm1501_vm3, %v2889_v56 }
 0x482   : > { %3930 = vmatmul.mubr.msk.f32.vlgmr.msra.gmra.mxu1 %vm1501_vm3, %v6634_v16 }
 0x52b   : > { %v3363_v25 = vpop.f32.mrf.mxu0 }
 0x52d   : > { %v3365_v61 = vpop.f32.mrf.mxu0 }
 0x542   : > { %v3193_v3 = vpop.f32.mrf.mxu1 }
 0x543   : > { %v3364_v58 = vadd.f32 %v3363_v25, %v3193_v3 }
 0x544   : > { %v3195_v49 = vpop.f32.mrf.mxu1 }
 0x545   : > { %v3374_v54 = vadd.f32 %v3372_v41, %v3364_v58  ;;  %v3366_v55 = vadd.f32 %v3365_v61, %v3195_v49 }
 0x547   : > { %3376 = vst [vmem:[%s414_s25] sm:$0xff] %v3374_v54  ;;  %v3375_v33 = vadd.f32 %v3372_v41, %v3366_v55 }
 0x549   : > { %3377 = vst [vmem:[%s414_s25 + $0x8] sm:$0xff] %v3375_v33 }
 0x54a PF: > { %s22_s17 = sadd.s32 1, %s4411_s17  }
 0x54b   : > { %p19_p4 = scmp.ge.s32.totalorder %s22_s17, 4  }
 0x54d   :  { %21 = sbr.rel (!%p19_p4) target bundleno = 1 (0x1), region = 107 }

</bundles_post_ra>
